<compile_context>
chip_gen: v5e
topology: v5e:2x2
jax: 0.10.0
libtpu: 0.0.40
codegen_flags: <defaults>
</compile_context>

<pallas_src>
import functools
import math

import jax
import jax.numpy as jnp
import numpy as np
from jax.experimental import pallas as pl
from jax.experimental.pallas import tpu as pltpu

EPS = 1e-5
GROWTH_RATE = 32
BLOCK_CONFIG = (3, 2, 2)
BN_SIZES = (2, 3, 4)
FMAX = 128  # max channel width reached by the model; all math padded to it


# ----------------------------------------------------------------------------
# Static layer plan
# ----------------------------------------------------------------------------
def _layer_plan(num_input_features):
    """(fin, fout, out_col_offset) for every GraphConvBn, in execution order."""
    plan = [(num_input_features, 32, 0)]                  # conv0
    width = 32
    for num_res, bn_size in zip(BLOCK_CONFIG, BN_SIZES):
        mid = int(GROWTH_RATE * bn_size)
        for _ in range(num_res):
            plan.append((width, mid, 0))                  # ResLayer.conv1
            plan.append((mid, GROWTH_RATE, width))        # ResLayer.conv2 (shifted)
            width += GROWTH_RATE
        plan.append((width, width // 2, 0))               # transition
        width //= 2
    assert width <= FMAX
    assert all(fin <= FMAX and off + fout <= FMAX for fin, fout, off in plan)
    return plan, width


# ----------------------------------------------------------------------------
# Fused forward kernel (whole network in one pallas_call)
# ----------------------------------------------------------------------------
def _fused_graph_resnet_kernel(x_ref, a_ref, p_ref, w_cat_ref, gamma_ref,
                               beta_ref, cls_w_ref, cls_b_ref, o_ref):
    a_bf = a_ref[...]                                     # [N, N] bf16 (0/1 exact)

    def gcbn(x_in, l):
        """GraphConv(add) + NodeLevelBatchNorm(train) + ReLU at padded width.

        The two GraphConv matmuls are fused into one K=256 MXU contraction:
            agg @ w_rel + x @ w_root == concat([agg, x], -1) @ W_cat[l].
        The conv bias is omitted: train-mode BN mean subtraction cancels it.
        """
        x_bf = x_in.astype(jnp.bfloat16)
        agg = jnp.dot(a_bf, x_bf, preferred_element_type=jnp.float32)
        lhs = jnp.concatenate([agg.astype(jnp.bfloat16), x_bf], axis=1)  # [N, 256]
        h = jnp.dot(lhs, w_cat_ref[l], preferred_element_type=jnp.float32)
        # Batch stats over the node dim (single-pass, biased variance), f32.
        mean = jnp.mean(h, axis=0, keepdims=True)
        var = jnp.maximum(
            jnp.mean(h * h, axis=0, keepdims=True) - mean * mean, 0.0)
        # Folded BN affine: two full-width VPU passes (mul, add) instead of 4.
        s = gamma_ref[l] * jax.lax.rsqrt(var + EPS)       # [1, 128]
        t = beta_ref[l] - mean * s                        # [1, 128]
        return jnp.maximum(h * s + t, 0.0)

    li = 0
    buf = gcbn(x_ref[...], li); li += 1                   # conv0
    for num_res in BLOCK_CONFIG:
        for _ in range(num_res):                          # ResLayer
            h = gcbn(buf, li); li += 1                    # conv1
            h = gcbn(h, li); li += 1                      # conv2 (column-shifted)
            buf = buf + h                                 # == torch.cat([x_in, h], 1)
        buf = gcbn(buf, li); li += 1                      # transition

    # global_mean_pool + Linear classifier (padded, lane-dense output).
    pooled = jnp.dot(p_ref[...], buf.astype(jnp.bfloat16),
                     preferred_element_type=jnp.float32)
    o_ref[...] = (jnp.dot(pooled.astype(jnp.bfloat16), cls_w_ref[...],
                          preferred_element_type=jnp.float32)
                  + cls_b_ref[...])


def _vmem_spec():
    return pl.BlockSpec(memory_space=pltpu.MemorySpace.VMEM)


def graph_resnet_forward(params, x, a, p):
    n, fin = x.shape
    bsz = p.shape[0]
    num_layers = params["w_cat"].shape[0]

    # Zero-pad node features once to the fixed lane-dense width, pre-cast bf16.
    x_pad = (jnp.zeros((n, FMAX), jnp.bfloat16)
             .at[:, :fin].set(x.astype(jnp.bfloat16)))
    args = (x_pad, a.astype(jnp.bfloat16), p.astype(jnp.bfloat16),
            params["w_cat"], params["gamma"], params["beta"],
            params["cls_w"], params["cls_b"])

    flops = (num_layers * (2 * n * n * FMAX + 2 * n * (2 * FMAX) * FMAX)
             + 2 * bsz * n * FMAX + 2 * bsz * FMAX * FMAX)
    bytes_accessed = int(sum(v.size * v.dtype.itemsize for v in args)
                         + bsz * FMAX * 4)

    out_pad = pl.pallas_call(
        _fused_graph_resnet_kernel,
        out_shape=jax.ShapeDtypeStruct((bsz, FMAX), jnp.float32),
        in_specs=[_vmem_spec() for _ in args],
        out_specs=_vmem_spec(),
        cost_estimate=pl.CostEstimate(flops=flops,
                                      transcendentals=num_layers * FMAX,
                                      bytes_accessed=bytes_accessed),
    )(*args)
    return out_pad[:, :params["out_dim"]]


# ----------------------------------------------------------------------------
# Parameter construction (PyTorch-like init, packed into padded bf16 stacks)
# ----------------------------------------------------------------------------
def init_graph_resnet(key, num_input_features, out_dim):
    plan, final_width = _layer_plan(num_input_features)
    num_layers = len(plan)
    # W_cat[l] = [[w_rel[l]], [w_root[l]]]  -> single K=256 contraction per layer.
    w_cat = np.zeros((num_layers, 2 * FMAX, FMAX), np.float32)
    gamma = np.zeros((num_layers, FMAX), np.float32)      # dense [L, 128]
    beta = np.zeros((num_layers, FMAX), np.float32)

    keys = jax.random.split(key, 2 * num_layers + 2)
    for l, (fin, fout, off) in enumerate(plan):
        s = 1.0 / math.sqrt(fin)
        w_cat[l, :fin, off:off + fout] = np.asarray(            # w_rel
            jax.random.uniform(keys[2 * l + 0], (fin, fout), jnp.float32, -s, s))
        w_cat[l, FMAX:FMAX + fin, off:off + fout] = np.asarray(  # w_root
            jax.random.uniform(keys[2 * l + 1], (fin, fout), jnp.float32, -s, s))
        gamma[l, off:off + fout] = 1.0           # BN weight; beta stays 0
        # NOTE: the GraphConv bias is intentionally NOT materialized — it is
        # exactly cancelled by the train-mode BatchNorm mean subtraction.

    s = 1.0 / math.sqrt(final_width)
    cls_w = np.zeros((FMAX, FMAX), np.float32)
    cls_b = np.zeros((1, FMAX), np.float32)
    cls_w[:final_width, :out_dim] = np.asarray(
        jax.random.uniform(keys[-2], (final_width, out_dim), jnp.float32, -s, s))
    cls_b[0, :out_dim] = np.asarray(
        jax.random.uniform(keys[-1], (out_dim,), jnp.float32, -s, s))

    return {
        "w_cat": jnp.asarray(w_cat, jnp.bfloat16),
        "gamma": jnp.asarray(gamma, jnp.float32),
        "beta": jnp.asarray(beta, jnp.float32),
        "cls_w": jnp.asarray(cls_w, jnp.bfloat16),
        "cls_b": jnp.asarray(cls_b, jnp.float32),
        "out_dim": out_dim,
        "num_input_features": num_input_features,
        "final_width": final_width,
    }


# ----------------------------------------------------------------------------
# Pure-JAX reference (explicit concat, unpadded weights, BN affine included,
# same bf16 matmul operands; bias omitted because BN cancels it exactly)
# ----------------------------------------------------------------------------
def graph_resnet_reference(params, x, a, p):
    plan, final_width = _layer_plan(params["num_input_features"])
    a_bf = a.astype(jnp.bfloat16)

    def gcbn(x_in, l, fin, fout, off):
        w_rel = params["w_cat"][l, :fin, off:off + fout]
        w_root = params["w_cat"][l, FMAX:FMAX + fin, off:off + fout]
        g = params["gamma"][l, off:off + fout]
        b = params["beta"][l, off:off + fout]
        x_bf = x_in.astype(jnp.bfloat16)
        agg = jnp.dot(a_bf, x_bf, preferred_element_type=jnp.float32)
        h = (jnp.dot(agg.astype(jnp.bfloat16), w_rel, preferred_element_type=jnp.float32)
             + jnp.dot(x_bf, w_root, preferred_element_type=jnp.float32))
        mean = jnp.mean(h, axis=0, keepdims=True)
        var = jnp.mean((h - mean) ** 2, axis=0, keepdims=True)
        y = (h - mean) * jax.lax.rsqrt(var + EPS) * g + b
        return jnp.maximum(y, 0.0)

    li = 0
    fin, fout, off = plan[li]
    buf = gcbn(x, li, fin, fout, off); li += 1
    for num_res in BLOCK_CONFIG:
        for _ in range(num_res):
            fin, fout, off = plan[li]
            h = gcbn(buf, li, fin, fout, off); li += 1
            fin, fout, off = plan[li]
            h = gcbn(h, li, fin, fout, off); li += 1
            buf = jnp.concatenate([buf, h], axis=1)
        fin, fout, off = plan[li]
        buf = gcbn(buf, li, fin, fout, off); li += 1

    pooled = jnp.dot(p.astype(jnp.bfloat16), buf.astype(jnp.bfloat16),
                     preferred_element_type=jnp.float32)
    cls_w = params["cls_w"][:final_width, :params["out_dim"]]
    cls_b = params["cls_b"][0, :params["out_dim"]]
    return jnp.dot(pooled.astype(jnp.bfloat16), cls_w,
                   preferred_element_type=jnp.float32) + cls_b


# ----------------------------------------------------------------------------
# Synthetic graph construction (dense A, dense mean-pool matrix)
# ----------------------------------------------------------------------------
def build_ring_adjacency(nodes_per_graph, num_graphs):
    n = nodes_per_graph * num_graphs
    a = np.zeros((n, n), np.float32)
    for g in range(num_graphs):
        base = g * nodes_per_graph
        for k in range(nodes_per_graph):
            i = base + k
            j = base + (k + 1) % nodes_per_graph
            a[i, j] = 1.0
            a[j, i] = 1.0
    return jnp.asarray(a)


def build_mean_pool_matrix(nodes_per_graph, num_graphs):
    n = nodes_per_graph * num_graphs
    p = np.zeros((num_graphs, n), np.float32)
    for g in range(num_graphs):
        p[g, g * nodes_per_graph:(g + 1) * nodes_per_graph] = 1.0 / nodes_per_graph
    return jnp.asarray(p)


if __name__ == "__main__":
    NUM_GRAPHS = 2
    NODES_PER_GRAPH = 16
    NUM_NODES = NUM_GRAPHS * NODES_PER_GRAPH            # 32 nodes total
    NUM_INPUT_FEATURES = 16
    OUT_DIM = 8

    key = jax.random.PRNGKey(0)
    k_x, k_params = jax.random.split(key)

    x = jax.random.normal(k_x, (NUM_NODES, NUM_INPUT_FEATURES), jnp.float32)
    a = build_ring_adjacency(NODES_PER_GRAPH, NUM_GRAPHS)
    p = build_mean_pool_matrix(NODES_PER_GRAPH, NUM_GRAPHS)

    params = init_graph_resnet(k_params, NUM_INPUT_FEATURES, OUT_DIM)

    fwd = jax.jit(functools.partial(graph_resnet_forward, params))
    out = jax.block_until_ready(fwd(x, a, p))

    assert out.shape == (NUM_GRAPHS, OUT_DIM), out.shape
    assert bool(jnp.all(jnp.isfinite(out)))

    # Validate the fused / K=256-packed / column-shifted-concat kernel against
    # an explicit-concat pure-JAX reference with matching bf16 matmul operands.
    ref = jax.block_until_ready(
        jax.jit(functools.partial(graph_resnet_reference, params))(x, a, p))
    assert bool(jnp.allclose(out, ref, atol=2e-2, rtol=2e-2)), (out, ref)

    print("KERNEL_OK")
</pallas_src>

<mosaic_0001>
module attributes {stable_mosaic.version = 11 : i64} {
  func.func @_fused_graph_resnet_kernel(%arg0: memref<32x128xbf16, #tpu.memory_space<vmem>>, %arg1: memref<32x32xbf16, #tpu.memory_space<vmem>>, %arg2: memref<2x32xbf16, #tpu.memory_space<vmem>>, %arg3: memref<18x256x128xbf16, #tpu.memory_space<vmem>>, %arg4: memref<18x128xf32, #tpu.memory_space<vmem>>, %arg5: memref<18x128xf32, #tpu.memory_space<vmem>>, %arg6: memref<128x128xbf16, #tpu.memory_space<vmem>>, %arg7: memref<1x128xf32, #tpu.memory_space<vmem>>, %arg8: memref<2x128xf32, #tpu.memory_space<vmem>>) attributes {dimension_semantics = [], scalar_prefetch = 0 : i64, scratch_operands = 0 : i64, tpu.core_type = #tpu.core_type<tc>} {
    %c0 = arith.constant 0 : index
    %c0_0 = arith.constant 0 : index
    %0 = vector.load %arg1[%c0, %c0_0] : memref<32x32xbf16, #tpu.memory_space<vmem>>, vector<32x32xbf16>
    %c0_1 = arith.constant 0 : index
    %c0_2 = arith.constant 0 : index
    %1 = vector.load %arg0[%c0_1, %c0_2] : memref<32x128xbf16, #tpu.memory_space<vmem>>, vector<32x128xbf16>
    %cst = arith.constant dense<0.000000e+00> : vector<32x128xf32>
    %2 = tpu.matmul %0, %1, %cst {dimension_numbers = #tpu.dot_dimension_numbers<[1], [0], [0], [1], [0, 0, 1, 1], [], []>} : vector<32x32xbf16>, vector<32x128xbf16>, vector<32x128xf32> -> vector<32x128xf32>
    %3 = arith.truncf %2 : vector<32x128xf32> to vector<32x128xbf16>
    %4 = tpu.concatenate %3, %1 in 1 : vector<32x128xbf16>, vector<32x128xbf16> -> vector<32x256xbf16>
    %c0_3 = arith.constant 0 : index
    %c0_4 = arith.constant 0 : index
    %c0_5 = arith.constant 0 : index
    %5 = vector.load %arg3[%c0_3, %c0_4, %c0_5] : memref<18x256x128xbf16, #tpu.memory_space<vmem>>, vector<1x256x128xbf16>
    %6 = vector.shape_cast %5 : vector<1x256x128xbf16> to vector<256x128xbf16>
    %cst_6 = arith.constant dense<0.000000e+00> : vector<32x128xf32>
    %7 = tpu.matmul %4, %6, %cst_6 {dimension_numbers = #tpu.dot_dimension_numbers<[1], [0], [0], [1], [0, 0, 1, 1], [], []>} : vector<32x256xbf16>, vector<256x128xbf16>, vector<32x128xf32> -> vector<32x128xf32>
    %cst_7 = arith.constant dense<0.000000e+00> : vector<128xf32>
    %8 = vector.multi_reduction <add>, %7, %cst_7 [0] : vector<32x128xf32> to vector<128xf32>
    %9 = vector.shape_cast %8 : vector<128xf32> to vector<1x128xf32>
    %cst_8 = arith.constant 3.200000e+01 : f32
    %10 = vector.broadcast %cst_8 : f32 to vector<1x128xf32>
    %11 = arith.divf %9, %10 : vector<1x128xf32>
    %12 = arith.mulf %7, %7 : vector<32x128xf32>
    %cst_9 = arith.constant dense<0.000000e+00> : vector<128xf32>
    %13 = vector.multi_reduction <add>, %12, %cst_9 [0] : vector<32x128xf32> to vector<128xf32>
    %14 = vector.shape_cast %13 : vector<128xf32> to vector<1x128xf32>
    %cst_10 = arith.constant 3.200000e+01 : f32
    %15 = vector.broadcast %cst_10 : f32 to vector<1x128xf32>
    %16 = arith.divf %14, %15 : vector<1x128xf32>
    %17 = arith.mulf %11, %11 : vector<1x128xf32>
    %18 = arith.subf %16, %17 : vector<1x128xf32>
    %cst_11 = arith.constant 0.000000e+00 : f32
    %19 = vector.broadcast %cst_11 : f32 to vector<1x128xf32>
    %20 = arith.maximumf %18, %19 : vector<1x128xf32>
    %c0_12 = arith.constant 0 : index
    %c0_13 = arith.constant 0 : index
    %21 = vector.load %arg4[%c0_12, %c0_13] : memref<18x128xf32, #tpu.memory_space<vmem>>, vector<1x128xf32>
    %22 = vector.shape_cast %21 : vector<1x128xf32> to vector<128xf32>
    %cst_14 = arith.constant 9.99999974E-6 : f32
    %23 = vector.broadcast %cst_14 : f32 to vector<1x128xf32>
    %24 = arith.addf %20, %23 : vector<1x128xf32>
    %25 = math.rsqrt %24 : vector<1x128xf32>
    %26 = vector.shape_cast %22 : vector<128xf32> to vector<1x128xf32>
    %27 = arith.mulf %26, %25 : vector<1x128xf32>
    %c0_15 = arith.constant 0 : index
    %c0_16 = arith.constant 0 : index
    %28 = vector.load %arg5[%c0_15, %c0_16] : memref<18x128xf32, #tpu.memory_space<vmem>>, vector<1x128xf32>
    %29 = vector.shape_cast %28 : vector<1x128xf32> to vector<128xf32>
    %30 = arith.mulf %11, %27 : vector<1x128xf32>
    %31 = vector.shape_cast %29 : vector<128xf32> to vector<1x128xf32>
    %32 = arith.subf %31, %30 : vector<1x128xf32>
    %33 = vector.broadcast %27 : vector<1x128xf32> to vector<32x128xf32>
    %34 = arith.mulf %7, %33 : vector<32x128xf32>
    %35 = vector.broadcast %32 : vector<1x128xf32> to vector<32x128xf32>
    %36 = arith.addf %34, %35 : vector<32x128xf32>
    %cst_17 = arith.constant 0.000000e+00 : f32
    %37 = vector.broadcast %cst_17 : f32 to vector<32x128xf32>
    %38 = arith.maximumf %36, %37 : vector<32x128xf32>
    %39 = arith.truncf %38 : vector<32x128xf32> to vector<32x128xbf16>
    %cst_18 = arith.constant dense<0.000000e+00> : vector<32x128xf32>
    %40 = tpu.matmul %0, %39, %cst_18 {dimension_numbers = #tpu.dot_dimension_numbers<[1], [0], [0], [1], [0, 0, 1, 1], [], []>} : vector<32x32xbf16>, vector<32x128xbf16>, vector<32x128xf32> -> vector<32x128xf32>
    %41 = arith.truncf %40 : vector<32x128xf32> to vector<32x128xbf16>
    %42 = tpu.concatenate %41, %39 in 1 : vector<32x128xbf16>, vector<32x128xbf16> -> vector<32x256xbf16>
    %c1 = arith.constant 1 : index
    %c0_19 = arith.constant 0 : index
    %c0_20 = arith.constant 0 : index
    %43 = vector.load %arg3[%c1, %c0_19, %c0_20] : memref<18x256x128xbf16, #tpu.memory_space<vmem>>, vector<1x256x128xbf16>
    %44 = vector.shape_cast %43 : vector<1x256x128xbf16> to vector<256x128xbf16>
    %cst_21 = arith.constant dense<0.000000e+00> : vector<32x128xf32>
    %45 = tpu.matmul %42, %44, %cst_21 {dimension_numbers = #tpu.dot_dimension_numbers<[1], [0], [0], [1], [0, 0, 1, 1], [], []>} : vector<32x256xbf16>, vector<256x128xbf16>, vector<32x128xf32> -> vector<32x128xf32>
    %cst_22 = arith.constant dense<0.000000e+00> : vector<128xf32>
    %46 = vector.multi_reduction <add>, %45, %cst_22 [0] : vector<32x128xf32> to vector<128xf32>
    %47 = vector.shape_cast %46 : vector<128xf32> to vector<1x128xf32>
    %cst_23 = arith.constant 3.200000e+01 : f32
    %48 = vector.broadcast %cst_23 : f32 to vector<1x128xf32>
    %49 = arith.divf %47, %48 : vector<1x128xf32>
    %50 = arith.mulf %45, %45 : vector<32x128xf32>
    %cst_24 = arith.constant dense<0.000000e+00> : vector<128xf32>
    %51 = vector.multi_reduction <add>, %50, %cst_24 [0] : vector<32x128xf32> to vector<128xf32>
    %52 = vector.shape_cast %51 : vector<128xf32> to vector<1x128xf32>
    %cst_25 = arith.constant 3.200000e+01 : f32
    %53 = vector.broadcast %cst_25 : f32 to vector<1x128xf32>
    %54 = arith.divf %52, %53 : vector<1x128xf32>
    %55 = arith.mulf %49, %49 : vector<1x128xf32>
    %56 = arith.subf %54, %55 : vector<1x128xf32>
    %cst_26 = arith.constant 0.000000e+00 : f32
    %57 = vector.broadcast %cst_26 : f32 to vector<1x128xf32>
    %58 = arith.maximumf %56, %57 : vector<1x128xf32>
    %c1_27 = arith.constant 1 : index
    %c0_28 = arith.constant 0 : index
    %59 = vector.load %arg4[%c1_27, %c0_28] : memref<18x128xf32, #tpu.memory_space<vmem>>, vector<1x128xf32>
    %60 = vector.shape_cast %59 : vector<1x128xf32> to vector<128xf32>
    %cst_29 = arith.constant 9.99999974E-6 : f32
    %61 = vector.broadcast %cst_29 : f32 to vector<1x128xf32>
    %62 = arith.addf %58, %61 : vector<1x128xf32>
    %63 = math.rsqrt %62 : vector<1x128xf32>
    %64 = vector.shape_cast %60 : vector<128xf32> to vector<1x128xf32>
    %65 = arith.mulf %64, %63 : vector<1x128xf32>
    %c1_30 = arith.constant 1 : index
    %c0_31 = arith.constant 0 : index
    %66 = vector.load %arg5[%c1_30, %c0_31] : memref<18x128xf32, #tpu.memory_space<vmem>>, vector<1x128xf32>
    %67 = vector.shape_cast %66 : vector<1x128xf32> to vector<128xf32>
    %68 = arith.mulf %49, %65 : vector<1x128xf32>
    %69 = vector.shape_cast %67 : vector<128xf32> to vector<1x128xf32>
    %70 = arith.subf %69, %68 : vector<1x128xf32>
    %71 = vector.broadcast %65 : vector<1x128xf32> to vector<32x128xf32>
    %72 = arith.mulf %45, %71 : vector<32x128xf32>
    %73 = vector.broadcast %70 : vector<1x128xf32> to vector<32x128xf32>
    %74 = arith.addf %72, %73 : vector<32x128xf32>
    %cst_32 = arith.constant 0.000000e+00 : f32
    %75 = vector.broadcast %cst_32 : f32 to vector<32x128xf32>
    %76 = arith.maximumf %74, %75 : vector<32x128xf32>
    %77 = arith.truncf %76 : vector<32x128xf32> to vector<32x128xbf16>
    %cst_33 = arith.constant dense<0.000000e+00> : vector<32x128xf32>
    %78 = tpu.matmul %0, %77, %cst_33 {dimension_numbers = #tpu.dot_dimension_numbers<[1], [0], [0], [1], [0, 0, 1, 1], [], []>} : vector<32x32xbf16>, vector<32x128xbf16>, vector<32x128xf32> -> vector<32x128xf32>
    %79 = arith.truncf %78 : vector<32x128xf32> to vector<32x128xbf16>
    %80 = tpu.concatenate %79, %77 in 1 : vector<32x128xbf16>, vector<32x128xbf16> -> vector<32x256xbf16>
    %c2 = arith.constant 2 : index
    %c0_34 = arith.constant 0 : index
    %c0_35 = arith.constant 0 : index
    %81 = vector.load %arg3[%c2, %c0_34, %c0_35] : memref<18x256x128xbf16, #tpu.memory_space<vmem>>, vector<1x256x128xbf16>
    %82 = vector.shape_cast %81 : vector<1x256x128xbf16> to vector<256x128xbf16>
    %cst_36 = arith.constant dense<0.000000e+00> : vector<32x128xf32>
    %83 = tpu.matmul %80, %82, %cst_36 {dimension_numbers = #tpu.dot_dimension_numbers<[1], [0], [0], [1], [0, 0, 1, 1], [], []>} : vector<32x256xbf16>, vector<256x128xbf16>, vector<32x128xf32> -> vector<32x128xf32>
    %cst_37 = arith.constant dense<0.000000e+00> : vector<128xf32>
    %84 = vector.multi_reduction <add>, %83, %cst_37 [0] : vector<32x128xf32> to vector<128xf32>
    %85 = vector.shape_cast %84 : vector<128xf32> to vector<1x128xf32>
    %cst_38 = arith.constant 3.200000e+01 : f32
    %86 = vector.broadcast %cst_38 : f32 to vector<1x128xf32>
    %87 = arith.divf %85, %86 : vector<1x128xf32>
    %88 = arith.mulf %83, %83 : vector<32x128xf32>
    %cst_39 = arith.constant dense<0.000000e+00> : vector<128xf32>
    %89 = vector.multi_reduction <add>, %88, %cst_39 [0] : vector<32x128xf32> to vector<128xf32>
    %90 = vector.shape_cast %89 : vector<128xf32> to vector<1x128xf32>
    %cst_40 = arith.constant 3.200000e+01 : f32
    %91 = vector.broadcast %cst_40 : f32 to vector<1x128xf32>
    %92 = arith.divf %90, %91 : vector<1x128xf32>
    %93 = arith.mulf %87, %87 : vector<1x128xf32>
    %94 = arith.subf %92, %93 : vector<1x128xf32>
    %cst_41 = arith.constant 0.000000e+00 : f32
    %95 = vector.broadcast %cst_41 : f32 to vector<1x128xf32>
    %96 = arith.maximumf %94, %95 : vector<1x128xf32>
    %c2_42 = arith.constant 2 : index
    %c0_43 = arith.constant 0 : index
    %97 = vector.load %arg4[%c2_42, %c0_43] : memref<18x128xf32, #tpu.memory_space<vmem>>, vector<1x128xf32>
    %98 = vector.shape_cast %97 : vector<1x128xf32> to vector<128xf32>
    %cst_44 = arith.constant 9.99999974E-6 : f32
    %99 = vector.broadcast %cst_44 : f32 to vector<1x128xf32>
    %100 = arith.addf %96, %99 : vector<1x128xf32>
    %101 = math.rsqrt %100 : vector<1x128xf32>
    %102 = vector.shape_cast %98 : vector<128xf32> to vector<1x128xf32>
    %103 = arith.mulf %102, %101 : vector<1x128xf32>
    %c2_45 = arith.constant 2 : index
    %c0_46 = arith.constant 0 : index
    %104 = vector.load %arg5[%c2_45, %c0_46] : memref<18x128xf32, #tpu.memory_space<vmem>>, vector<1x128xf32>
    %105 = vector.shape_cast %104 : vector<1x128xf32> to vector<128xf32>
    %106 = arith.mulf %87, %103 : vector<1x128xf32>
    %107 = vector.shape_cast %105 : vector<128xf32> to vector<1x128xf32>
    %108 = arith.subf %107, %106 : vector<1x128xf32>
    %109 = vector.broadcast %103 : vector<1x128xf32> to vector<32x128xf32>
    %110 = arith.mulf %83, %109 : vector<32x128xf32>
    %111 = vector.broadcast %108 : vector<1x128xf32> to vector<32x128xf32>
    %112 = arith.addf %110, %111 : vector<32x128xf32>
    %cst_47 = arith.constant 0.000000e+00 : f32
    %113 = vector.broadcast %cst_47 : f32 to vector<32x128xf32>
    %114 = arith.maximumf %112, %113 : vector<32x128xf32>
    %115 = arith.addf %38, %114 : vector<32x128xf32>
    %116 = arith.truncf %115 : vector<32x128xf32> to vector<32x128xbf16>
    %cst_48 = arith.constant dense<0.000000e+00> : vector<32x128xf32>
    %117 = tpu.matmul %0, %116, %cst_48 {dimension_numbers = #tpu.dot_dimension_numbers<[1], [0], [0], [1], [0, 0, 1, 1], [], []>} : vector<32x32xbf16>, vector<32x128xbf16>, vector<32x128xf32> -> vector<32x128xf32>
    %118 = arith.truncf %117 : vector<32x128xf32> to vector<32x128xbf16>
    %119 = tpu.concatenate %118, %116 in 1 : vector<32x128xbf16>, vector<32x128xbf16> -> vector<32x256xbf16>
    %c3 = arith.constant 3 : index
    %c0_49 = arith.constant 0 : index
    %c0_50 = arith.constant 0 : index
    %120 = vector.load %arg3[%c3, %c0_49, %c0_50] : memref<18x256x128xbf16, #tpu.memory_space<vmem>>, vector<1x256x128xbf16>
    %121 = vector.shape_cast %120 : vector<1x256x128xbf16> to vector<256x128xbf16>
    %cst_51 = arith.constant dense<0.000000e+00> : vector<32x128xf32>
    %122 = tpu.matmul %119, %121, %cst_51 {dimension_numbers = #tpu.dot_dimension_numbers<[1], [0], [0], [1], [0, 0, 1, 1], [], []>} : vector<32x256xbf16>, vector<256x128xbf16>, vector<32x128xf32> -> vector<32x128xf32>
    %cst_52 = arith.constant dense<0.000000e+00> : vector<128xf32>
    %123 = vector.multi_reduction <add>, %122, %cst_52 [0] : vector<32x128xf32> to vector<128xf32>
    %124 = vector.shape_cast %123 : vector<128xf32> to vector<1x128xf32>
    %cst_53 = arith.constant 3.200000e+01 : f32
    %125 = vector.broadcast %cst_53 : f32 to vector<1x128xf32>
    %126 = arith.divf %124, %125 : vector<1x128xf32>
    %127 = arith.mulf %122, %122 : vector<32x128xf32>
    %cst_54 = arith.constant dense<0.000000e+00> : vector<128xf32>
    %128 = vector.multi_reduction <add>, %127, %cst_54 [0] : vector<32x128xf32> to vector<128xf32>
    %129 = vector.shape_cast %128 : vector<128xf32> to vector<1x128xf32>
    %cst_55 = arith.constant 3.200000e+01 : f32
    %130 = vector.broadcast %cst_55 : f32 to vector<1x128xf32>
    %131 = arith.divf %129, %130 : vector<1x128xf32>
    %132 = arith.mulf %126, %126 : vector<1x128xf32>
    %133 = arith.subf %131, %132 : vector<1x128xf32>
    %cst_56 = arith.constant 0.000000e+00 : f32
    %134 = vector.broadcast %cst_56 : f32 to vector<1x128xf32>
    %135 = arith.maximumf %133, %134 : vector<1x128xf32>
    %c3_57 = arith.constant 3 : index
    %c0_58 = arith.constant 0 : index
    %136 = vector.load %arg4[%c3_57, %c0_58] : memref<18x128xf32, #tpu.memory_space<vmem>>, vector<1x128xf32>
    %137 = vector.shape_cast %136 : vector<1x128xf32> to vector<128xf32>
    %cst_59 = arith.constant 9.99999974E-6 : f32
    %138 = vector.broadcast %cst_59 : f32 to vector<1x128xf32>
    %139 = arith.addf %135, %138 : vector<1x128xf32>
    %140 = math.rsqrt %139 : vector<1x128xf32>
    %141 = vector.shape_cast %137 : vector<128xf32> to vector<1x128xf32>
    %142 = arith.mulf %141, %140 : vector<1x128xf32>
    %c3_60 = arith.constant 3 : index
    %c0_61 = arith.constant 0 : index
    %143 = vector.load %arg5[%c3_60, %c0_61] : memref<18x128xf32, #tpu.memory_space<vmem>>, vector<1x128xf32>
    %144 = vector.shape_cast %143 : vector<1x128xf32> to vector<128xf32>
    %145 = arith.mulf %126, %142 : vector<1x128xf32>
    %146 = vector.shape_cast %144 : vector<128xf32> to vector<1x128xf32>
    %147 = arith.subf %146, %145 : vector<1x128xf32>
    %148 = vector.broadcast %142 : vector<1x128xf32> to vector<32x128xf32>
    %149 = arith.mulf %122, %148 : vector<32x128xf32>
    %150 = vector.broadcast %147 : vector<1x128xf32> to vector<32x128xf32>
    %151 = arith.addf %149, %150 : vector<32x128xf32>
    %cst_62 = arith.constant 0.000000e+00 : f32
    %152 = vector.broadcast %cst_62 : f32 to vector<32x128xf32>
    %153 = arith.maximumf %151, %152 : vector<32x128xf32>
    %154 = arith.truncf %153 : vector<32x128xf32> to vector<32x128xbf16>
    %cst_63 = arith.constant dense<0.000000e+00> : vector<32x128xf32>
    %155 = tpu.matmul %0, %154, %cst_63 {dimension_numbers = #tpu.dot_dimension_numbers<[1], [0], [0], [1], [0, 0, 1, 1], [], []>} : vector<32x32xbf16>, vector<32x128xbf16>, vector<32x128xf32> -> vector<32x128xf32>
    %156 = arith.truncf %155 : vector<32x128xf32> to vector<32x128xbf16>
    %157 = tpu.concatenate %156, %154 in 1 : vector<32x128xbf16>, vector<32x128xbf16> -> vector<32x256xbf16>
    %c4 = arith.constant 4 : index
    %c0_64 = arith.constant 0 : index
    %c0_65 = arith.constant 0 : index
    %158 = vector.load %arg3[%c4, %c0_64, %c0_65] : memref<18x256x128xbf16, #tpu.memory_space<vmem>>, vector<1x256x128xbf16>
    %159 = vector.shape_cast %158 : vector<1x256x128xbf16> to vector<256x128xbf16>
    %cst_66 = arith.constant dense<0.000000e+00> : vector<32x128xf32>
    %160 = tpu.matmul %157, %159, %cst_66 {dimension_numbers = #tpu.dot_dimension_numbers<[1], [0], [0], [1], [0, 0, 1, 1], [], []>} : vector<32x256xbf16>, vector<256x128xbf16>, vector<32x128xf32> -> vector<32x128xf32>
    %cst_67 = arith.constant dense<0.000000e+00> : vector<128xf32>
    %161 = vector.multi_reduction <add>, %160, %cst_67 [0] : vector<32x128xf32> to vector<128xf32>
    %162 = vector.shape_cast %161 : vector<128xf32> to vector<1x128xf32>
    %cst_68 = arith.constant 3.200000e+01 : f32
    %163 = vector.broadcast %cst_68 : f32 to vector<1x128xf32>
    %164 = arith.divf %162, %163 : vector<1x128xf32>
    %165 = arith.mulf %160, %160 : vector<32x128xf32>
    %cst_69 = arith.constant dense<0.000000e+00> : vector<128xf32>
    %166 = vector.multi_reduction <add>, %165, %cst_69 [0] : vector<32x128xf32> to vector<128xf32>
    %167 = vector.shape_cast %166 : vector<128xf32> to vector<1x128xf32>
    %cst_70 = arith.constant 3.200000e+01 : f32
    %168 = vector.broadcast %cst_70 : f32 to vector<1x128xf32>
    %169 = arith.divf %167, %168 : vector<1x128xf32>
    %170 = arith.mulf %164, %164 : vector<1x128xf32>
    %171 = arith.subf %169, %170 : vector<1x128xf32>
    %cst_71 = arith.constant 0.000000e+00 : f32
    %172 = vector.broadcast %cst_71 : f32 to vector<1x128xf32>
    %173 = arith.maximumf %171, %172 : vector<1x128xf32>
    %c4_72 = arith.constant 4 : index
    %c0_73 = arith.constant 0 : index
    %174 = vector.load %arg4[%c4_72, %c0_73] : memref<18x128xf32, #tpu.memory_space<vmem>>, vector<1x128xf32>
    %175 = vector.shape_cast %174 : vector<1x128xf32> to vector<128xf32>
    %cst_74 = arith.constant 9.99999974E-6 : f32
    %176 = vector.broadcast %cst_74 : f32 to vector<1x128xf32>
    %177 = arith.addf %173, %176 : vector<1x128xf32>
    %178 = math.rsqrt %177 : vector<1x128xf32>
    %179 = vector.shape_cast %175 : vector<128xf32> to vector<1x128xf32>
    %180 = arith.mulf %179, %178 : vector<1x128xf32>
    %c4_75 = arith.constant 4 : index
    %c0_76 = arith.constant 0 : index
    %181 = vector.load %arg5[%c4_75, %c0_76] : memref<18x128xf32, #tpu.memory_space<vmem>>, vector<1x128xf32>
    %182 = vector.shape_cast %181 : vector<1x128xf32> to vector<128xf32>
    %183 = arith.mulf %164, %180 : vector<1x128xf32>
    %184 = vector.shape_cast %182 : vector<128xf32> to vector<1x128xf32>
    %185 = arith.subf %184, %183 : vector<1x128xf32>
    %186 = vector.broadcast %180 : vector<1x128xf32> to vector<32x128xf32>
    %187 = arith.mulf %160, %186 : vector<32x128xf32>
    %188 = vector.broadcast %185 : vector<1x128xf32> to vector<32x128xf32>
    %189 = arith.addf %187, %188 : vector<32x128xf32>
    %cst_77 = arith.constant 0.000000e+00 : f32
    %190 = vector.broadcast %cst_77 : f32 to vector<32x128xf32>
    %191 = arith.maximumf %189, %190 : vector<32x128xf32>
    %192 = arith.addf %115, %191 : vector<32x128xf32>
    %193 = arith.truncf %192 : vector<32x128xf32> to vector<32x128xbf16>
    %cst_78 = arith.constant dense<0.000000e+00> : vector<32x128xf32>
    %194 = tpu.matmul %0, %193, %cst_78 {dimension_numbers = #tpu.dot_dimension_numbers<[1], [0], [0], [1], [0, 0, 1, 1], [], []>} : vector<32x32xbf16>, vector<32x128xbf16>, vector<32x128xf32> -> vector<32x128xf32>
    %195 = arith.truncf %194 : vector<32x128xf32> to vector<32x128xbf16>
    %196 = tpu.concatenate %195, %193 in 1 : vector<32x128xbf16>, vector<32x128xbf16> -> vector<32x256xbf16>
    %c5 = arith.constant 5 : index
    %c0_79 = arith.constant 0 : index
    %c0_80 = arith.constant 0 : index
    %197 = vector.load %arg3[%c5, %c0_79, %c0_80] : memref<18x256x128xbf16, #tpu.memory_space<vmem>>, vector<1x256x128xbf16>
    %198 = vector.shape_cast %197 : vector<1x256x128xbf16> to vector<256x128xbf16>
    %cst_81 = arith.constant dense<0.000000e+00> : vector<32x128xf32>
    %199 = tpu.matmul %196, %198, %cst_81 {dimension_numbers = #tpu.dot_dimension_numbers<[1], [0], [0], [1], [0, 0, 1, 1], [], []>} : vector<32x256xbf16>, vector<256x128xbf16>, vector<32x128xf32> -> vector<32x128xf32>
    %cst_82 = arith.constant dense<0.000000e+00> : vector<128xf32>
    %200 = vector.multi_reduction <add>, %199, %cst_82 [0] : vector<32x128xf32> to vector<128xf32>
    %201 = vector.shape_cast %200 : vector<128xf32> to vector<1x128xf32>
    %cst_83 = arith.constant 3.200000e+01 : f32
    %202 = vector.broadcast %cst_83 : f32 to vector<1x128xf32>
    %203 = arith.divf %201, %202 : vector<1x128xf32>
    %204 = arith.mulf %199, %199 : vector<32x128xf32>
    %cst_84 = arith.constant dense<0.000000e+00> : vector<128xf32>
    %205 = vector.multi_reduction <add>, %204, %cst_84 [0] : vector<32x128xf32> to vector<128xf32>
    %206 = vector.shape_cast %205 : vector<128xf32> to vector<1x128xf32>
    %cst_85 = arith.constant 3.200000e+01 : f32
    %207 = vector.broadcast %cst_85 : f32 to vector<1x128xf32>
    %208 = arith.divf %206, %207 : vector<1x128xf32>
    %209 = arith.mulf %203, %203 : vector<1x128xf32>
    %210 = arith.subf %208, %209 : vector<1x128xf32>
    %cst_86 = arith.constant 0.000000e+00 : f32
    %211 = vector.broadcast %cst_86 : f32 to vector<1x128xf32>
    %212 = arith.maximumf %210, %211 : vector<1x128xf32>
    %c5_87 = arith.constant 5 : index
    %c0_88 = arith.constant 0 : index
    %213 = vector.load %arg4[%c5_87, %c0_88] : memref<18x128xf32, #tpu.memory_space<vmem>>, vector<1x128xf32>
    %214 = vector.shape_cast %213 : vector<1x128xf32> to vector<128xf32>
    %cst_89 = arith.constant 9.99999974E-6 : f32
    %215 = vector.broadcast %cst_89 : f32 to vector<1x128xf32>
    %216 = arith.addf %212, %215 : vector<1x128xf32>
    %217 = math.rsqrt %216 : vector<1x128xf32>
    %218 = vector.shape_cast %214 : vector<128xf32> to vector<1x128xf32>
    %219 = arith.mulf %218, %217 : vector<1x128xf32>
    %c5_90 = arith.constant 5 : index
    %c0_91 = arith.constant 0 : index
    %220 = vector.load %arg5[%c5_90, %c0_91] : memref<18x128xf32, #tpu.memory_space<vmem>>, vector<1x128xf32>
    %221 = vector.shape_cast %220 : vector<1x128xf32> to vector<128xf32>
    %222 = arith.mulf %203, %219 : vector<1x128xf32>
    %223 = vector.shape_cast %221 : vector<128xf32> to vector<1x128xf32>
    %224 = arith.subf %223, %222 : vector<1x128xf32>
    %225 = vector.broadcast %219 : vector<1x128xf32> to vector<32x128xf32>
    %226 = arith.mulf %199, %225 : vector<32x128xf32>
    %227 = vector.broadcast %224 : vector<1x128xf32> to vector<32x128xf32>
    %228 = arith.addf %226, %227 : vector<32x128xf32>
    %cst_92 = arith.constant 0.000000e+00 : f32
    %229 = vector.broadcast %cst_92 : f32 to vector<32x128xf32>
    %230 = arith.maximumf %228, %229 : vector<32x128xf32>
    %231 = arith.truncf %230 : vector<32x128xf32> to vector<32x128xbf16>
    %cst_93 = arith.constant dense<0.000000e+00> : vector<32x128xf32>
    %232 = tpu.matmul %0, %231, %cst_93 {dimension_numbers = #tpu.dot_dimension_numbers<[1], [0], [0], [1], [0, 0, 1, 1], [], []>} : vector<32x32xbf16>, vector<32x128xbf16>, vector<32x128xf32> -> vector<32x128xf32>
    %233 = arith.truncf %232 : vector<32x128xf32> to vector<32x128xbf16>
    %234 = tpu.concatenate %233, %231 in 1 : vector<32x128xbf16>, vector<32x128xbf16> -> vector<32x256xbf16>
    %c6 = arith.constant 6 : index
    %c0_94 = arith.constant 0 : index
    %c0_95 = arith.constant 0 : index
    %235 = vector.load %arg3[%c6, %c0_94, %c0_95] : memref<18x256x128xbf16, #tpu.memory_space<vmem>>, vector<1x256x128xbf16>
    %236 = vector.shape_cast %235 : vector<1x256x128xbf16> to vector<256x128xbf16>
    %cst_96 = arith.constant dense<0.000000e+00> : vector<32x128xf32>
    %237 = tpu.matmul %234, %236, %cst_96 {dimension_numbers = #tpu.dot_dimension_numbers<[1], [0], [0], [1], [0, 0, 1, 1], [], []>} : vector<32x256xbf16>, vector<256x128xbf16>, vector<32x128xf32> -> vector<32x128xf32>
    %cst_97 = arith.constant dense<0.000000e+00> : vector<128xf32>
    %238 = vector.multi_reduction <add>, %237, %cst_97 [0] : vector<32x128xf32> to vector<128xf32>
    %239 = vector.shape_cast %238 : vector<128xf32> to vector<1x128xf32>
    %cst_98 = arith.constant 3.200000e+01 : f32
    %240 = vector.broadcast %cst_98 : f32 to vector<1x128xf32>
    %241 = arith.divf %239, %240 : vector<1x128xf32>
    %242 = arith.mulf %237, %237 : vector<32x128xf32>
    %cst_99 = arith.constant dense<0.000000e+00> : vector<128xf32>
    %243 = vector.multi_reduction <add>, %242, %cst_99 [0] : vector<32x128xf32> to vector<128xf32>
    %244 = vector.shape_cast %243 : vector<128xf32> to vector<1x128xf32>
    %cst_100 = arith.constant 3.200000e+01 : f32
    %245 = vector.broadcast %cst_100 : f32 to vector<1x128xf32>
    %246 = arith.divf %244, %245 : vector<1x128xf32>
    %247 = arith.mulf %241, %241 : vector<1x128xf32>
    %248 = arith.subf %246, %247 : vector<1x128xf32>
    %cst_101 = arith.constant 0.000000e+00 : f32
    %249 = vector.broadcast %cst_101 : f32 to vector<1x128xf32>
    %250 = arith.maximumf %248, %249 : vector<1x128xf32>
    %c6_102 = arith.constant 6 : index
    %c0_103 = arith.constant 0 : index
    %251 = vector.load %arg4[%c6_102, %c0_103] : memref<18x128xf32, #tpu.memory_space<vmem>>, vector<1x128xf32>
    %252 = vector.shape_cast %251 : vector<1x128xf32> to vector<128xf32>
    %cst_104 = arith.constant 9.99999974E-6 : f32
    %253 = vector.broadcast %cst_104 : f32 to vector<1x128xf32>
    %254 = arith.addf %250, %253 : vector<1x128xf32>
    %255 = math.rsqrt %254 : vector<1x128xf32>
    %256 = vector.shape_cast %252 : vector<128xf32> to vector<1x128xf32>
    %257 = arith.mulf %256, %255 : vector<1x128xf32>
    %c6_105 = arith.constant 6 : index
    %c0_106 = arith.constant 0 : index
    %258 = vector.load %arg5[%c6_105, %c0_106] : memref<18x128xf32, #tpu.memory_space<vmem>>, vector<1x128xf32>
    %259 = vector.shape_cast %258 : vector<1x128xf32> to vector<128xf32>
    %260 = arith.mulf %241, %257 : vector<1x128xf32>
    %261 = vector.shape_cast %259 : vector<128xf32> to vector<1x128xf32>
    %262 = arith.subf %261, %260 : vector<1x128xf32>
    %263 = vector.broadcast %257 : vector<1x128xf32> to vector<32x128xf32>
    %264 = arith.mulf %237, %263 : vector<32x128xf32>
    %265 = vector.broadcast %262 : vector<1x128xf32> to vector<32x128xf32>
    %266 = arith.addf %264, %265 : vector<32x128xf32>
    %cst_107 = arith.constant 0.000000e+00 : f32
    %267 = vector.broadcast %cst_107 : f32 to vector<32x128xf32>
    %268 = arith.maximumf %266, %267 : vector<32x128xf32>
    %269 = arith.addf %192, %268 : vector<32x128xf32>
    %270 = arith.truncf %269 : vector<32x128xf32> to vector<32x128xbf16>
    %cst_108 = arith.constant dense<0.000000e+00> : vector<32x128xf32>
    %271 = tpu.matmul %0, %270, %cst_108 {dimension_numbers = #tpu.dot_dimension_numbers<[1], [0], [0], [1], [0, 0, 1, 1], [], []>} : vector<32x32xbf16>, vector<32x128xbf16>, vector<32x128xf32> -> vector<32x128xf32>
    %272 = arith.truncf %271 : vector<32x128xf32> to vector<32x128xbf16>
    %273 = tpu.concatenate %272, %270 in 1 : vector<32x128xbf16>, vector<32x128xbf16> -> vector<32x256xbf16>
    %c7 = arith.constant 7 : index
    %c0_109 = arith.constant 0 : index
    %c0_110 = arith.constant 0 : index
    %274 = vector.load %arg3[%c7, %c0_109, %c0_110] : memref<18x256x128xbf16, #tpu.memory_space<vmem>>, vector<1x256x128xbf16>
    %275 = vector.shape_cast %274 : vector<1x256x128xbf16> to vector<256x128xbf16>
    %cst_111 = arith.constant dense<0.000000e+00> : vector<32x128xf32>
    %276 = tpu.matmul %273, %275, %cst_111 {dimension_numbers = #tpu.dot_dimension_numbers<[1], [0], [0], [1], [0, 0, 1, 1], [], []>} : vector<32x256xbf16>, vector<256x128xbf16>, vector<32x128xf32> -> vector<32x128xf32>
    %cst_112 = arith.constant dense<0.000000e+00> : vector<128xf32>
    %277 = vector.multi_reduction <add>, %276, %cst_112 [0] : vector<32x128xf32> to vector<128xf32>
    %278 = vector.shape_cast %277 : vector<128xf32> to vector<1x128xf32>
    %cst_113 = arith.constant 3.200000e+01 : f32
    %279 = vector.broadcast %cst_113 : f32 to vector<1x128xf32>
    %280 = arith.divf %278, %279 : vector<1x128xf32>
    %281 = arith.mulf %276, %276 : vector<32x128xf32>
    %cst_114 = arith.constant dense<0.000000e+00> : vector<128xf32>
    %282 = vector.multi_reduction <add>, %281, %cst_114 [0] : vector<32x128xf32> to vector<128xf32>
    %283 = vector.shape_cast %282 : vector<128xf32> to vector<1x128xf32>
    %cst_115 = arith.constant 3.200000e+01 : f32
    %284 = vector.broadcast %cst_115 : f32 to vector<1x128xf32>
    %285 = arith.divf %283, %284 : vector<1x128xf32>
    %286 = arith.mulf %280, %280 : vector<1x128xf32>
    %287 = arith.subf %285, %286 : vector<1x128xf32>
    %cst_116 = arith.constant 0.000000e+00 : f32
    %288 = vector.broadcast %cst_116 : f32 to vector<1x128xf32>
    %289 = arith.maximumf %287, %288 : vector<1x128xf32>
    %c7_117 = arith.constant 7 : index
    %c0_118 = arith.constant 0 : index
    %290 = vector.load %arg4[%c7_117, %c0_118] : memref<18x128xf32, #tpu.memory_space<vmem>>, vector<1x128xf32>
    %291 = vector.shape_cast %290 : vector<1x128xf32> to vector<128xf32>
    %cst_119 = arith.constant 9.99999974E-6 : f32
    %292 = vector.broadcast %cst_119 : f32 to vector<1x128xf32>
    %293 = arith.addf %289, %292 : vector<1x128xf32>
    %294 = math.rsqrt %293 : vector<1x128xf32>
    %295 = vector.shape_cast %291 : vector<128xf32> to vector<1x128xf32>
    %296 = arith.mulf %295, %294 : vector<1x128xf32>
    %c7_120 = arith.constant 7 : index
    %c0_121 = arith.constant 0 : index
    %297 = vector.load %arg5[%c7_120, %c0_121] : memref<18x128xf32, #tpu.memory_space<vmem>>, vector<1x128xf32>
    %298 = vector.shape_cast %297 : vector<1x128xf32> to vector<128xf32>
    %299 = arith.mulf %280, %296 : vector<1x128xf32>
    %300 = vector.shape_cast %298 : vector<128xf32> to vector<1x128xf32>
    %301 = arith.subf %300, %299 : vector<1x128xf32>
    %302 = vector.broadcast %296 : vector<1x128xf32> to vector<32x128xf32>
    %303 = arith.mulf %276, %302 : vector<32x128xf32>
    %304 = vector.broadcast %301 : vector<1x128xf32> to vector<32x128xf32>
    %305 = arith.addf %303, %304 : vector<32x128xf32>
    %cst_122 = arith.constant 0.000000e+00 : f32
    %306 = vector.broadcast %cst_122 : f32 to vector<32x128xf32>
    %307 = arith.maximumf %305, %306 : vector<32x128xf32>
    %308 = arith.truncf %307 : vector<32x128xf32> to vector<32x128xbf16>
    %cst_123 = arith.constant dense<0.000000e+00> : vector<32x128xf32>
    %309 = tpu.matmul %0, %308, %cst_123 {dimension_numbers = #tpu.dot_dimension_numbers<[1], [0], [0], [1], [0, 0, 1, 1], [], []>} : vector<32x32xbf16>, vector<32x128xbf16>, vector<32x128xf32> -> vector<32x128xf32>
    %310 = arith.truncf %309 : vector<32x128xf32> to vector<32x128xbf16>
    %311 = tpu.concatenate %310, %308 in 1 : vector<32x128xbf16>, vector<32x128xbf16> -> vector<32x256xbf16>
    %c8 = arith.constant 8 : index
    %c0_124 = arith.constant 0 : index
    %c0_125 = arith.constant 0 : index
    %312 = vector.load %arg3[%c8, %c0_124, %c0_125] : memref<18x256x128xbf16, #tpu.memory_space<vmem>>, vector<1x256x128xbf16>
    %313 = vector.shape_cast %312 : vector<1x256x128xbf16> to vector<256x128xbf16>
    %cst_126 = arith.constant dense<0.000000e+00> : vector<32x128xf32>
    %314 = tpu.matmul %311, %313, %cst_126 {dimension_numbers = #tpu.dot_dimension_numbers<[1], [0], [0], [1], [0, 0, 1, 1], [], []>} : vector<32x256xbf16>, vector<256x128xbf16>, vector<32x128xf32> -> vector<32x128xf32>
    %cst_127 = arith.constant dense<0.000000e+00> : vector<128xf32>
    %315 = vector.multi_reduction <add>, %314, %cst_127 [0] : vector<32x128xf32> to vector<128xf32>
    %316 = vector.shape_cast %315 : vector<128xf32> to vector<1x128xf32>
    %cst_128 = arith.constant 3.200000e+01 : f32
    %317 = vector.broadcast %cst_128 : f32 to vector<1x128xf32>
    %318 = arith.divf %316, %317 : vector<1x128xf32>
    %319 = arith.mulf %314, %314 : vector<32x128xf32>
    %cst_129 = arith.constant dense<0.000000e+00> : vector<128xf32>
    %320 = vector.multi_reduction <add>, %319, %cst_129 [0] : vector<32x128xf32> to vector<128xf32>
    %321 = vector.shape_cast %320 : vector<128xf32> to vector<1x128xf32>
    %cst_130 = arith.constant 3.200000e+01 : f32
    %322 = vector.broadcast %cst_130 : f32 to vector<1x128xf32>
    %323 = arith.divf %321, %322 : vector<1x128xf32>
    %324 = arith.mulf %318, %318 : vector<1x128xf32>
    %325 = arith.subf %323, %324 : vector<1x128xf32>
    %cst_131 = arith.constant 0.000000e+00 : f32
    %326 = vector.broadcast %cst_131 : f32 to vector<1x128xf32>
    %327 = arith.maximumf %325, %326 : vector<1x128xf32>
    %c8_132 = arith.constant 8 : index
    %c0_133 = arith.constant 0 : index
    %328 = vector.load %arg4[%c8_132, %c0_133] : memref<18x128xf32, #tpu.memory_space<vmem>>, vector<1x128xf32>
    %329 = vector.shape_cast %328 : vector<1x128xf32> to vector<128xf32>
    %cst_134 = arith.constant 9.99999974E-6 : f32
    %330 = vector.broadcast %cst_134 : f32 to vector<1x128xf32>
    %331 = arith.addf %327, %330 : vector<1x128xf32>
    %332 = math.rsqrt %331 : vector<1x128xf32>
    %333 = vector.shape_cast %329 : vector<128xf32> to vector<1x128xf32>
    %334 = arith.mulf %333, %332 : vector<1x128xf32>
    %c8_135 = arith.constant 8 : index
    %c0_136 = arith.constant 0 : index
    %335 = vector.load %arg5[%c8_135, %c0_136] : memref<18x128xf32, #tpu.memory_space<vmem>>, vector<1x128xf32>
    %336 = vector.shape_cast %335 : vector<1x128xf32> to vector<128xf32>
    %337 = arith.mulf %318, %334 : vector<1x128xf32>
    %338 = vector.shape_cast %336 : vector<128xf32> to vector<1x128xf32>
    %339 = arith.subf %338, %337 : vector<1x128xf32>
    %340 = vector.broadcast %334 : vector<1x128xf32> to vector<32x128xf32>
    %341 = arith.mulf %314, %340 : vector<32x128xf32>
    %342 = vector.broadcast %339 : vector<1x128xf32> to vector<32x128xf32>
    %343 = arith.addf %341, %342 : vector<32x128xf32>
    %cst_137 = arith.constant 0.000000e+00 : f32
    %344 = vector.broadcast %cst_137 : f32 to vector<32x128xf32>
    %345 = arith.maximumf %343, %344 : vector<32x128xf32>
    %346 = arith.truncf %345 : vector<32x128xf32> to vector<32x128xbf16>
    %cst_138 = arith.constant dense<0.000000e+00> : vector<32x128xf32>
    %347 = tpu.matmul %0, %346, %cst_138 {dimension_numbers = #tpu.dot_dimension_numbers<[1], [0], [0], [1], [0, 0, 1, 1], [], []>} : vector<32x32xbf16>, vector<32x128xbf16>, vector<32x128xf32> -> vector<32x128xf32>
    %348 = arith.truncf %347 : vector<32x128xf32> to vector<32x128xbf16>
    %349 = tpu.concatenate %348, %346 in 1 : vector<32x128xbf16>, vector<32x128xbf16> -> vector<32x256xbf16>
    %c9 = arith.constant 9 : index
    %c0_139 = arith.constant 0 : index
    %c0_140 = arith.constant 0 : index
    %350 = vector.load %arg3[%c9, %c0_139, %c0_140] : memref<18x256x128xbf16, #tpu.memory_space<vmem>>, vector<1x256x128xbf16>
    %351 = vector.shape_cast %350 : vector<1x256x128xbf16> to vector<256x128xbf16>
    %cst_141 = arith.constant dense<0.000000e+00> : vector<32x128xf32>
    %352 = tpu.matmul %349, %351, %cst_141 {dimension_numbers = #tpu.dot_dimension_numbers<[1], [0], [0], [1], [0, 0, 1, 1], [], []>} : vector<32x256xbf16>, vector<256x128xbf16>, vector<32x128xf32> -> vector<32x128xf32>
    %cst_142 = arith.constant dense<0.000000e+00> : vector<128xf32>
    %353 = vector.multi_reduction <add>, %352, %cst_142 [0] : vector<32x128xf32> to vector<128xf32>
    %354 = vector.shape_cast %353 : vector<128xf32> to vector<1x128xf32>
    %cst_143 = arith.constant 3.200000e+01 : f32
    %355 = vector.broadcast %cst_143 : f32 to vector<1x128xf32>
    %356 = arith.divf %354, %355 : vector<1x128xf32>
    %357 = arith.mulf %352, %352 : vector<32x128xf32>
    %cst_144 = arith.constant dense<0.000000e+00> : vector<128xf32>
    %358 = vector.multi_reduction <add>, %357, %cst_144 [0] : vector<32x128xf32> to vector<128xf32>
    %359 = vector.shape_cast %358 : vector<128xf32> to vector<1x128xf32>
    %cst_145 = arith.constant 3.200000e+01 : f32
    %360 = vector.broadcast %cst_145 : f32 to vector<1x128xf32>
    %361 = arith.divf %359, %360 : vector<1x128xf32>
    %362 = arith.mulf %356, %356 : vector<1x128xf32>
    %363 = arith.subf %361, %362 : vector<1x128xf32>
    %cst_146 = arith.constant 0.000000e+00 : f32
    %364 = vector.broadcast %cst_146 : f32 to vector<1x128xf32>
    %365 = arith.maximumf %363, %364 : vector<1x128xf32>
    %c9_147 = arith.constant 9 : index
    %c0_148 = arith.constant 0 : index
    %366 = vector.load %arg4[%c9_147, %c0_148] : memref<18x128xf32, #tpu.memory_space<vmem>>, vector<1x128xf32>
    %367 = vector.shape_cast %366 : vector<1x128xf32> to vector<128xf32>
    %cst_149 = arith.constant 9.99999974E-6 : f32
    %368 = vector.broadcast %cst_149 : f32 to vector<1x128xf32>
    %369 = arith.addf %365, %368 : vector<1x128xf32>
    %370 = math.rsqrt %369 : vector<1x128xf32>
    %371 = vector.shape_cast %367 : vector<128xf32> to vector<1x128xf32>
    %372 = arith.mulf %371, %370 : vector<1x128xf32>
    %c9_150 = arith.constant 9 : index
    %c0_151 = arith.constant 0 : index
    %373 = vector.load %arg5[%c9_150, %c0_151] : memref<18x128xf32, #tpu.memory_space<vmem>>, vector<1x128xf32>
    %374 = vector.shape_cast %373 : vector<1x128xf32> to vector<128xf32>
    %375 = arith.mulf %356, %372 : vector<1x128xf32>
    %376 = vector.shape_cast %374 : vector<128xf32> to vector<1x128xf32>
    %377 = arith.subf %376, %375 : vector<1x128xf32>
    %378 = vector.broadcast %372 : vector<1x128xf32> to vector<32x128xf32>
    %379 = arith.mulf %352, %378 : vector<32x128xf32>
    %380 = vector.broadcast %377 : vector<1x128xf32> to vector<32x128xf32>
    %381 = arith.addf %379, %380 : vector<32x128xf32>
    %cst_152 = arith.constant 0.000000e+00 : f32
    %382 = vector.broadcast %cst_152 : f32 to vector<32x128xf32>
    %383 = arith.maximumf %381, %382 : vector<32x128xf32>
    %384 = arith.addf %307, %383 : vector<32x128xf32>
    %385 = arith.truncf %384 : vector<32x128xf32> to vector<32x128xbf16>
    %cst_153 = arith.constant dense<0.000000e+00> : vector<32x128xf32>
    %386 = tpu.matmul %0, %385, %cst_153 {dimension_numbers = #tpu.dot_dimension_numbers<[1], [0], [0], [1], [0, 0, 1, 1], [], []>} : vector<32x32xbf16>, vector<32x128xbf16>, vector<32x128xf32> -> vector<32x128xf32>
    %387 = arith.truncf %386 : vector<32x128xf32> to vector<32x128xbf16>
    %388 = tpu.concatenate %387, %385 in 1 : vector<32x128xbf16>, vector<32x128xbf16> -> vector<32x256xbf16>
    %c10 = arith.constant 10 : index
    %c0_154 = arith.constant 0 : index
    %c0_155 = arith.constant 0 : index
    %389 = vector.load %arg3[%c10, %c0_154, %c0_155] : memref<18x256x128xbf16, #tpu.memory_space<vmem>>, vector<1x256x128xbf16>
    %390 = vector.shape_cast %389 : vector<1x256x128xbf16> to vector<256x128xbf16>
    %cst_156 = arith.constant dense<0.000000e+00> : vector<32x128xf32>
    %391 = tpu.matmul %388, %390, %cst_156 {dimension_numbers = #tpu.dot_dimension_numbers<[1], [0], [0], [1], [0, 0, 1, 1], [], []>} : vector<32x256xbf16>, vector<256x128xbf16>, vector<32x128xf32> -> vector<32x128xf32>
    %cst_157 = arith.constant dense<0.000000e+00> : vector<128xf32>
    %392 = vector.multi_reduction <add>, %391, %cst_157 [0] : vector<32x128xf32> to vector<128xf32>
    %393 = vector.shape_cast %392 : vector<128xf32> to vector<1x128xf32>
    %cst_158 = arith.constant 3.200000e+01 : f32
    %394 = vector.broadcast %cst_158 : f32 to vector<1x128xf32>
    %395 = arith.divf %393, %394 : vector<1x128xf32>
    %396 = arith.mulf %391, %391 : vector<32x128xf32>
    %cst_159 = arith.constant dense<0.000000e+00> : vector<128xf32>
    %397 = vector.multi_reduction <add>, %396, %cst_159 [0] : vector<32x128xf32> to vector<128xf32>
    %398 = vector.shape_cast %397 : vector<128xf32> to vector<1x128xf32>
    %cst_160 = arith.constant 3.200000e+01 : f32
    %399 = vector.broadcast %cst_160 : f32 to vector<1x128xf32>
    %400 = arith.divf %398, %399 : vector<1x128xf32>
    %401 = arith.mulf %395, %395 : vector<1x128xf32>
    %402 = arith.subf %400, %401 : vector<1x128xf32>
    %cst_161 = arith.constant 0.000000e+00 : f32
    %403 = vector.broadcast %cst_161 : f32 to vector<1x128xf32>
    %404 = arith.maximumf %402, %403 : vector<1x128xf32>
    %c10_162 = arith.constant 10 : index
    %c0_163 = arith.constant 0 : index
    %405 = vector.load %arg4[%c10_162, %c0_163] : memref<18x128xf32, #tpu.memory_space<vmem>>, vector<1x128xf32>
    %406 = vector.shape_cast %405 : vector<1x128xf32> to vector<128xf32>
    %cst_164 = arith.constant 9.99999974E-6 : f32
    %407 = vector.broadcast %cst_164 : f32 to vector<1x128xf32>
    %408 = arith.addf %404, %407 : vector<1x128xf32>
    %409 = math.rsqrt %408 : vector<1x128xf32>
    %410 = vector.shape_cast %406 : vector<128xf32> to vector<1x128xf32>
    %411 = arith.mulf %410, %409 : vector<1x128xf32>
    %c10_165 = arith.constant 10 : index
    %c0_166 = arith.constant 0 : index
    %412 = vector.load %arg5[%c10_165, %c0_166] : memref<18x128xf32, #tpu.memory_space<vmem>>, vector<1x128xf32>
    %413 = vector.shape_cast %412 : vector<1x128xf32> to vector<128xf32>
    %414 = arith.mulf %395, %411 : vector<1x128xf32>
    %415 = vector.shape_cast %413 : vector<128xf32> to vector<1x128xf32>
    %416 = arith.subf %415, %414 : vector<1x128xf32>
    %417 = vector.broadcast %411 : vector<1x128xf32> to vector<32x128xf32>
    %418 = arith.mulf %391, %417 : vector<32x128xf32>
    %419 = vector.broadcast %416 : vector<1x128xf32> to vector<32x128xf32>
    %420 = arith.addf %418, %419 : vector<32x128xf32>
    %cst_167 = arith.constant 0.000000e+00 : f32
    %421 = vector.broadcast %cst_167 : f32 to vector<32x128xf32>
    %422 = arith.maximumf %420, %421 : vector<32x128xf32>
    %423 = arith.truncf %422 : vector<32x128xf32> to vector<32x128xbf16>
    %cst_168 = arith.constant dense<0.000000e+00> : vector<32x128xf32>
    %424 = tpu.matmul %0, %423, %cst_168 {dimension_numbers = #tpu.dot_dimension_numbers<[1], [0], [0], [1], [0, 0, 1, 1], [], []>} : vector<32x32xbf16>, vector<32x128xbf16>, vector<32x128xf32> -> vector<32x128xf32>
    %425 = arith.truncf %424 : vector<32x128xf32> to vector<32x128xbf16>
    %426 = tpu.concatenate %425, %423 in 1 : vector<32x128xbf16>, vector<32x128xbf16> -> vector<32x256xbf16>
    %c11 = arith.constant 11 : index
    %c0_169 = arith.constant 0 : index
    %c0_170 = arith.constant 0 : index
    %427 = vector.load %arg3[%c11, %c0_169, %c0_170] : memref<18x256x128xbf16, #tpu.memory_space<vmem>>, vector<1x256x128xbf16>
    %428 = vector.shape_cast %427 : vector<1x256x128xbf16> to vector<256x128xbf16>
    %cst_171 = arith.constant dense<0.000000e+00> : vector<32x128xf32>
    %429 = tpu.matmul %426, %428, %cst_171 {dimension_numbers = #tpu.dot_dimension_numbers<[1], [0], [0], [1], [0, 0, 1, 1], [], []>} : vector<32x256xbf16>, vector<256x128xbf16>, vector<32x128xf32> -> vector<32x128xf32>
    %cst_172 = arith.constant dense<0.000000e+00> : vector<128xf32>
    %430 = vector.multi_reduction <add>, %429, %cst_172 [0] : vector<32x128xf32> to vector<128xf32>
    %431 = vector.shape_cast %430 : vector<128xf32> to vector<1x128xf32>
    %cst_173 = arith.constant 3.200000e+01 : f32
    %432 = vector.broadcast %cst_173 : f32 to vector<1x128xf32>
    %433 = arith.divf %431, %432 : vector<1x128xf32>
    %434 = arith.mulf %429, %429 : vector<32x128xf32>
    %cst_174 = arith.constant dense<0.000000e+00> : vector<128xf32>
    %435 = vector.multi_reduction <add>, %434, %cst_174 [0] : vector<32x128xf32> to vector<128xf32>
    %436 = vector.shape_cast %435 : vector<128xf32> to vector<1x128xf32>
    %cst_175 = arith.constant 3.200000e+01 : f32
    %437 = vector.broadcast %cst_175 : f32 to vector<1x128xf32>
    %438 = arith.divf %436, %437 : vector<1x128xf32>
    %439 = arith.mulf %433, %433 : vector<1x128xf32>
    %440 = arith.subf %438, %439 : vector<1x128xf32>
    %cst_176 = arith.constant 0.000000e+00 : f32
    %441 = vector.broadcast %cst_176 : f32 to vector<1x128xf32>
    %442 = arith.maximumf %440, %441 : vector<1x128xf32>
    %c11_177 = arith.constant 11 : index
    %c0_178 = arith.constant 0 : index
    %443 = vector.load %arg4[%c11_177, %c0_178] : memref<18x128xf32, #tpu.memory_space<vmem>>, vector<1x128xf32>
    %444 = vector.shape_cast %443 : vector<1x128xf32> to vector<128xf32>
    %cst_179 = arith.constant 9.99999974E-6 : f32
    %445 = vector.broadcast %cst_179 : f32 to vector<1x128xf32>
    %446 = arith.addf %442, %445 : vector<1x128xf32>
    %447 = math.rsqrt %446 : vector<1x128xf32>
    %448 = vector.shape_cast %444 : vector<128xf32> to vector<1x128xf32>
    %449 = arith.mulf %448, %447 : vector<1x128xf32>
    %c11_180 = arith.constant 11 : index
    %c0_181 = arith.constant 0 : index
    %450 = vector.load %arg5[%c11_180, %c0_181] : memref<18x128xf32, #tpu.memory_space<vmem>>, vector<1x128xf32>
    %451 = vector.shape_cast %450 : vector<1x128xf32> to vector<128xf32>
    %452 = arith.mulf %433, %449 : vector<1x128xf32>
    %453 = vector.shape_cast %451 : vector<128xf32> to vector<1x128xf32>
    %454 = arith.subf %453, %452 : vector<1x128xf32>
    %455 = vector.broadcast %449 : vector<1x128xf32> to vector<32x128xf32>
    %456 = arith.mulf %429, %455 : vector<32x128xf32>
    %457 = vector.broadcast %454 : vector<1x128xf32> to vector<32x128xf32>
    %458 = arith.addf %456, %457 : vector<32x128xf32>
    %cst_182 = arith.constant 0.000000e+00 : f32
    %459 = vector.broadcast %cst_182 : f32 to vector<32x128xf32>
    %460 = arith.maximumf %458, %459 : vector<32x128xf32>
    %461 = arith.addf %384, %460 : vector<32x128xf32>
    %462 = arith.truncf %461 : vector<32x128xf32> to vector<32x128xbf16>
    %cst_183 = arith.constant dense<0.000000e+00> : vector<32x128xf32>
    %463 = tpu.matmul %0, %462, %cst_183 {dimension_numbers = #tpu.dot_dimension_numbers<[1], [0], [0], [1], [0, 0, 1, 1], [], []>} : vector<32x32xbf16>, vector<32x128xbf16>, vector<32x128xf32> -> vector<32x128xf32>
    %464 = arith.truncf %463 : vector<32x128xf32> to vector<32x128xbf16>
    %465 = tpu.concatenate %464, %462 in 1 : vector<32x128xbf16>, vector<32x128xbf16> -> vector<32x256xbf16>
    %c12 = arith.constant 12 : index
    %c0_184 = arith.constant 0 : index
    %c0_185 = arith.constant 0 : index
    %466 = vector.load %arg3[%c12, %c0_184, %c0_185] : memref<18x256x128xbf16, #tpu.memory_space<vmem>>, vector<1x256x128xbf16>
    %467 = vector.shape_cast %466 : vector<1x256x128xbf16> to vector<256x128xbf16>
    %cst_186 = arith.constant dense<0.000000e+00> : vector<32x128xf32>
    %468 = tpu.matmul %465, %467, %cst_186 {dimension_numbers = #tpu.dot_dimension_numbers<[1], [0], [0], [1], [0, 0, 1, 1], [], []>} : vector<32x256xbf16>, vector<256x128xbf16>, vector<32x128xf32> -> vector<32x128xf32>
    %cst_187 = arith.constant dense<0.000000e+00> : vector<128xf32>
    %469 = vector.multi_reduction <add>, %468, %cst_187 [0] : vector<32x128xf32> to vector<128xf32>
    %470 = vector.shape_cast %469 : vector<128xf32> to vector<1x128xf32>
    %cst_188 = arith.constant 3.200000e+01 : f32
    %471 = vector.broadcast %cst_188 : f32 to vector<1x128xf32>
    %472 = arith.divf %470, %471 : vector<1x128xf32>
    %473 = arith.mulf %468, %468 : vector<32x128xf32>
    %cst_189 = arith.constant dense<0.000000e+00> : vector<128xf32>
    %474 = vector.multi_reduction <add>, %473, %cst_189 [0] : vector<32x128xf32> to vector<128xf32>
    %475 = vector.shape_cast %474 : vector<128xf32> to vector<1x128xf32>
    %cst_190 = arith.constant 3.200000e+01 : f32
    %476 = vector.broadcast %cst_190 : f32 to vector<1x128xf32>
    %477 = arith.divf %475, %476 : vector<1x128xf32>
    %478 = arith.mulf %472, %472 : vector<1x128xf32>
    %479 = arith.subf %477, %478 : vector<1x128xf32>
    %cst_191 = arith.constant 0.000000e+00 : f32
    %480 = vector.broadcast %cst_191 : f32 to vector<1x128xf32>
    %481 = arith.maximumf %479, %480 : vector<1x128xf32>
    %c12_192 = arith.constant 12 : index
    %c0_193 = arith.constant 0 : index
    %482 = vector.load %arg4[%c12_192, %c0_193] : memref<18x128xf32, #tpu.memory_space<vmem>>, vector<1x128xf32>
    %483 = vector.shape_cast %482 : vector<1x128xf32> to vector<128xf32>
    %cst_194 = arith.constant 9.99999974E-6 : f32
    %484 = vector.broadcast %cst_194 : f32 to vector<1x128xf32>
    %485 = arith.addf %481, %484 : vector<1x128xf32>
    %486 = math.rsqrt %485 : vector<1x128xf32>
    %487 = vector.shape_cast %483 : vector<128xf32> to vector<1x128xf32>
    %488 = arith.mulf %487, %486 : vector<1x128xf32>
    %c12_195 = arith.constant 12 : index
    %c0_196 = arith.constant 0 : index
    %489 = vector.load %arg5[%c12_195, %c0_196] : memref<18x128xf32, #tpu.memory_space<vmem>>, vector<1x128xf32>
    %490 = vector.shape_cast %489 : vector<1x128xf32> to vector<128xf32>
    %491 = arith.mulf %472, %488 : vector<1x128xf32>
    %492 = vector.shape_cast %490 : vector<128xf32> to vector<1x128xf32>
    %493 = arith.subf %492, %491 : vector<1x128xf32>
    %494 = vector.broadcast %488 : vector<1x128xf32> to vector<32x128xf32>
    %495 = arith.mulf %468, %494 : vector<32x128xf32>
    %496 = vector.broadcast %493 : vector<1x128xf32> to vector<32x128xf32>
    %497 = arith.addf %495, %496 : vector<32x128xf32>
    %cst_197 = arith.constant 0.000000e+00 : f32
    %498 = vector.broadcast %cst_197 : f32 to vector<32x128xf32>
    %499 = arith.maximumf %497, %498 : vector<32x128xf32>
    %500 = arith.truncf %499 : vector<32x128xf32> to vector<32x128xbf16>
    %cst_198 = arith.constant dense<0.000000e+00> : vector<32x128xf32>
    %501 = tpu.matmul %0, %500, %cst_198 {dimension_numbers = #tpu.dot_dimension_numbers<[1], [0], [0], [1], [0, 0, 1, 1], [], []>} : vector<32x32xbf16>, vector<32x128xbf16>, vector<32x128xf32> -> vector<32x128xf32>
    %502 = arith.truncf %501 : vector<32x128xf32> to vector<32x128xbf16>
    %503 = tpu.concatenate %502, %500 in 1 : vector<32x128xbf16>, vector<32x128xbf16> -> vector<32x256xbf16>
    %c13 = arith.constant 13 : index
    %c0_199 = arith.constant 0 : index
    %c0_200 = arith.constant 0 : index
    %504 = vector.load %arg3[%c13, %c0_199, %c0_200] : memref<18x256x128xbf16, #tpu.memory_space<vmem>>, vector<1x256x128xbf16>
    %505 = vector.shape_cast %504 : vector<1x256x128xbf16> to vector<256x128xbf16>
    %cst_201 = arith.constant dense<0.000000e+00> : vector<32x128xf32>
    %506 = tpu.matmul %503, %505, %cst_201 {dimension_numbers = #tpu.dot_dimension_numbers<[1], [0], [0], [1], [0, 0, 1, 1], [], []>} : vector<32x256xbf16>, vector<256x128xbf16>, vector<32x128xf32> -> vector<32x128xf32>
    %cst_202 = arith.constant dense<0.000000e+00> : vector<128xf32>
    %507 = vector.multi_reduction <add>, %506, %cst_202 [0] : vector<32x128xf32> to vector<128xf32>
    %508 = vector.shape_cast %507 : vector<128xf32> to vector<1x128xf32>
    %cst_203 = arith.constant 3.200000e+01 : f32
    %509 = vector.broadcast %cst_203 : f32 to vector<1x128xf32>
    %510 = arith.divf %508, %509 : vector<1x128xf32>
    %511 = arith.mulf %506, %506 : vector<32x128xf32>
    %cst_204 = arith.constant dense<0.000000e+00> : vector<128xf32>
    %512 = vector.multi_reduction <add>, %511, %cst_204 [0] : vector<32x128xf32> to vector<128xf32>
    %513 = vector.shape_cast %512 : vector<128xf32> to vector<1x128xf32>
    %cst_205 = arith.constant 3.200000e+01 : f32
    %514 = vector.broadcast %cst_205 : f32 to vector<1x128xf32>
    %515 = arith.divf %513, %514 : vector<1x128xf32>
    %516 = arith.mulf %510, %510 : vector<1x128xf32>
    %517 = arith.subf %515, %516 : vector<1x128xf32>
    %cst_206 = arith.constant 0.000000e+00 : f32
    %518 = vector.broadcast %cst_206 : f32 to vector<1x128xf32>
    %519 = arith.maximumf %517, %518 : vector<1x128xf32>
    %c13_207 = arith.constant 13 : index
    %c0_208 = arith.constant 0 : index
    %520 = vector.load %arg4[%c13_207, %c0_208] : memref<18x128xf32, #tpu.memory_space<vmem>>, vector<1x128xf32>
    %521 = vector.shape_cast %520 : vector<1x128xf32> to vector<128xf32>
    %cst_209 = arith.constant 9.99999974E-6 : f32
    %522 = vector.broadcast %cst_209 : f32 to vector<1x128xf32>
    %523 = arith.addf %519, %522 : vector<1x128xf32>
    %524 = math.rsqrt %523 : vector<1x128xf32>
    %525 = vector.shape_cast %521 : vector<128xf32> to vector<1x128xf32>
    %526 = arith.mulf %525, %524 : vector<1x128xf32>
    %c13_210 = arith.constant 13 : index
    %c0_211 = arith.constant 0 : index
    %527 = vector.load %arg5[%c13_210, %c0_211] : memref<18x128xf32, #tpu.memory_space<vmem>>, vector<1x128xf32>
    %528 = vector.shape_cast %527 : vector<1x128xf32> to vector<128xf32>
    %529 = arith.mulf %510, %526 : vector<1x128xf32>
    %530 = vector.shape_cast %528 : vector<128xf32> to vector<1x128xf32>
    %531 = arith.subf %530, %529 : vector<1x128xf32>
    %532 = vector.broadcast %526 : vector<1x128xf32> to vector<32x128xf32>
    %533 = arith.mulf %506, %532 : vector<32x128xf32>
    %534 = vector.broadcast %531 : vector<1x128xf32> to vector<32x128xf32>
    %535 = arith.addf %533, %534 : vector<32x128xf32>
    %cst_212 = arith.constant 0.000000e+00 : f32
    %536 = vector.broadcast %cst_212 : f32 to vector<32x128xf32>
    %537 = arith.maximumf %535, %536 : vector<32x128xf32>
    %538 = arith.truncf %537 : vector<32x128xf32> to vector<32x128xbf16>
    %cst_213 = arith.constant dense<0.000000e+00> : vector<32x128xf32>
    %539 = tpu.matmul %0, %538, %cst_213 {dimension_numbers = #tpu.dot_dimension_numbers<[1], [0], [0], [1], [0, 0, 1, 1], [], []>} : vector<32x32xbf16>, vector<32x128xbf16>, vector<32x128xf32> -> vector<32x128xf32>
    %540 = arith.truncf %539 : vector<32x128xf32> to vector<32x128xbf16>
    %541 = tpu.concatenate %540, %538 in 1 : vector<32x128xbf16>, vector<32x128xbf16> -> vector<32x256xbf16>
    %c14 = arith.constant 14 : index
    %c0_214 = arith.constant 0 : index
    %c0_215 = arith.constant 0 : index
    %542 = vector.load %arg3[%c14, %c0_214, %c0_215] : memref<18x256x128xbf16, #tpu.memory_space<vmem>>, vector<1x256x128xbf16>
    %543 = vector.shape_cast %542 : vector<1x256x128xbf16> to vector<256x128xbf16>
    %cst_216 = arith.constant dense<0.000000e+00> : vector<32x128xf32>
    %544 = tpu.matmul %541, %543, %cst_216 {dimension_numbers = #tpu.dot_dimension_numbers<[1], [0], [0], [1], [0, 0, 1, 1], [], []>} : vector<32x256xbf16>, vector<256x128xbf16>, vector<32x128xf32> -> vector<32x128xf32>
    %cst_217 = arith.constant dense<0.000000e+00> : vector<128xf32>
    %545 = vector.multi_reduction <add>, %544, %cst_217 [0] : vector<32x128xf32> to vector<128xf32>
    %546 = vector.shape_cast %545 : vector<128xf32> to vector<1x128xf32>
    %cst_218 = arith.constant 3.200000e+01 : f32
    %547 = vector.broadcast %cst_218 : f32 to vector<1x128xf32>
    %548 = arith.divf %546, %547 : vector<1x128xf32>
    %549 = arith.mulf %544, %544 : vector<32x128xf32>
    %cst_219 = arith.constant dense<0.000000e+00> : vector<128xf32>
    %550 = vector.multi_reduction <add>, %549, %cst_219 [0] : vector<32x128xf32> to vector<128xf32>
    %551 = vector.shape_cast %550 : vector<128xf32> to vector<1x128xf32>
    %cst_220 = arith.constant 3.200000e+01 : f32
    %552 = vector.broadcast %cst_220 : f32 to vector<1x128xf32>
    %553 = arith.divf %551, %552 : vector<1x128xf32>
    %554 = arith.mulf %548, %548 : vector<1x128xf32>
    %555 = arith.subf %553, %554 : vector<1x128xf32>
    %cst_221 = arith.constant 0.000000e+00 : f32
    %556 = vector.broadcast %cst_221 : f32 to vector<1x128xf32>
    %557 = arith.maximumf %555, %556 : vector<1x128xf32>
    %c14_222 = arith.constant 14 : index
    %c0_223 = arith.constant 0 : index
    %558 = vector.load %arg4[%c14_222, %c0_223] : memref<18x128xf32, #tpu.memory_space<vmem>>, vector<1x128xf32>
    %559 = vector.shape_cast %558 : vector<1x128xf32> to vector<128xf32>
    %cst_224 = arith.constant 9.99999974E-6 : f32
    %560 = vector.broadcast %cst_224 : f32 to vector<1x128xf32>
    %561 = arith.addf %557, %560 : vector<1x128xf32>
    %562 = math.rsqrt %561 : vector<1x128xf32>
    %563 = vector.shape_cast %559 : vector<128xf32> to vector<1x128xf32>
    %564 = arith.mulf %563, %562 : vector<1x128xf32>
    %c14_225 = arith.constant 14 : index
    %c0_226 = arith.constant 0 : index
    %565 = vector.load %arg5[%c14_225, %c0_226] : memref<18x128xf32, #tpu.memory_space<vmem>>, vector<1x128xf32>
    %566 = vector.shape_cast %565 : vector<1x128xf32> to vector<128xf32>
    %567 = arith.mulf %548, %564 : vector<1x128xf32>
    %568 = vector.shape_cast %566 : vector<128xf32> to vector<1x128xf32>
    %569 = arith.subf %568, %567 : vector<1x128xf32>
    %570 = vector.broadcast %564 : vector<1x128xf32> to vector<32x128xf32>
    %571 = arith.mulf %544, %570 : vector<32x128xf32>
    %572 = vector.broadcast %569 : vector<1x128xf32> to vector<32x128xf32>
    %573 = arith.addf %571, %572 : vector<32x128xf32>
    %cst_227 = arith.constant 0.000000e+00 : f32
    %574 = vector.broadcast %cst_227 : f32 to vector<32x128xf32>
    %575 = arith.maximumf %573, %574 : vector<32x128xf32>
    %576 = arith.addf %499, %575 : vector<32x128xf32>
    %577 = arith.truncf %576 : vector<32x128xf32> to vector<32x128xbf16>
    %cst_228 = arith.constant dense<0.000000e+00> : vector<32x128xf32>
    %578 = tpu.matmul %0, %577, %cst_228 {dimension_numbers = #tpu.dot_dimension_numbers<[1], [0], [0], [1], [0, 0, 1, 1], [], []>} : vector<32x32xbf16>, vector<32x128xbf16>, vector<32x128xf32> -> vector<32x128xf32>
    %579 = arith.truncf %578 : vector<32x128xf32> to vector<32x128xbf16>
    %580 = tpu.concatenate %579, %577 in 1 : vector<32x128xbf16>, vector<32x128xbf16> -> vector<32x256xbf16>
    %c15 = arith.constant 15 : index
    %c0_229 = arith.constant 0 : index
    %c0_230 = arith.constant 0 : index
    %581 = vector.load %arg3[%c15, %c0_229, %c0_230] : memref<18x256x128xbf16, #tpu.memory_space<vmem>>, vector<1x256x128xbf16>
    %582 = vector.shape_cast %581 : vector<1x256x128xbf16> to vector<256x128xbf16>
    %cst_231 = arith.constant dense<0.000000e+00> : vector<32x128xf32>
    %583 = tpu.matmul %580, %582, %cst_231 {dimension_numbers = #tpu.dot_dimension_numbers<[1], [0], [0], [1], [0, 0, 1, 1], [], []>} : vector<32x256xbf16>, vector<256x128xbf16>, vector<32x128xf32> -> vector<32x128xf32>
    %cst_232 = arith.constant dense<0.000000e+00> : vector<128xf32>
    %584 = vector.multi_reduction <add>, %583, %cst_232 [0] : vector<32x128xf32> to vector<128xf32>
    %585 = vector.shape_cast %584 : vector<128xf32> to vector<1x128xf32>
    %cst_233 = arith.constant 3.200000e+01 : f32
    %586 = vector.broadcast %cst_233 : f32 to vector<1x128xf32>
    %587 = arith.divf %585, %586 : vector<1x128xf32>
    %588 = arith.mulf %583, %583 : vector<32x128xf32>
    %cst_234 = arith.constant dense<0.000000e+00> : vector<128xf32>
    %589 = vector.multi_reduction <add>, %588, %cst_234 [0] : vector<32x128xf32> to vector<128xf32>
    %590 = vector.shape_cast %589 : vector<128xf32> to vector<1x128xf32>
    %cst_235 = arith.constant 3.200000e+01 : f32
    %591 = vector.broadcast %cst_235 : f32 to vector<1x128xf32>
    %592 = arith.divf %590, %591 : vector<1x128xf32>
    %593 = arith.mulf %587, %587 : vector<1x128xf32>
    %594 = arith.subf %592, %593 : vector<1x128xf32>
    %cst_236 = arith.constant 0.000000e+00 : f32
    %595 = vector.broadcast %cst_236 : f32 to vector<1x128xf32>
    %596 = arith.maximumf %594, %595 : vector<1x128xf32>
    %c15_237 = arith.constant 15 : index
    %c0_238 = arith.constant 0 : index
    %597 = vector.load %arg4[%c15_237, %c0_238] : memref<18x128xf32, #tpu.memory_space<vmem>>, vector<1x128xf32>
    %598 = vector.shape_cast %597 : vector<1x128xf32> to vector<128xf32>
    %cst_239 = arith.constant 9.99999974E-6 : f32
    %599 = vector.broadcast %cst_239 : f32 to vector<1x128xf32>
    %600 = arith.addf %596, %599 : vector<1x128xf32>
    %601 = math.rsqrt %600 : vector<1x128xf32>
    %602 = vector.shape_cast %598 : vector<128xf32> to vector<1x128xf32>
    %603 = arith.mulf %602, %601 : vector<1x128xf32>
    %c15_240 = arith.constant 15 : index
    %c0_241 = arith.constant 0 : index
    %604 = vector.load %arg5[%c15_240, %c0_241] : memref<18x128xf32, #tpu.memory_space<vmem>>, vector<1x128xf32>
    %605 = vector.shape_cast %604 : vector<1x128xf32> to vector<128xf32>
    %606 = arith.mulf %587, %603 : vector<1x128xf32>
    %607 = vector.shape_cast %605 : vector<128xf32> to vector<1x128xf32>
    %608 = arith.subf %607, %606 : vector<1x128xf32>
    %609 = vector.broadcast %603 : vector<1x128xf32> to vector<32x128xf32>
    %610 = arith.mulf %583, %609 : vector<32x128xf32>
    %611 = vector.broadcast %608 : vector<1x128xf32> to vector<32x128xf32>
    %612 = arith.addf %610, %611 : vector<32x128xf32>
    %cst_242 = arith.constant 0.000000e+00 : f32
    %613 = vector.broadcast %cst_242 : f32 to vector<32x128xf32>
    %614 = arith.maximumf %612, %613 : vector<32x128xf32>
    %615 = arith.truncf %614 : vector<32x128xf32> to vector<32x128xbf16>
    %cst_243 = arith.constant dense<0.000000e+00> : vector<32x128xf32>
    %616 = tpu.matmul %0, %615, %cst_243 {dimension_numbers = #tpu.dot_dimension_numbers<[1], [0], [0], [1], [0, 0, 1, 1], [], []>} : vector<32x32xbf16>, vector<32x128xbf16>, vector<32x128xf32> -> vector<32x128xf32>
    %617 = arith.truncf %616 : vector<32x128xf32> to vector<32x128xbf16>
    %618 = tpu.concatenate %617, %615 in 1 : vector<32x128xbf16>, vector<32x128xbf16> -> vector<32x256xbf16>
    %c16 = arith.constant 16 : index
    %c0_244 = arith.constant 0 : index
    %c0_245 = arith.constant 0 : index
    %619 = vector.load %arg3[%c16, %c0_244, %c0_245] : memref<18x256x128xbf16, #tpu.memory_space<vmem>>, vector<1x256x128xbf16>
    %620 = vector.shape_cast %619 : vector<1x256x128xbf16> to vector<256x128xbf16>
    %cst_246 = arith.constant dense<0.000000e+00> : vector<32x128xf32>
    %621 = tpu.matmul %618, %620, %cst_246 {dimension_numbers = #tpu.dot_dimension_numbers<[1], [0], [0], [1], [0, 0, 1, 1], [], []>} : vector<32x256xbf16>, vector<256x128xbf16>, vector<32x128xf32> -> vector<32x128xf32>
    %cst_247 = arith.constant dense<0.000000e+00> : vector<128xf32>
    %622 = vector.multi_reduction <add>, %621, %cst_247 [0] : vector<32x128xf32> to vector<128xf32>
    %623 = vector.shape_cast %622 : vector<128xf32> to vector<1x128xf32>
    %cst_248 = arith.constant 3.200000e+01 : f32
    %624 = vector.broadcast %cst_248 : f32 to vector<1x128xf32>
    %625 = arith.divf %623, %624 : vector<1x128xf32>
    %626 = arith.mulf %621, %621 : vector<32x128xf32>
    %cst_249 = arith.constant dense<0.000000e+00> : vector<128xf32>
    %627 = vector.multi_reduction <add>, %626, %cst_249 [0] : vector<32x128xf32> to vector<128xf32>
    %628 = vector.shape_cast %627 : vector<128xf32> to vector<1x128xf32>
    %cst_250 = arith.constant 3.200000e+01 : f32
    %629 = vector.broadcast %cst_250 : f32 to vector<1x128xf32>
    %630 = arith.divf %628, %629 : vector<1x128xf32>
    %631 = arith.mulf %625, %625 : vector<1x128xf32>
    %632 = arith.subf %630, %631 : vector<1x128xf32>
    %cst_251 = arith.constant 0.000000e+00 : f32
    %633 = vector.broadcast %cst_251 : f32 to vector<1x128xf32>
    %634 = arith.maximumf %632, %633 : vector<1x128xf32>
    %c16_252 = arith.constant 16 : index
    %c0_253 = arith.constant 0 : index
    %635 = vector.load %arg4[%c16_252, %c0_253] : memref<18x128xf32, #tpu.memory_space<vmem>>, vector<1x128xf32>
    %636 = vector.shape_cast %635 : vector<1x128xf32> to vector<128xf32>
    %cst_254 = arith.constant 9.99999974E-6 : f32
    %637 = vector.broadcast %cst_254 : f32 to vector<1x128xf32>
    %638 = arith.addf %634, %637 : vector<1x128xf32>
    %639 = math.rsqrt %638 : vector<1x128xf32>
    %640 = vector.shape_cast %636 : vector<128xf32> to vector<1x128xf32>
    %641 = arith.mulf %640, %639 : vector<1x128xf32>
    %c16_255 = arith.constant 16 : index
    %c0_256 = arith.constant 0 : index
    %642 = vector.load %arg5[%c16_255, %c0_256] : memref<18x128xf32, #tpu.memory_space<vmem>>, vector<1x128xf32>
    %643 = vector.shape_cast %642 : vector<1x128xf32> to vector<128xf32>
    %644 = arith.mulf %625, %641 : vector<1x128xf32>
    %645 = vector.shape_cast %643 : vector<128xf32> to vector<1x128xf32>
    %646 = arith.subf %645, %644 : vector<1x128xf32>
    %647 = vector.broadcast %641 : vector<1x128xf32> to vector<32x128xf32>
    %648 = arith.mulf %621, %647 : vector<32x128xf32>
    %649 = vector.broadcast %646 : vector<1x128xf32> to vector<32x128xf32>
    %650 = arith.addf %648, %649 : vector<32x128xf32>
    %cst_257 = arith.constant 0.000000e+00 : f32
    %651 = vector.broadcast %cst_257 : f32 to vector<32x128xf32>
    %652 = arith.maximumf %650, %651 : vector<32x128xf32>
    %653 = arith.addf %576, %652 : vector<32x128xf32>
    %654 = arith.truncf %653 : vector<32x128xf32> to vector<32x128xbf16>
    %cst_258 = arith.constant dense<0.000000e+00> : vector<32x128xf32>
    %655 = tpu.matmul %0, %654, %cst_258 {dimension_numbers = #tpu.dot_dimension_numbers<[1], [0], [0], [1], [0, 0, 1, 1], [], []>} : vector<32x32xbf16>, vector<32x128xbf16>, vector<32x128xf32> -> vector<32x128xf32>
    %656 = arith.truncf %655 : vector<32x128xf32> to vector<32x128xbf16>
    %657 = tpu.concatenate %656, %654 in 1 : vector<32x128xbf16>, vector<32x128xbf16> -> vector<32x256xbf16>
    %c17 = arith.constant 17 : index
    %c0_259 = arith.constant 0 : index
    %c0_260 = arith.constant 0 : index
    %658 = vector.load %arg3[%c17, %c0_259, %c0_260] : memref<18x256x128xbf16, #tpu.memory_space<vmem>>, vector<1x256x128xbf16>
    %659 = vector.shape_cast %658 : vector<1x256x128xbf16> to vector<256x128xbf16>
    %cst_261 = arith.constant dense<0.000000e+00> : vector<32x128xf32>
    %660 = tpu.matmul %657, %659, %cst_261 {dimension_numbers = #tpu.dot_dimension_numbers<[1], [0], [0], [1], [0, 0, 1, 1], [], []>} : vector<32x256xbf16>, vector<256x128xbf16>, vector<32x128xf32> -> vector<32x128xf32>
    %cst_262 = arith.constant dense<0.000000e+00> : vector<128xf32>
    %661 = vector.multi_reduction <add>, %660, %cst_262 [0] : vector<32x128xf32> to vector<128xf32>
    %662 = vector.shape_cast %661 : vector<128xf32> to vector<1x128xf32>
    %cst_263 = arith.constant 3.200000e+01 : f32
    %663 = vector.broadcast %cst_263 : f32 to vector<1x128xf32>
    %664 = arith.divf %662, %663 : vector<1x128xf32>
    %665 = arith.mulf %660, %660 : vector<32x128xf32>
    %cst_264 = arith.constant dense<0.000000e+00> : vector<128xf32>
    %666 = vector.multi_reduction <add>, %665, %cst_264 [0] : vector<32x128xf32> to vector<128xf32>
    %667 = vector.shape_cast %666 : vector<128xf32> to vector<1x128xf32>
    %cst_265 = arith.constant 3.200000e+01 : f32
    %668 = vector.broadcast %cst_265 : f32 to vector<1x128xf32>
    %669 = arith.divf %667, %668 : vector<1x128xf32>
    %670 = arith.mulf %664, %664 : vector<1x128xf32>
    %671 = arith.subf %669, %670 : vector<1x128xf32>
    %cst_266 = arith.constant 0.000000e+00 : f32
    %672 = vector.broadcast %cst_266 : f32 to vector<1x128xf32>
    %673 = arith.maximumf %671, %672 : vector<1x128xf32>
    %c17_267 = arith.constant 17 : index
    %c0_268 = arith.constant 0 : index
    %674 = vector.load %arg4[%c17_267, %c0_268] : memref<18x128xf32, #tpu.memory_space<vmem>>, vector<1x128xf32>
    %675 = vector.shape_cast %674 : vector<1x128xf32> to vector<128xf32>
    %cst_269 = arith.constant 9.99999974E-6 : f32
    %676 = vector.broadcast %cst_269 : f32 to vector<1x128xf32>
    %677 = arith.addf %673, %676 : vector<1x128xf32>
    %678 = math.rsqrt %677 : vector<1x128xf32>
    %679 = vector.shape_cast %675 : vector<128xf32> to vector<1x128xf32>
    %680 = arith.mulf %679, %678 : vector<1x128xf32>
    %c17_270 = arith.constant 17 : index
    %c0_271 = arith.constant 0 : index
    %681 = vector.load %arg5[%c17_270, %c0_271] : memref<18x128xf32, #tpu.memory_space<vmem>>, vector<1x128xf32>
    %682 = vector.shape_cast %681 : vector<1x128xf32> to vector<128xf32>
    %683 = arith.mulf %664, %680 : vector<1x128xf32>
    %684 = vector.shape_cast %682 : vector<128xf32> to vector<1x128xf32>
    %685 = arith.subf %684, %683 : vector<1x128xf32>
    %686 = vector.broadcast %680 : vector<1x128xf32> to vector<32x128xf32>
    %687 = arith.mulf %660, %686 : vector<32x128xf32>
    %688 = vector.broadcast %685 : vector<1x128xf32> to vector<32x128xf32>
    %689 = arith.addf %687, %688 : vector<32x128xf32>
    %cst_272 = arith.constant 0.000000e+00 : f32
    %690 = vector.broadcast %cst_272 : f32 to vector<32x128xf32>
    %691 = arith.maximumf %689, %690 : vector<32x128xf32>
    %c0_273 = arith.constant 0 : index
    %c0_274 = arith.constant 0 : index
    %692 = vector.load %arg2[%c0_273, %c0_274] : memref<2x32xbf16, #tpu.memory_space<vmem>>, vector<2x32xbf16>
    %693 = arith.truncf %691 : vector<32x128xf32> to vector<32x128xbf16>
    %cst_275 = arith.constant dense<0.000000e+00> : vector<2x128xf32>
    %694 = tpu.matmul %692, %693, %cst_275 {dimension_numbers = #tpu.dot_dimension_numbers<[1], [0], [0], [1], [0, 0, 1, 1], [], []>} : vector<2x32xbf16>, vector<32x128xbf16>, vector<2x128xf32> -> vector<2x128xf32>
    %695 = arith.truncf %694 : vector<2x128xf32> to vector<2x128xbf16>
    %c0_276 = arith.constant 0 : index
    %c0_277 = arith.constant 0 : index
    %696 = vector.load %arg6[%c0_276, %c0_277] : memref<128x128xbf16, #tpu.memory_space<vmem>>, vector<128x128xbf16>
    %cst_278 = arith.constant dense<0.000000e+00> : vector<2x128xf32>
    %697 = tpu.matmul %695, %696, %cst_278 {dimension_numbers = #tpu.dot_dimension_numbers<[1], [0], [0], [1], [0, 0, 1, 1], [], []>} : vector<2x128xbf16>, vector<128x128xbf16>, vector<2x128xf32> -> vector<2x128xf32>
    %c0_279 = arith.constant 0 : index
    %c0_280 = arith.constant 0 : index
    %698 = vector.load %arg7[%c0_279, %c0_280] : memref<1x128xf32, #tpu.memory_space<vmem>>, vector<1x128xf32>
    %699 = vector.broadcast %698 : vector<1x128xf32> to vector<2x128xf32>
    %700 = arith.addf %697, %699 : vector<2x128xf32>
    %c0_281 = arith.constant 0 : index
    %c0_282 = arith.constant 0 : index
    %701 = vector.load %arg8[%c0_281, %c0_282] : memref<2x128xf32, #tpu.memory_space<vmem>>, vector<2x128xf32>
    tpu.vector_store %arg8[%c0_281, %c0_282], %700 {strides = array<i32>} : memref<2x128xf32, #tpu.memory_space<vmem>>, vector<2x128xf32>,
    return
  }
}

</mosaic_0001>

<bundles_post_ra>
// kernel: graph_resnet_forward.1
= control target key start
LH: loop header
LB: loop body
LE: loop exit
PB: predicated region body
PF: predicated region fallthrough
CT: control target
= control target key end

     0   :  { %13 = vsyncpa [#allocation3], 0  ;;  %s7668_s0 = inlined_call_operand.vmem [shape: bf16[32,128], index: 0, kind: input, shape index: {}]   ;;  %s7669_s1 = inlined_call_operand.vmem [shape: bf16[32,32], index: 1, kind: input, shape index: {}]   ;;  %s7670_s2 = inlined_call_operand.vmem [shape: bf16[2,32], index: 2, kind: input, shape index: {}]   ;;  %s7671_s3 = inlined_call_operand.hbm [shape: bf16[18,256,128], index: 3, kind: input, shape index: {}]   ;;  %s7672_s4 = inlined_call_operand.hbm [shape: f32[18,128], index: 4, kind: input, shape index: {}]   ;;  %s7673_s5 = inlined_call_operand.vmem [shape: f32[18,128], index: 5, kind: input, shape index: {}]   ;;  %s7674_s6 = inlined_call_operand.hbm [shape: bf16[128,128], index: 6, kind: input, shape index: {}]   ;;  %s7675_s7 = inlined_call_operand.hbm [shape: f32[1,128], index: 7, kind: input, shape index: {}]   ;;  %s7676_s8 = inlined_call_operand.hbm [shape: f32[2,128], index: 8, kind: output, shape index: {}]  }
   0x1   :  { %14 = vsyncpa [#allocation6], 0 }
   0x2   :  { %15 = vsyncpa [#allocation9], 0  ;;  %s40_s29 = sshll.u32 %s7672_s4, 4  ;;  %s41_s29 = int_to_ptr.hbm [resolvable:$true] %s40_s29 }
   0x3   :  { %16 = vsyncpa [#allocation4], 0  ;;  %s6940_s30 = smov [#allocation5]   ;;  %s27_s12 = sshll.u32 %s7671_s3, 4  ;;  %s28_s12 = int_to_ptr.hbm [resolvable:$true] %s27_s12 }
   0x4   :  { %s42_s9 = sshll.u32 %s6940_s30, 4  ;;  %s6941_s13 = smov 128   ;;  %s43_s9 = int_to_ptr.vmem [resolvable:$true] %s42_s9 }
   0x5   :  { %s6942_s14 = smov 8   ;;  %s6943_s15 = smov [#allocation2]  }
   0x6   :  { %48 = dma.hbm_to_vmem [thread:$0]  %s41_s29, 384, %s43_s9, [#allocation6], %s6941_s13, %s6941_s13, %s6942_s14  }
   0x7   :  { %s29_s16 = sshll.u32 %s6943_s15, 4  ;;  %s6944_s17 = smov 64   ;;  %s30_s16 = int_to_ptr.vmem [resolvable:$true] %s29_s16 }
   0x8   :  { %s6945_s18 = smov 4   ;;  %s55_s20 = sshll.u32 %s7674_s6, 4  ;;  %s56_s20 = int_to_ptr.hbm [resolvable:$true] %s55_s20 }
   0x9   :  { %35 = dma.hbm_to_vmem [thread:$0]  %s28_s12, 36864, %s30_s16, [#allocation3], %s6944_s17, %s6944_s17, %s6945_s18  }
   0xa   :  { %s6946_s21 = smov [#allocation7]   ;;  %s69_s24 = sshll.u32 %s7675_s7, 4  ;;  %s70_s24 = int_to_ptr.hbm [resolvable:$true] %s69_s24 }
   0xb   :  { %s57_s22 = sshll.u32 %s6946_s21, 4  ;;  %s6947_s25 = smov [#allocation8]   ;;  %s58_s22 = int_to_ptr.vmem [resolvable:$true] %s57_s22 }
   0xc   :  { %63 = dma.hbm_to_vmem [thread:$0]  %s56_s20, 1024, %s58_s22, [#allocation6], %s6944_s17, %s6944_s17, %s6945_s18  }
   0xd   :  { %s71_s26 = sshll.u32 %s6947_s25, 4  ;;  %s72_s26 = int_to_ptr.vmem [resolvable:$true] %s71_s26 }
   0xe   :  { %74 = dma.hbm_to_vmem [thread:$0]  %s70_s24, 16, %s72_s26, [#allocation9]  }
   0xf   :  { %6932 = dma.done.wait [#allocation3], 36864  }
  0x10   :  { %6933 = vsyncadd [#allocation3], 4294930432 }
  0x11   :  { %6934 = dma.done.wait [#allocation6], 1408  }
  0x12   :  { %6935 = vsyncadd [#allocation6], 4294965888 }
  0x13   :  { %6936 = dma.done.wait [#allocation9], 16  }
  0x14   :  { %6937 = vsyncadd [#allocation9], 4294967280  ;;  %v6458_v0 = vld [vmem:[%s7668_s0 + $0x8] sm:$0xff]  ;;  %v6474_v1 = vld [vmem:[#allocation2 + $0x78] sm:$0xff]  ;;  %vm122_vm0 = vcmask 261120   ;;  %v6948_v38 = vmov 32.0  }
  0x15   :  { %135 = vmatpush.bf16.msra.mxu0 %v6458_v0  ;;  %v6457_v2 = vld [vmem:[%s7668_s0] sm:$0xff]  ;;  %v6466_v3 = vld [vmem:[#allocation2 + $0x38] sm:$0xff]  ;;  %311 = vmatpush.bf16.msra.mxu2 %v6474_v1  ;;  %v6473_v4 = vld [vmem:[#allocation2 + $0x70] sm:$0xff]  ;;  %6766 = vrcp.f32 %v6948_v38  ;;  %s6949_s0 = smov [#allocation10]   ;;  %s5206_s12 = sshll.u32 %s7676_s8, 4  ;;  %s5207_s12 = int_to_ptr.hbm [resolvable:$true] %s5206_s12 }
  0x16   :  { %292 = vmatpush.bf16.msra.mxu1 %v6466_v3  ;;  %v6465_v5 = vld [vmem:[#allocation2 + $0x30] sm:$0xff]  ;;  %v7016_v6 = vld [vmem:[%s7669_s1] sm:$0xff]  ;;  %v6472_v7 = vld [vmem:[#allocation2 + $0x68] sm:$0xff]  ;;  %s5204_s9 = sshll.u32 %s6949_s0, 4  ;;  %s5205_s9 = int_to_ptr.vmem [resolvable:$true] %s5204_s9 }
  0x17   :  { %v6464_v8 = vld [vmem:[#allocation2 + $0x28] sm:$0xff]  ;;  %v6471_v9 = vld [vmem:[#allocation2 + $0x60] sm:$0xff]  ;;  %v6470_v11 = vld [vmem:[#allocation2 + $0x58] sm:$0xff] }
  0x18   :  { %v6463_v10 = vld [vmem:[#allocation2 + $0x20] sm:$0xff]  ;;  %v6469_v12 = vld [vmem:[#allocation2 + $0x50] sm:$0xff]  ;;  %v7023_v13 = vld [vmem:[%s7669_s1 + $0x8] sm:$0xff] }
  0x19   :  { %136 = vmatpush.bf16.msra.mxu0 %v6457_v2  ;;  %312 = vmatpush.bf16.msra.mxu2 %v6473_v4  ;;  %v6468_v14 = vld [vmem:[#allocation2 + $0x48] sm:$0xff]  ;;  %v6467_v15 = vld [vmem:[#allocation2 + $0x40] sm:$0xff]  ;;  %v6462_v16 = vld [vmem:[#allocation2 + $0x18] sm:$0xff] }
  0x1a   :  { %293 = vmatpush.bf16.msra.mxu1 %v6465_v5  ;;  %v6461_v17 = vld [vmem:[#allocation2 + $0x10] sm:$0xff]  ;;  %v6460_v18 = vld [vmem:[#allocation2 + $0x8] sm:$0xff]  ;;  %v6459_v19 = vld [vmem:[#allocation2] sm:$0xff] }
  0x1b   :  { %v6767_v42 = vpop.eup %6766 }
  0x1c   :  { %5234 = vmatmul.msk.bf16.vlgmr.msra.gmra.mxu0 %vm122_vm0, %v7016_v6  ;;  %v340_v46 = vmul.f32 32.0, %v6767_v42  ;;  %vm344_vm1 = vweird.f32 %v6767_v42 }
  0x1d   :  { %313 = vmatpush.bf16.msra.mxu2 %v6472_v7 }
  0x1e   :  { %294 = vmatpush.bf16.msra.mxu1 %v6464_v8  ;;  %v341_v55 = vsub.f32 1.0, %v340_v46 }
  0x20   :  { %v342_v61 = vmul.f32 %v6767_v42, %v341_v55 }
  0x21   :  { %314 = vmatpush.bf16.msra.mxu2 %v6471_v9 }
  0x22   :  { %295 = vmatpush.bf16.msra.mxu1 %v6463_v10 }
  0x25   :  { %315 = vmatpush.bf16.msra.mxu2 %v6470_v11 }
  0x26   :  { %296 = vmatpush.bf16.msra.mxu1 %v6462_v16 }
  0x29   :  { %316 = vmatpush.bf16.msra.mxu2 %v6469_v12 }
  0x2a   :  { %297 = vmatpush.bf16.msra.mxu1 %v6461_v17 }
  0x2c   :  { %5235 = vmatmul.msk.bf16.gmra.mxu0 %vm122_vm0, %v7023_v13 }
  0x2d   :  { %317 = vmatpush.bf16.msra.mxu2 %v6468_v14 }
  0x2e   :  { %298 = vmatpush.bf16.msra.mxu1 %v6460_v18 }
  0x31   :  { %318 = vmatpush.bf16.msra.mxu2 %v6467_v15 }
  0x32   :  { %299 = vmatpush.bf16.msra.mxu1 %v6459_v19 }
  0x34   :  { %319 = vmatmul.bf16.vlgmr.msra.gmra.mxu2 %v6457_v2  ;;  %v343_v2 = vadd.f32 %v6767_v42, %v342_v61  ;;  %v6482_v61 = vld [vmem:[#allocation2 + $0xb8] sm:$0xff] }
  0x35   :  { %574 = vmatpush.bf16.msrb.mxu0 %v6482_v61 }
  0x36   :  { %v7027_v8 = vsel %vm344_vm1, %v6767_v42, %v343_v2  ;;  %v6479_v2 = vld [vmem:[#allocation2 + $0xa0] sm:$0xff] }
  0x44   :  { %324 = vmatmul.bf16.gmra.mxu2 %v6458_v0 }
  0x99   :  { %v138_v20 = vpop.f32.mrf.mxu0 }
  0x9a   :  { %v148_v21 = vpack.c.bf16 %v138_v20, %v138_v20 }
  0x9c   :  { %v156_v24 = vunpack.c.l.b16 %v148_v21 }
  0xa1   :  { %v140_v22 = vpop.f32.mrf.mxu0 }
  0xa2   :  { %v149_v23 = vpack.c.bf16 %v140_v22, %v140_v22 }
  0xa4   :  { %v157_v25 = vunpack.c.l.b16 %v149_v23 }
  0xa6   :  { %v160_v26 = vpack.c.b16 %v157_v25, %v156_v24  ;;  %v364_v24 = vld [vmem:[#allocation5] sm:$0x1] }
  0xa8   :  { %300 = vmatmul.bf16.vlgmr.msra.gmra.mxu1 %v160_v26 }
  0xa9   :  { %v143_v27 = vpop.f32.mrf.mxu0 }
  0xaa   :  { %v150_v28 = vpack.c.bf16 %v143_v27, %v143_v27 }
  0xac   :  { %v158_v31 = vunpack.c.l.b16 %v150_v28  ;;  %v377_v28 = vld [vmem:[%s7673_s5] sm:$0x1] }
  0xb1   :  { %v145_v29 = vpop.f32.mrf.mxu0 }
  0xb2   :  { %v151_v30 = vpack.c.bf16 %v145_v29, %v145_v29 }
  0xb4   :  { %v159_v32 = vunpack.c.l.b16 %v151_v30 }
  0xb6   :  { %v161_v33 = vpack.c.b16 %v159_v32, %v158_v31 }
  0xb7   :  { %v320_v34 = vpop.f32.mrf.mxu2 }
  0xb8   :  { %305 = vmatmul.bf16.gmra.mxu1 %v161_v33 }
  0xbf   :  { %v322_v36 = vpop.f32.mrf.mxu2 }
  0xc7   :  { %v325_v39 = vpop.f32.mrf.mxu2 }
  0xcf   :  { %v327_v50 = vpop.f32.mrf.mxu2 }
 0x125   :  { %v301_v35 = vpop.f32.mrf.mxu1 }
 0x126   :  { %v321_v43 = vadd.f32 %v320_v34, %v301_v35 }
 0x128   :  { %v347_v47 = vmul.f32 %v321_v43, %v321_v43 }
 0x12d   :  { %v303_v37 = vpop.f32.mrf.mxu1 }
 0x12e   :  { %v323_v41 = vadd.f32 %v322_v36, %v303_v37 }
 0x130   :  { %v348_v45 = vmul.f32 %v323_v41, %v323_v41  ;;  %v330_v48 = vadd.f32 %v323_v41, %v321_v43 }
 0x132   :  { %v351_v52 = vadd.f32 %v348_v45, %v347_v47 }
 0x135   :  { %v306_v40 = vpop.f32.mrf.mxu1 }
 0x136   :  { %v326_v44 = vadd.f32 %v325_v39, %v306_v40 }
 0x138   :  { %v349_v49 = vmul.f32 %v326_v44, %v326_v44  ;;  %v331_v53 = vadd.f32 %v330_v48, %v326_v44 }
 0x13a   :  { %v352_v56 = vadd.f32 %v351_v52, %v349_v49 }
 0x13d   :  { %v308_v51 = vpop.f32.mrf.mxu1 }
 0x13e   :  { %v328_v54 = vadd.f32 %v327_v50, %v308_v51 }
 0x140   :  { %v332_v57 = vadd.f32 %v331_v53, %v328_v54  ;;  %v350_v58 = vmul.f32 %v328_v54, %v328_v54 }
 0x142   :  { %v333_v59 = vrot.slane %v332_v57, 4  ;;  %v353_v60 = vadd.f32 %v352_v56, %v350_v58  ;;  %v6489_v56 = vld [vmem:[#allocation2 + $0xf0] sm:$0xff]  ;;  %v6487_v58 = vld [vmem:[#allocation2 + $0xe0] sm:$0xff] }
 0x144   :  { %v334_v62 = vadd.f32 %v333_v59, %v332_v57  ;;  %v354_v63 = vrot.slane %v353_v60, 4  ;;  %v6488_v57 = vld [vmem:[#allocation2 + $0xe8] sm:$0xff]  ;;  %v6486_v59 = vld [vmem:[#allocation2 + $0xd8] sm:$0xff] }
 0x146   :  { %v335_v0 = vrot.slane %v334_v62, 2  ;;  %v355_v1 = vadd.f32 %v354_v63, %v353_v60  ;;  %v6485_v60 = vld [vmem:[#allocation2 + $0xd0] sm:$0xff] }
 0x147   :  { %v6481_v63 = vld [vmem:[#allocation2 + $0xb0] sm:$0xff] }
 0x148   :  { %v336_v3 = vadd.f32 %v335_v0, %v334_v62  ;;  %v356_v4 = vrot.slane %v355_v1, 2  ;;  %v6484_v62 = vld [vmem:[#allocation2 + $0xc8] sm:$0xff]  ;;  %v6483_v0 = vld [vmem:[#allocation2 + $0xc0] sm:$0xff]  ;;  %575 = vmatpush.bf16.msrb.mxu0 %v6481_v63 }
 0x14a   :  { %v337_v5 = vrot.slane %v336_v3, 1  ;;  %v357_v7 = vadd.f32 %v356_v4, %v355_v1  ;;  %v6480_v1 = vld [vmem:[#allocation2 + $0xa8] sm:$0xff]  ;;  %v6477_v4 = vld [vmem:[#allocation2 + $0x90] sm:$0xff] }
 0x14c   :  { %v338_v9 = vadd.f32 %v337_v5, %v336_v3  ;;  %v358_v10 = vrot.slane %v357_v7, 1  ;;  %576 = vmatpush.bf16.msrb.mxu0 %v6480_v1  ;;  %v6478_v3 = vld [vmem:[#allocation2 + $0x98] sm:$0xff]  ;;  %v6476_v5 = vld [vmem:[#allocation2 + $0x88] sm:$0xff] }
 0x14d   :  { %v6502_v1 = vld [vmem:[#allocation2 + $0x158] sm:$0xff] }
 0x14e   :  { %v346_v11 = vmul.f32 %v7027_v8, %v338_v9  ;;  %v359_v12 = vadd.f32 %v358_v10, %v357_v7  ;;  %v6475_v7 = vld [vmem:[#allocation2 + $0x80] sm:$0xff] }
 0x150   :  { %v360_v14 = vmul.f32 %v359_v12, %v7027_v8  ;;  %v361_v15 = vmul.f32 %v346_v11, %v346_v11  ;;  %577 = vmatpush.bf16.msrb.mxu0 %v6479_v2 }
 0x152   :  { %v362_v16 = vsub.f32 %v360_v14, %v361_v15 }
 0x154   :  { %v363_v17 = vmax.f32 %v362_v16, 0.0  ;;  %578 = vmatpush.bf16.msrb.mxu0 %v6478_v3 }
 0x156   :  { %v365_v18 = vadd.f32 1e-05, %v363_v17 }
 0x158   :  { %6768 = vrsqrt.f32 %v365_v18  ;;  %vm372_vm3 = vweird.f32 %v365_v18  ;;  %579 = vmatpush.bf16.msrb.mxu0 %v6477_v4  ;;  %v6501_v4 = vld [vmem:[#allocation2 + $0x150] sm:$0xff] }
 0x15c   :  { %580 = vmatpush.bf16.msrb.mxu0 %v6476_v5 }
 0x15e   :  { %v6769_v19 = vpop.eup %6768 }
 0x15f   :  { %v367_v20 = vmul.f32 %v6769_v19, %v365_v18  ;;  %vm373_vm2 = vweird.f32 %v6769_v19 }
 0x160   :  { %vm374_vm4 = vmor %vm372_vm3, %vm373_vm2  ;;  %581 = vmatpush.bf16.msrb.mxu0 %v6475_v7 }
 0x161   :  { %v368_v21 = vmul.f32 %v6769_v19, %v367_v20 }
 0x163   :  { %v369_v22 = vmul.f32 0.5, %v368_v21 }
 0x165   :  { %v370_v23 = vsub.f32 1.5, %v369_v22 }
 0x167   :  { %v371_v25 = vmul.f32 %v6769_v19, %v370_v23 }
 0x169   :  { %v375_v26 = vsel %vm374_vm4, %v6769_v19, %v371_v25 }
 0x16a   :  { %v376_v27 = vmul.f32 %v375_v26, %v364_v24 }
 0x16c   :  { %v378_v29 = vmul.f32 %v376_v27, %v346_v11  ;;  %v380_v30 = vperm.slane %v376_v27, 0 }
 0x16e   :  { %v379_v31 = vsub.f32 %v377_v28, %v378_v29  ;;  %v384_v32 = vmul.f32 %v380_v30, %v328_v54  ;;  %v383_v33 = vmul.f32 %v380_v30, %v326_v44  ;;  %v381_v35 = vmul.f32 %v380_v30, %v321_v43  ;;  %v6490_v54 = vld [vmem:[#allocation2 + $0xf8] sm:$0xff] }
 0x16f   :  { %v382_v36 = vmul.f32 %v380_v30, %v323_v41 }
 0x170   :  { %v385_v34 = vperm.slane %v379_v31, 0 }
 0x172   :  { %v388_v37 = vadd.f32 %v385_v34, %v383_v33  ;;  %v389_v38 = vadd.f32 %v385_v34, %v384_v32  ;;  %v386_v39 = vadd.f32 %v385_v34, %v381_v35  ;;  %v387_v40 = vadd.f32 %v385_v34, %v382_v36 }
 0x174   :  { %v7034_v42 = vmax.f32 %v388_v37, 0.0  ;;  %v7036_v45 = vmax.f32 %v389_v38, 0.0  ;;  %v7038_v46 = vmax.f32 %v386_v39, 0.0  ;;  %v7040_v47 = vmax.f32 %v387_v40, 0.0  ;;  %v6506_v37 = vld [vmem:[#allocation2 + $0x178] sm:$0xff] }
 0x175   :  { %868 = vmatpush.bf16.msra.mxu0 %v6506_v37 }
 0x176   :  { %v396_v48 = vpack.c.bf16 %v7034_v42, %v7034_v42  ;;  %v397_v44 = vpack.c.bf16 %v7036_v45, %v7036_v45  ;;  %v394_v41 = vpack.c.bf16 %v7038_v46, %v7038_v46  ;;  %v395_v43 = vpack.c.bf16 %v7040_v47, %v7040_v47 }
 0x178   :  { %v404_v49 = vunpack.c.l.b16 %v396_v48  ;;  %v405_v50 = vunpack.c.l.b16 %v397_v44  ;;  %v402_v52 = vunpack.c.l.b16 %v394_v41  ;;  %v403_v53 = vunpack.c.l.b16 %v395_v43 }
 0x17a   :  { %v407_v51 = vpack.c.b16 %v405_v50, %v404_v49  ;;  %v406_v55 = vpack.c.b16 %v403_v53, %v402_v52  ;;  %v6505_v50 = vld [vmem:[#allocation2 + $0x170] sm:$0xff] }
 0x17b   :  { %869 = vmatpush.bf16.msra.mxu0 %v6505_v50  ;;  %v6497_v50 = vld [vmem:[#allocation2 + $0x130] sm:$0xff] }
 0x17c   :  { %416 = vmatpush.bf16.msra.mxu3 %v407_v51 }
 0x180   :  { %417 = vmatpush.bf16.msra.mxu3 %v406_v55 }
 0x183   :  { %5300 = vmatmul.msk.bf16.vlgmr.msra.gmra.mxu3 %vm122_vm0, %v7016_v6 }
 0x184   :  { %593 = vmatpush.bf16.msrb.mxu3 %v6490_v54 }
 0x188   :  { %594 = vmatpush.bf16.msrb.mxu3 %v6489_v56 }
 0x18c   :  { %595 = vmatpush.bf16.msrb.mxu3 %v6488_v57 }
 0x190   :  { %596 = vmatpush.bf16.msrb.mxu3 %v6487_v58 }
 0x193   :  { %5301 = vmatmul.msk.bf16.gmra.mxu3 %vm122_vm0, %v7023_v13 }
 0x194   :  { %597 = vmatpush.bf16.msrb.mxu3 %v6486_v59 }
 0x198   :  { %598 = vmatpush.bf16.msrb.mxu3 %v6485_v60  ;;  %v6503_v60 = vld [vmem:[#allocation2 + $0x160] sm:$0xff] }
 0x19c   :  { %599 = vmatpush.bf16.msrb.mxu3 %v6484_v62 }
 0x1a0   :  { %600 = vmatpush.bf16.msrb.mxu3 %v6483_v0 }
 0x1a3   :  { %601 = vmatmul.bf16.vlgmr.msrb.gmra.mxu3 %v406_v55  ;;  %v6504_v55 = vld [vmem:[#allocation2 + $0x168] sm:$0xff] }
 0x1a4   :  { %870 = vmatpush.bf16.msra.mxu0 %v6504_v55 }
 0x1a8   :  { %871 = vmatpush.bf16.msra.mxu0 %v6503_v60  ;;  %v6493_v60 = vld [vmem:[#allocation2 + $0x110] sm:$0xff] }
 0x1ac   :  { %872 = vmatpush.bf16.msra.mxu0 %v6502_v1 }
 0x1b0   :  { %873 = vmatpush.bf16.msra.mxu0 %v6501_v4 }
 0x1b3   :  { %606 = vmatmul.bf16.gmra.mxu3 %v407_v51 }
 0x206   :  { %v419_v9 = vpop.f32.mrf.mxu3 }
 0x207   :  { %v429_v10 = vpack.c.bf16 %v419_v9, %v419_v9 }
 0x209   :  { %v437_v14 = vunpack.c.l.b16 %v429_v10  ;;  %v6500_v10 = vld [vmem:[#allocation2 + $0x148] sm:$0xff] }
 0x20a   :  { %874 = vmatpush.bf16.msra.mxu0 %v6500_v10 }
 0x20e   :  { %v421_v11 = vpop.f32.mrf.mxu3 }
 0x20f   :  { %v430_v12 = vpack.c.bf16 %v421_v11, %v421_v11 }
 0x211   :  { %v438_v15 = vunpack.c.l.b16 %v430_v12 }
 0x213   :  { %v441_v16 = vpack.c.b16 %v438_v15, %v437_v14  ;;  %v6499_v14 = vld [vmem:[#allocation2 + $0x140] sm:$0xff] }
 0x214   :  { %875 = vmatpush.bf16.msra.mxu0 %v6499_v14 }
 0x215   :  { %582 = vmatmul.bf16.vlgmr.msrb.gmra.mxu0 %v441_v16 }
 0x216   :  { %v424_v17 = vpop.f32.mrf.mxu3 }
 0x217   :  { %v431_v18 = vpack.c.bf16 %v424_v17, %v424_v17 }
 0x219   :  { %v439_v21 = vunpack.c.l.b16 %v431_v18 }
 0x21e   :  { %v426_v19 = vpop.f32.mrf.mxu3 }
 0x21f   :  { %v432_v20 = vpack.c.bf16 %v426_v19, %v426_v19 }
 0x221   :  { %v440_v22 = vunpack.c.l.b16 %v432_v20  ;;  %v639_v20 = vld [vmem:[#allocation5 + $0x1] sm:$0x1] }
 0x223   :  { %v442_v23 = vpack.c.b16 %v440_v22, %v439_v21 }
 0x225   :  { %587 = vmatmul.bf16.gmra.mxu0 %v442_v23 }
 0x226   :  { %v602_v24 = vpop.f32.mrf.mxu3 }
 0x22e   :  { %v604_v26 = vpop.f32.mrf.mxu3 }
 0x236   :  { %v607_v28 = vpop.f32.mrf.mxu3 }
 0x23e   :  { %v609_v38 = vpop.f32.mrf.mxu3 }
 0x292   :  { %v583_v25 = vpop.f32.mrf.mxu0 }
 0x293   :  { %v7056_v31 = vadd.f32 %v602_v24, %v583_v25  ;;  %v652_v24 = vld [vmem:[%s7673_s5 + $0x1] sm:$0x1] }
 0x295   :  { %v622_v34 = vmul.f32 %v7056_v31, %v7056_v31 }
 0x29a   :  { %v585_v27 = vpop.f32.mrf.mxu0 }
 0x29b   :  { %v7054_v30 = vadd.f32 %v604_v26, %v585_v27 }
 0x29d   :  { %v623_v33 = vmul.f32 %v7054_v30, %v7054_v30  ;;  %v612_v35 = vadd.f32 %v7054_v30, %v7056_v31 }
 0x29f   :  { %v626_v40 = vadd.f32 %v623_v33, %v622_v34 }
 0x2a2   :  { %v588_v29 = vpop.f32.mrf.mxu0 }
 0x2a3   :  { %v7058_v32 = vadd.f32 %v607_v28, %v588_v29 }
 0x2a5   :  { %v624_v36 = vmul.f32 %v7058_v32, %v7058_v32  ;;  %v613_v48 = vadd.f32 %v612_v35, %v7058_v32 }
 0x2a7   :  { %v627_v41 = vadd.f32 %v626_v40, %v624_v36  ;;  %v6498_v40 = vld [vmem:[#allocation2 + $0x138] sm:$0xff] }
 0x2a8   :  { %849 = vmatpush.bf16.msrb.mxu2 %v6498_v40 }
 0x2aa   :  { %v590_v39 = vpop.f32.mrf.mxu0 }
 0x2ab   :  { %v610_v44 = vadd.f32 %v609_v38, %v590_v39 }
 0x2ac   :  { %850 = vmatpush.bf16.msrb.mxu2 %v6497_v50 }
 0x2ad   :  { %v614_v43 = vadd.f32 %v613_v48, %v610_v44  ;;  %v625_v49 = vmul.f32 %v610_v44, %v610_v44 }
 0x2af   :  { %v615_v51 = vrot.slane %v614_v43, 4  ;;  %v628_v52 = vadd.f32 %v627_v41, %v625_v49 }
 0x2b1   :  { %v616_v53 = vadd.f32 %v615_v51, %v614_v43  ;;  %v629_v54 = vrot.slane %v628_v52, 4 }
 0x2b3   :  { %v617_v56 = vrot.slane %v616_v53, 2  ;;  %v630_v57 = vadd.f32 %v629_v54, %v628_v52 }
 0x2b5   :  { %v618_v58 = vadd.f32 %v617_v56, %v616_v53  ;;  %v631_v59 = vrot.slane %v630_v57, 2 }
 0x2b7   :  { %v619_v61 = vrot.slane %v618_v58, 1  ;;  %v632_v62 = vadd.f32 %v631_v59, %v630_v57  ;;  %v6494_v59 = vld [vmem:[#allocation2 + $0x118] sm:$0xff] }
 0x2b9   :  { %v620_v63 = vadd.f32 %v619_v61, %v618_v58  ;;  %v633_v0 = vrot.slane %v632_v62, 1  ;;  %v6495_v58 = vld [vmem:[#allocation2 + $0x120] sm:$0xff]  ;;  %v6492_v61 = vld [vmem:[#allocation2 + $0x108] sm:$0xff] }
 0x2bb   :  { %v621_v2 = vmul.f32 %v620_v63, %v7027_v8  ;;  %v634_v3 = vadd.f32 %v633_v0, %v632_v62  ;;  %v6491_v62 = vld [vmem:[#allocation2 + $0x100] sm:$0xff] }
 0x2bd   :  { %v635_v5 = vmul.f32 %v634_v3, %v7027_v8  ;;  %v636_v7 = vmul.f32 %v621_v2, %v621_v2 }
 0x2bf   :  { %v637_v9 = vsub.f32 %v635_v5, %v636_v7 }
 0x2c1   :  { %v638_v11 = vmax.f32 %v637_v9, 0.0 }
 0x2c3   :  { %v640_v12 = vadd.f32 1e-05, %v638_v11 }
 0x2c5   :  { %6770 = vrsqrt.f32 %v640_v12  ;;  %vm647_vm6 = vweird.f32 %v640_v12 }
 0x2cb   :  { %v6771_v15 = vpop.eup %6770 }
 0x2cc   :  { %v642_v16 = vmul.f32 %v6771_v15, %v640_v12  ;;  %vm648_vm5 = vweird.f32 %v6771_v15 }
 0x2cd   :  { %vm649_vm7 = vmor %vm647_vm6, %vm648_vm5 }
 0x2ce   :  { %v643_v17 = vmul.f32 %v6771_v15, %v642_v16 }
 0x2d0   :  { %v644_v18 = vmul.f32 0.5, %v643_v17 }
 0x2d2   :  { %v645_v19 = vsub.f32 1.5, %v644_v18 }
 0x2d4   :  { %v646_v21 = vmul.f32 %v6771_v15, %v645_v19 }
 0x2d6   :  { %v650_v22 = vsel %vm649_vm7, %v6771_v15, %v646_v21 }
 0x2d7   :  { %v651_v23 = vmul.f32 %v650_v22, %v639_v20 }
 0x2d9   :  { %v655_v25 = vperm.slane %v651_v23, 0  ;;  %v653_v26 = vmul.f32 %v651_v23, %v621_v2 }
 0x2db   :  { %v654_v27 = vsub.f32 %v652_v24, %v653_v26  ;;  %v659_v28 = vmul.f32 %v655_v25, %v610_v44  ;;  %v658_v29 = vmul.f32 %v655_v25, %v7058_v32  ;;  %v656_v34 = vmul.f32 %v655_v25, %v7056_v31 }
 0x2dc   :  { %v657_v35 = vmul.f32 %v655_v25, %v7054_v30  ;;  %v6496_v30 = vld [vmem:[#allocation2 + $0x128] sm:$0xff] }
 0x2dd   :  { %v660_v33 = vperm.slane %v654_v27, 0  ;;  %851 = vmatpush.bf16.msrb.mxu2 %v6496_v30 }
 0x2df   :  { %v663_v36 = vadd.f32 %v660_v33, %v658_v29  ;;  %v664_v37 = vadd.f32 %v660_v33, %v659_v28  ;;  %v661_v38 = vadd.f32 %v660_v33, %v656_v34  ;;  %v662_v39 = vadd.f32 %v660_v33, %v657_v35 }
 0x2e1   :  { %v667_v48 = vmax.f32 %v663_v36, 0.0  ;;  %v668_v41 = vmax.f32 %v664_v37, 0.0  ;;  %v665_v43 = vmax.f32 %v661_v38, 0.0  ;;  %v666_v49 = vmax.f32 %v662_v39, 0.0  ;;  %852 = vmatpush.bf16.msrb.mxu2 %v6495_v58  ;;  %v6522_v37 = vld [vmem:[#allocation2 + $0x1f8] sm:$0xff] }
 0x2e3   :  { %v671_v51 = vpack.c.bf16 %v667_v48, %v667_v48  ;;  %v672_v44 = vpack.c.bf16 %v668_v41, %v668_v41  ;;  %v669_v52 = vpack.c.bf16 %v665_v43, %v665_v43  ;;  %v670_v32 = vpack.c.bf16 %v666_v49, %v666_v49  ;;  %v6521_v43 = vld [vmem:[#allocation2 + $0x1f0] sm:$0xff] }
 0x2e5   :  { %v679_v53 = vunpack.c.l.b16 %v671_v51  ;;  %v680_v54 = vunpack.c.l.b16 %v672_v44  ;;  %v677_v31 = vunpack.c.l.b16 %v669_v52  ;;  %v678_v55 = vunpack.c.l.b16 %v670_v32  ;;  %853 = vmatpush.bf16.msrb.mxu2 %v6494_v59  ;;  %v6520_v52 = vld [vmem:[#allocation2 + $0x1e8] sm:$0xff]  ;;  %v6518_v59 = vld [vmem:[#allocation2 + $0x1d8] sm:$0xff] }
 0x2e7   :  { %v682_v56 = vpack.c.b16 %v680_v54, %v679_v53  ;;  %v681_v57 = vpack.c.b16 %v678_v55, %v677_v31  ;;  %v6519_v55 = vld [vmem:[#allocation2 + $0x1e0] sm:$0xff] }
 0x2e9   :  { %691 = vmatpush.bf16.msrb.mxu1 %v682_v56  ;;  %876 = vmatmul.bf16.vlgmr.msra.gmra.mxu0 %v681_v57 }
 0x2ea   :  { %854 = vmatpush.bf16.msrb.mxu2 %v6493_v60 }
 0x2ed   :  { %692 = vmatpush.bf16.msrb.mxu1 %v681_v57 }
 0x2ee   :  { %855 = vmatpush.bf16.msrb.mxu2 %v6492_v61 }
 0x2f0   :  { %5366 = vmatmul.msk.bf16.vlgmr.msrb.gmra.mxu1 %vm122_vm0, %v7016_v6 }
 0x2f2   :  { %856 = vmatpush.bf16.msrb.mxu2 %v6491_v62 }
 0x2f6   :  { %1147 = vmatpush.bf16.msra.mxu2 %v6522_v37 }
 0x2f9   :  { %881 = vmatmul.bf16.gmra.mxu0 %v682_v56 }
 0x2fa   :  { %1148 = vmatpush.bf16.msra.mxu2 %v6521_v43 }
 0x2fe   :  { %1149 = vmatpush.bf16.msra.mxu2 %v6520_v52 }
 0x300   :  { %5367 = vmatmul.msk.bf16.gmra.mxu1 %vm122_vm0, %v7023_v13 }
 0x302   :  { %1150 = vmatpush.bf16.msra.mxu2 %v6519_v55  ;;  %v6507_v55 = vld [vmem:[#allocation2 + $0x180] sm:$0xff] }
 0x306   :  { %1151 = vmatpush.bf16.msra.mxu2 %v6518_v59 }
 0x366   :  { %v877_v16 = vpop.f32.mrf.mxu0 }
 0x36d   :  { %v694_v63 = vpop.f32.mrf.mxu1 }
 0x36e   :  { %v704_v0 = vpack.c.bf16 %v694_v63, %v694_v63  ;;  %v879_v18 = vpop.f32.mrf.mxu0  ;;  %v6517_v63 = vld [vmem:[#allocation2 + $0x1d0] sm:$0xff] }
 0x36f   :  { %1152 = vmatpush.bf16.msra.mxu2 %v6517_v63 }
 0x370   :  { %v712_v3 = vunpack.c.l.b16 %v704_v0 }
 0x375   :  { %v696_v1 = vpop.f32.mrf.mxu1 }
 0x376   :  { %v705_v2 = vpack.c.bf16 %v696_v1, %v696_v1  ;;  %v882_v20 = vpop.f32.mrf.mxu0 }
 0x378   :  { %v713_v4 = vunpack.c.l.b16 %v705_v2  ;;  %v6516_v2 = vld [vmem:[#allocation2 + $0x1c8] sm:$0xff] }
 0x379   :  { %1153 = vmatpush.bf16.msra.mxu2 %v6516_v2 }
 0x37a   :  { %v716_v5 = vpack.c.b16 %v713_v4, %v712_v3  ;;  %v6515_v3 = vld [vmem:[#allocation2 + $0x1c0] sm:$0xff] }
 0x37c   :  { %857 = vmatmul.bf16.vlgmr.msrb.gmra.mxu2 %v716_v5 }
 0x37d   :  { %v699_v7 = vpop.f32.mrf.mxu1  ;;  %1154 = vmatpush.bf16.msra.mxu2 %v6515_v3 }
 0x37e   :  { %v706_v9 = vpack.c.bf16 %v699_v7, %v699_v7  ;;  %v884_v29 = vpop.f32.mrf.mxu0 }
 0x380   :  { %v714_v12 = vunpack.c.l.b16 %v706_v9 }
 0x385   :  { %v701_v10 = vpop.f32.mrf.mxu1 }
 0x386   :  { %v707_v11 = vpack.c.bf16 %v701_v10, %v701_v10 }
 0x388   :  { %v715_v14 = vunpack.c.l.b16 %v707_v11  ;;  %v914_v11 = vld [vmem:[#allocation5 + $0x2] sm:$0x1] }
 0x38a   :  { %v717_v15 = vpack.c.b16 %v715_v14, %v714_v12 }
 0x38c   :  { %862 = vmatmul.bf16.gmra.mxu2 %v717_v15 }
 0x3ff   :  { %v858_v17 = vpop.f32.mrf.mxu2 }
 0x400   :  { %v7083_v23 = vadd.f32 %v877_v16, %v858_v17  ;;  %v927_v16 = vld [vmem:[%s7673_s5 + $0x2] sm:$0x1] }
 0x402   :  { %v897_v26 = vmul.f32 %v7083_v23, %v7083_v23 }
 0x407   :  { %v860_v19 = vpop.f32.mrf.mxu2 }
 0x408   :  { %v7081_v22 = vadd.f32 %v879_v18, %v860_v19 }
 0x40a   :  { %v898_v25 = vmul.f32 %v7081_v22, %v7081_v22  ;;  %v887_v27 = vadd.f32 %v7081_v22, %v7083_v23 }
 0x40c   :  { %v901_v34 = vadd.f32 %v898_v25, %v897_v26 }
 0x40f   :  { %v863_v21 = vpop.f32.mrf.mxu2 }
 0x410   :  { %v7085_v24 = vadd.f32 %v882_v20, %v863_v21 }
 0x412   :  { %v899_v28 = vmul.f32 %v7085_v24, %v7085_v24  ;;  %v888_v35 = vadd.f32 %v887_v27, %v7085_v24 }
 0x414   :  { %v902_v38 = vadd.f32 %v901_v34, %v899_v28 }
 0x417   :  { %v865_v33 = vpop.f32.mrf.mxu2 }
 0x418   :  { %v885_v36 = vadd.f32 %v884_v29, %v865_v33 }
 0x41a   :  { %v889_v39 = vadd.f32 %v888_v35, %v885_v36  ;;  %v900_v40 = vmul.f32 %v885_v36, %v885_v36 }
 0x41c   :  { %v890_v48 = vrot.slane %v889_v39, 4  ;;  %v903_v41 = vadd.f32 %v902_v38, %v900_v40  ;;  %v6514_v40 = vld [vmem:[#allocation2 + $0x1b8] sm:$0xff] }
 0x41d   :  { %1128 = vmatpush.bf16.msra.mxu1 %v6514_v40  ;;  %v6536_v40 = vld [vmem:[#allocation2 + $0x268] sm:$0xff] }
 0x41e   :  { %v891_v49 = vadd.f32 %v890_v48, %v889_v39  ;;  %v904_v50 = vrot.slane %v903_v41, 4 }
 0x420   :  { %v892_v51 = vrot.slane %v891_v49, 2  ;;  %v905_v44 = vadd.f32 %v904_v50, %v903_v41 }
 0x422   :  { %v893_v32 = vadd.f32 %v892_v51, %v891_v49  ;;  %v906_v53 = vrot.slane %v905_v44, 2 }
 0x424   :  { %v894_v54 = vrot.slane %v893_v32, 1  ;;  %v907_v31 = vadd.f32 %v906_v53, %v905_v44  ;;  %v6510_v53 = vld [vmem:[#allocation2 + $0x198] sm:$0xff] }
 0x426   :  { %v895_v30 = vadd.f32 %v894_v54, %v893_v32  ;;  %v908_v56 = vrot.slane %v907_v31, 1  ;;  %v6511_v32 = vld [vmem:[#allocation2 + $0x1a0] sm:$0xff]  ;;  %v6509_v54 = vld [vmem:[#allocation2 + $0x190] sm:$0xff] }
 0x428   :  { %v896_v57 = vmul.f32 %v895_v30, %v7027_v8  ;;  %v909_v58 = vadd.f32 %v908_v56, %v907_v31  ;;  %v6508_v31 = vld [vmem:[#allocation2 + $0x188] sm:$0xff] }
 0x42a   :  { %v910_v60 = vmul.f32 %v909_v58, %v7027_v8  ;;  %v911_v61 = vmul.f32 %v896_v57, %v896_v57 }
 0x42c   :  { %v912_v62 = vsub.f32 %v910_v60, %v911_v61 }
 0x42e   :  { %v913_v0 = vmax.f32 %v912_v62, 0.0 }
 0x430   :  { %v915_v1 = vadd.f32 1e-05, %v913_v0 }
 0x432   :  { %6772 = vrsqrt.f32 %v915_v1  ;;  %vm922_vm9 = vweird.f32 %v915_v1 }
 0x438   :  { %v6773_v4 = vpop.eup %6772 }
 0x439   :  { %v917_v5 = vmul.f32 %v6773_v4, %v915_v1  ;;  %vm923_vm8 = vweird.f32 %v6773_v4 }
 0x43a   :  { %vm924_vm10 = vmor %vm922_vm9, %vm923_vm8 }
 0x43b   :  { %v918_v7 = vmul.f32 %v6773_v4, %v917_v5 }
 0x43d   :  { %v919_v9 = vmul.f32 0.5, %v918_v7 }
 0x43f   :  { %v920_v10 = vsub.f32 1.5, %v919_v9 }
 0x441   :  { %v921_v12 = vmul.f32 %v6773_v4, %v920_v10 }
 0x443   :  { %v925_v14 = vsel %vm924_vm10, %v6773_v4, %v921_v12 }
 0x444   :  { %v926_v15 = vmul.f32 %v925_v14, %v914_v11 }
 0x446   :  { %v928_v17 = vmul.f32 %v926_v15, %v896_v57  ;;  %v930_v18 = vperm.slane %v926_v15, 0 }
 0x448   :  { %v929_v19 = vsub.f32 %v927_v16, %v928_v17  ;;  %v934_v20 = vmul.f32 %v930_v18, %v885_v36  ;;  %v933_v25 = vmul.f32 %v930_v18, %v7085_v24  ;;  %v931_v26 = vmul.f32 %v930_v18, %v7083_v23  ;;  %v6513_v23 = vld [vmem:[#allocation2 + $0x1b0] sm:$0xff] }
 0x449   :  { %v932_v27 = vmul.f32 %v930_v18, %v7081_v22  ;;  %1129 = vmatpush.bf16.msra.mxu1 %v6513_v23 }
 0x44a   :  { %v935_v21 = vperm.slane %v929_v19, 0  ;;  %v6538_v19 = vld [vmem:[#allocation2 + $0x278] sm:$0xff] }
 0x44c   :  { %v939_v28 = vadd.f32 %v935_v21, %v934_v20  ;;  %v938_v29 = vadd.f32 %v935_v21, %v933_v25  ;;  %v936_v33 = vadd.f32 %v935_v21, %v931_v26  ;;  %v937_v34 = vadd.f32 %v935_v21, %v932_v27 }
 0x44e   :  { %v943_v35 = vmax.f32 %v939_v28, 0.0  ;;  %v942_v37 = vmax.f32 %v938_v29, 0.0  ;;  %v940_v38 = vmax.f32 %v936_v33, 0.0  ;;  %v941_v39 = vmax.f32 %v937_v34, 0.0  ;;  %v6537_v34 = vld [vmem:[#allocation2 + $0x270] sm:$0xff] }
 0x450   :  { %v7105_v48 = vadd.f32 %v943_v35, %v7036_v45  ;;  %v7108_v36 = vadd.f32 %v942_v37, %v7034_v42  ;;  %v7111_v24 = vadd.f32 %v940_v38, %v7038_v46  ;;  %v7114_v22 = vadd.f32 %v941_v39, %v7040_v47  ;;  %v6512_v47 = vld [vmem:[#allocation2 + $0x1a8] sm:$0xff] }
 0x451   :  { %1130 = vmatpush.bf16.msra.mxu1 %v6512_v47  ;;  %v6534_v47 = vld [vmem:[#allocation2 + $0x258] sm:$0xff] }
 0x452   :  { %v950_v41 = vpack.c.bf16 %v7108_v36, %v7108_v36  ;;  %v951_v43 = vpack.c.bf16 %v7105_v48, %v7105_v48  ;;  %v948_v45 = vpack.c.bf16 %v7111_v24, %v7111_v24  ;;  %v949_v42 = vpack.c.bf16 %v7114_v22, %v7114_v22 }
 0x454   :  { %v958_v49 = vunpack.c.l.b16 %v950_v41  ;;  %v959_v46 = vunpack.c.l.b16 %v951_v43  ;;  %v956_v50 = vunpack.c.l.b16 %v948_v45  ;;  %v957_v51 = vunpack.c.l.b16 %v949_v42  ;;  %v6535_v42 = vld [vmem:[#allocation2 + $0x260] sm:$0xff] }
 0x455   :  { %1131 = vmatpush.bf16.msra.mxu1 %v6511_v32 }
 0x456   :  { %v961_v44 = vpack.c.b16 %v959_v46, %v958_v49  ;;  %v960_v52 = vpack.c.b16 %v957_v51, %v956_v50 }
 0x458   :  { %970 = vmatpush.bf16.msra.mxu3 %v961_v44  ;;  %1155 = vmatmul.bf16.vlgmr.msra.gmra.mxu2 %v960_v52 }
 0x459   :  { %1132 = vmatpush.bf16.msra.mxu1 %v6510_v53 }
 0x45c   :  { %971 = vmatpush.bf16.msra.mxu3 %v960_v52 }
 0x45d   :  { %1133 = vmatpush.bf16.msra.mxu1 %v6509_v54  ;;  %v6533_v54 = vld [vmem:[#allocation2 + $0x250] sm:$0xff] }
 0x45f   :  { %5432 = vmatmul.msk.bf16.vlgmr.msra.gmra.mxu3 %vm122_vm0, %v7016_v6 }
 0x461   :  { %1134 = vmatpush.bf16.msra.mxu1 %v6508_v31 }
 0x465   :  { %1135 = vmatpush.bf16.msra.mxu1 %v6507_v55 }
 0x468   :  { %1160 = vmatmul.bf16.gmra.mxu2 %v961_v44 }
 0x469   :  { %1422 = vmatpush.bf16.msrb.mxu1 %v6538_v19 }
 0x46d   :  { %1423 = vmatpush.bf16.msrb.mxu1 %v6537_v34 }
 0x46f   :  { %5433 = vmatmul.msk.bf16.gmra.mxu3 %vm122_vm0, %v7023_v13 }
 0x471   :  { %1424 = vmatpush.bf16.msrb.mxu1 %v6536_v40 }
 0x475   :  { %1425 = vmatpush.bf16.msrb.mxu1 %v6535_v42  ;;  %v6525_v42 = vld [vmem:[#allocation2 + $0x210] sm:$0xff] }
 0x479   :  { %1426 = vmatpush.bf16.msrb.mxu1 %v6534_v47 }
 0x47d   :  { %1427 = vmatpush.bf16.msrb.mxu1 %v6533_v54 }
 0x4db   :  { %v1156_v3 = vpop.f32.mrf.mxu2 }
 0x4e2   :  { %v973_v30 = vpop.f32.mrf.mxu3 }
 0x4e3   :  { %v983_v56 = vpack.c.bf16 %v973_v30, %v973_v30  ;;  %v1158_v5 = vpop.f32.mrf.mxu2  ;;  %v6532_v30 = vld [vmem:[#allocation2 + $0x248] sm:$0xff] }
 0x4e4   :  { %1428 = vmatpush.bf16.msrb.mxu1 %v6532_v30 }
 0x4e5   :  { %v991_v59 = vunpack.c.l.b16 %v983_v56 }
 0x4ea   :  { %v975_v57 = vpop.f32.mrf.mxu3 }
 0x4eb   :  { %v984_v58 = vpack.c.bf16 %v975_v57, %v975_v57  ;;  %v1161_v9 = vpop.f32.mrf.mxu2  ;;  %v6531_v57 = vld [vmem:[#allocation2 + $0x240] sm:$0xff] }
 0x4ec   :  { %1429 = vmatpush.bf16.msrb.mxu1 %v6531_v57 }
 0x4ed   :  { %v992_v6 = vunpack.c.l.b16 %v984_v58 }
 0x4ef   :  { %v995_v60 = vpack.c.b16 %v992_v6, %v991_v59 }
 0x4f1   :  { %1136 = vmatmul.bf16.vlgmr.msra.gmra.mxu1 %v995_v60 }
 0x4f2   :  { %v978_v61 = vpop.f32.mrf.mxu3 }
 0x4f3   :  { %v985_v13 = vpack.c.bf16 %v978_v61, %v978_v61  ;;  %v1163_v20 = vpop.f32.mrf.mxu2 }
 0x4f5   :  { %v993_v0 = vunpack.c.l.b16 %v985_v13  ;;  %v1193_v13 = vld [vmem:[#allocation5 + $0x3] sm:$0x1] }
 0x4fa   :  { %v980_v62 = vpop.f32.mrf.mxu3 }
 0x4fb   :  { %v986_v63 = vpack.c.bf16 %v980_v62, %v980_v62 }
 0x4fd   :  { %v994_v1 = vunpack.c.l.b16 %v986_v63 }
 0x4ff   :  { %v996_v2 = vpack.c.b16 %v994_v1, %v993_v0  ;;  %v1206_v1 = vld [vmem:[%s7673_s5 + $0x3] sm:$0x1] }
 0x501   :  { %1141 = vmatmul.bf16.gmra.mxu1 %v996_v2 }
 0x56e   :  { %v1137_v4 = vpop.f32.mrf.mxu1 }
 0x56f   :  { %v7130_v12 = vadd.f32 %v1156_v3, %v1137_v4 }
 0x571   :  { %v1176_v16 = vmul.f32 %v7130_v12, %v7130_v12 }
 0x576   :  { %v1139_v7 = vpop.f32.mrf.mxu1 }
 0x577   :  { %v7128_v11 = vadd.f32 %v1158_v5, %v1139_v7 }
 0x579   :  { %v1177_v15 = vmul.f32 %v7128_v11, %v7128_v11  ;;  %v1166_v17 = vadd.f32 %v7128_v11, %v7130_v12 }
 0x57b   :  { %v1180_v25 = vadd.f32 %v1177_v15, %v1176_v16 }
 0x57e   :  { %v1142_v10 = vpop.f32.mrf.mxu1 }
 0x57f   :  { %v7132_v14 = vadd.f32 %v1161_v9, %v1142_v10 }
 0x581   :  { %v1178_v18 = vmul.f32 %v7132_v14, %v7132_v14  ;;  %v1167_v26 = vadd.f32 %v1166_v17, %v7132_v14 }
 0x583   :  { %v1181_v28 = vadd.f32 %v1180_v25, %v1178_v18 }
 0x586   :  { %v1144_v21 = vpop.f32.mrf.mxu1 }
 0x587   :  { %v1164_v27 = vadd.f32 %v1163_v20, %v1144_v21  ;;  %v6530_v20 = vld [vmem:[#allocation2 + $0x238] sm:$0xff] }
 0x588   :  { %1403 = vmatpush.bf16.msrb.mxu3 %v6530_v20 }
 0x589   :  { %v1168_v29 = vadd.f32 %v1167_v26, %v1164_v27  ;;  %v1179_v33 = vmul.f32 %v1164_v27, %v1164_v27 }
 0x58b   :  { %v1169_v35 = vrot.slane %v1168_v29, 4  ;;  %v1182_v37 = vadd.f32 %v1181_v28, %v1179_v33 }
 0x58d   :  { %v1170_v38 = vadd.f32 %v1169_v35, %v1168_v29  ;;  %v1183_v39 = vrot.slane %v1182_v37, 4  ;;  %v6529_v29 = vld [vmem:[#allocation2 + $0x230] sm:$0xff] }
 0x58e   :  { %1404 = vmatpush.bf16.msrb.mxu3 %v6529_v29 }
 0x58f   :  { %v1171_v23 = vrot.slane %v1170_v38, 2  ;;  %v1184_v41 = vadd.f32 %v1183_v39, %v1182_v37 }
 0x591   :  { %v1172_v43 = vadd.f32 %v1171_v23, %v1170_v38  ;;  %v1185_v45 = vrot.slane %v1184_v41, 2  ;;  %v7154_v23 = vld [vmem:[%s7669_s1] sm:$0xff] }
 0x593   :  { %v1173_v49 = vrot.slane %v1172_v43, 1  ;;  %v1186_v46 = vadd.f32 %v1185_v45, %v1184_v41  ;;  %v7161_v41 = vld [vmem:[%s7669_s1 + $0x8] sm:$0xff]  ;;  %v6526_v45 = vld [vmem:[#allocation2 + $0x218] sm:$0xff] }
 0x595   :  { %v1174_v50 = vadd.f32 %v1173_v49, %v1172_v43  ;;  %v1187_v51 = vrot.slane %v1186_v46, 1  ;;  %v6527_v43 = vld [vmem:[#allocation2 + $0x220] sm:$0xff]  ;;  %v6524_v49 = vld [vmem:[#allocation2 + $0x208] sm:$0xff] }
 0x597   :  { %v1175_v44 = vmul.f32 %v1174_v50, %v7027_v8  ;;  %v1188_v52 = vadd.f32 %v1187_v51, %v1186_v46  ;;  %v6523_v46 = vld [vmem:[#allocation2 + $0x200] sm:$0xff] }
 0x599   :  { %v1189_v32 = vmul.f32 %v1188_v52, %v7027_v8  ;;  %v1190_v53 = vmul.f32 %v1175_v44, %v1175_v44 }
 0x59b   :  { %v1191_v31 = vsub.f32 %v1189_v32, %v1190_v53 }
 0x59d   :  { %v1192_v55 = vmax.f32 %v1191_v31, 0.0 }
 0x59f   :  { %v1194_v56 = vadd.f32 1e-05, %v1192_v55 }
 0x5a1   :  { %6774 = vrsqrt.f32 %v1194_v56  ;;  %vm1201_vm12 = vweird.f32 %v1194_v56 }
 0x5a7   :  { %v6775_v58 = vpop.eup %6774 }
 0x5a8   :  { %v1196_v59 = vmul.f32 %v6775_v58, %v1194_v56  ;;  %vm1202_vm11 = vweird.f32 %v6775_v58 }
 0x5a9   :  { %vm1203_vm13 = vmor %vm1201_vm12, %vm1202_vm11 }
 0x5aa   :  { %v1197_v6 = vmul.f32 %v6775_v58, %v1196_v59 }
 0x5ac   :  { %v1198_v60 = vmul.f32 0.5, %v1197_v6 }
 0x5ae   :  { %v1199_v61 = vsub.f32 1.5, %v1198_v60 }
 0x5b0   :  { %v1200_v62 = vmul.f32 %v6775_v58, %v1199_v61 }
 0x5b2   :  { %v1204_v63 = vsel %vm1203_vm13, %v6775_v58, %v1200_v62 }
 0x5b3   :  { %v1205_v0 = vmul.f32 %v1204_v63, %v1193_v13 }
 0x5b5   :  { %v1207_v2 = vmul.f32 %v1205_v0, %v1175_v44  ;;  %v1209_v3 = vperm.slane %v1205_v0, 0 }
 0x5b7   :  { %v1208_v4 = vsub.f32 %v1206_v1, %v1207_v2  ;;  %v1213_v5 = vmul.f32 %v1209_v3, %v1164_v27  ;;  %v1212_v9 = vmul.f32 %v1209_v3, %v7132_v14  ;;  %v1210_v10 = vmul.f32 %v1209_v3, %v7130_v12 }
 0x5b8   :  { %v1211_v15 = vmul.f32 %v1209_v3, %v7128_v11  ;;  %v6528_v11 = vld [vmem:[#allocation2 + $0x228] sm:$0xff] }
 0x5b9   :  { %v1214_v7 = vperm.slane %v1208_v4, 0  ;;  %1405 = vmatpush.bf16.msrb.mxu3 %v6528_v11 }
 0x5bb   :  { %v1218_v16 = vadd.f32 %v1214_v7, %v1213_v5  ;;  %v1217_v17 = vadd.f32 %v1214_v7, %v1212_v9  ;;  %v1215_v18 = vadd.f32 %v1214_v7, %v1210_v10  ;;  %v1216_v19 = vadd.f32 %v1214_v7, %v1211_v15 }
 0x5bd   :  { %v1222_v21 = vmax.f32 %v1218_v16, 0.0  ;;  %v1221_v25 = vmax.f32 %v1217_v17, 0.0  ;;  %v1219_v26 = vmax.f32 %v1215_v18, 0.0  ;;  %v1220_v28 = vmax.f32 %v1216_v19, 0.0  ;;  %1406 = vmatpush.bf16.msrb.mxu3 %v6527_v43  ;;  %v6554_v17 = vld [vmem:[#allocation2 + $0x2f8] sm:$0xff] }
 0x5bf   :  { %v1226_v33 = vpack.c.bf16 %v1222_v21, %v1222_v21  ;;  %v1225_v27 = vpack.c.bf16 %v1221_v25, %v1221_v25  ;;  %v1223_v34 = vpack.c.bf16 %v1219_v26, %v1219_v26  ;;  %v1224_v35 = vpack.c.bf16 %v1220_v28, %v1220_v28  ;;  %v6553_v26 = vld [vmem:[#allocation2 + $0x2f0] sm:$0xff] }
 0x5c1   :  { %v1233_v14 = vunpack.c.l.b16 %v1225_v27  ;;  %v1234_v37 = vunpack.c.l.b16 %v1226_v33  ;;  %v1231_v12 = vunpack.c.l.b16 %v1223_v34  ;;  %v1232_v38 = vunpack.c.l.b16 %v1224_v35  ;;  %1407 = vmatpush.bf16.msrb.mxu3 %v6526_v45  ;;  %v6552_v34 = vld [vmem:[#allocation2 + $0x2e8] sm:$0xff]  ;;  %v6550_v45 = vld [vmem:[#allocation2 + $0x2d8] sm:$0xff] }
 0x5c3   :  { %v1236_v39 = vpack.c.b16 %v1234_v37, %v1233_v14  ;;  %v1235_v40 = vpack.c.b16 %v1232_v38, %v1231_v12  ;;  %v6551_v38 = vld [vmem:[#allocation2 + $0x2e0] sm:$0xff] }
 0x5c5   :  { %1245 = vmatpush.bf16.msrb.mxu0 %v1236_v39  ;;  %1430 = vmatmul.bf16.vlgmr.msrb.gmra.mxu1 %v1235_v40 }
 0x5c6   :  { %1408 = vmatpush.bf16.msrb.mxu3 %v6525_v42 }
 0x5c9   :  { %1246 = vmatpush.bf16.msrb.mxu0 %v1235_v40 }
 0x5ca   :  { %1409 = vmatpush.bf16.msrb.mxu3 %v6524_v49 }
 0x5cc   :  { %5498 = vmatmul.msk.bf16.vlgmr.msrb.gmra.mxu0 %vm122_vm0, %v7154_v23 }
 0x5ce   :  { %1410 = vmatpush.bf16.msrb.mxu3 %v6523_v46 }
 0x5d2   :  { %1701 = vmatpush.bf16.msra.mxu3 %v6554_v17 }
 0x5d5   :  { %1435 = vmatmul.bf16.gmra.mxu1 %v1236_v39 }
 0x5d6   :  { %1702 = vmatpush.bf16.msra.mxu3 %v6553_v26 }
 0x5da   :  { %1703 = vmatpush.bf16.msra.mxu3 %v6552_v34 }
 0x5dc   :  { %5499 = vmatmul.msk.bf16.gmra.mxu0 %vm122_vm0, %v7161_v41 }
 0x5de   :  { %1704 = vmatpush.bf16.msra.mxu3 %v6551_v38  ;;  %v6539_v38 = vld [vmem:[#allocation2 + $0x280] sm:$0xff] }
 0x5e2   :  { %1705 = vmatpush.bf16.msra.mxu3 %v6550_v45 }
 0x642   :  { %v1431_v59 = vpop.f32.mrf.mxu1 }
 0x649   :  { %v1248_v50 = vpop.f32.mrf.mxu0 }
 0x64a   :  { %v1258_v51 = vpack.c.bf16 %v1248_v50, %v1248_v50  ;;  %v1433_v60 = vpop.f32.mrf.mxu1  ;;  %v6549_v50 = vld [vmem:[#allocation2 + $0x2d0] sm:$0xff] }
 0x64b   :  { %1706 = vmatpush.bf16.msra.mxu3 %v6549_v50 }
 0x64c   :  { %v1266_v52 = vunpack.c.l.b16 %v1258_v51 }
 0x651   :  { %v1250_v47 = vpop.f32.mrf.mxu0 }
 0x652   :  { %v1259_v44 = vpack.c.bf16 %v1250_v47, %v1250_v47  ;;  %v1436_v13 = vpop.f32.mrf.mxu1 }
 0x654   :  { %v1267_v32 = vunpack.c.l.b16 %v1259_v44  ;;  %v6548_v44 = vld [vmem:[#allocation2 + $0x2c8] sm:$0xff] }
 0x655   :  { %1707 = vmatpush.bf16.msra.mxu3 %v6548_v44 }
 0x656   :  { %v1270_v53 = vpack.c.b16 %v1267_v32, %v1266_v52  ;;  %v6547_v52 = vld [vmem:[#allocation2 + $0x2c0] sm:$0xff] }
 0x658   :  { %1411 = vmatmul.bf16.vlgmr.msrb.gmra.mxu3 %v1270_v53 }
 0x659   :  { %v1253_v54 = vpop.f32.mrf.mxu0  ;;  %1708 = vmatpush.bf16.msra.mxu3 %v6547_v52 }
 0x65a   :  { %v1260_v31 = vpack.c.bf16 %v1253_v54, %v1253_v54  ;;  %v1438_v7 = vpop.f32.mrf.mxu1 }
 0x65c   :  { %v1268_v56 = vunpack.c.l.b16 %v1260_v31 }
 0x661   :  { %v1255_v55 = vpop.f32.mrf.mxu0 }
 0x662   :  { %v1261_v30 = vpack.c.bf16 %v1255_v55, %v1255_v55 }
 0x664   :  { %v1269_v57 = vunpack.c.l.b16 %v1261_v30  ;;  %v1468_v30 = vld [vmem:[#allocation5 + $0x4] sm:$0x1] }
 0x666   :  { %v1271_v58 = vpack.c.b16 %v1269_v57, %v1268_v56 }
 0x668   :  { %1416 = vmatmul.bf16.gmra.mxu3 %v1271_v58 }
 0x6db   :  { %v1412_v6 = vpop.f32.mrf.mxu3 }
 0x6dc   :  { %v7167_v0 = vadd.f32 %v1431_v59, %v1412_v6  ;;  %v1481_v59 = vld [vmem:[%s7673_s5 + $0x4] sm:$0x1] }
 0x6de   :  { %v1451_v3 = vmul.f32 %v7167_v0, %v7167_v0 }
 0x6e3   :  { %v1414_v61 = vpop.f32.mrf.mxu3 }
 0x6e4   :  { %v7165_v63 = vadd.f32 %v1433_v60, %v1414_v61 }
 0x6e6   :  { %v1452_v2 = vmul.f32 %v7165_v63, %v7165_v63  ;;  %v1441_v4 = vadd.f32 %v7165_v63, %v7167_v0 }
 0x6e8   :  { %v1455_v10 = vadd.f32 %v1452_v2, %v1451_v3 }
 0x6eb   :  { %v1417_v62 = vpop.f32.mrf.mxu3 }
 0x6ec   :  { %v7169_v1 = vadd.f32 %v1436_v13, %v1417_v62 }
 0x6ee   :  { %v1453_v5 = vmul.f32 %v7169_v1, %v7169_v1  ;;  %v1442_v15 = vadd.f32 %v1441_v4, %v7169_v1 }
 0x6f0   :  { %v1456_v18 = vadd.f32 %v1455_v10, %v1453_v5 }
 0x6f3   :  { %v1419_v9 = vpop.f32.mrf.mxu3 }
 0x6f4   :  { %v1439_v16 = vadd.f32 %v1438_v7, %v1419_v9 }
 0x6f6   :  { %v1443_v19 = vadd.f32 %v1442_v15, %v1439_v16  ;;  %v1454_v20 = vmul.f32 %v1439_v16, %v1439_v16 }
 0x6f8   :  { %v1444_v21 = vrot.slane %v1443_v19, 4  ;;  %v1457_v25 = vadd.f32 %v1456_v18, %v1454_v20  ;;  %v6546_v20 = vld [vmem:[#allocation2 + $0x2b8] sm:$0xff] }
 0x6f9   :  { %1682 = vmatpush.bf16.msra.mxu0 %v6546_v20 }
 0x6fa   :  { %v1445_v28 = vadd.f32 %v1444_v21, %v1443_v19  ;;  %v1458_v29 = vrot.slane %v1457_v25, 4 }
 0x6fc   :  { %v1446_v33 = vrot.slane %v1445_v28, 2  ;;  %v1459_v27 = vadd.f32 %v1458_v29, %v1457_v25 }
 0x6fe   :  { %v1447_v35 = vadd.f32 %v1446_v33, %v1445_v28  ;;  %v1460_v14 = vrot.slane %v1459_v27, 2 }
 0x700   :  { %v1448_v37 = vrot.slane %v1447_v35, 1  ;;  %v1461_v12 = vadd.f32 %v1460_v14, %v1459_v27  ;;  %v6542_v14 = vld [vmem:[#allocation2 + $0x298] sm:$0xff] }
 0x702   :  { %v1449_v11 = vadd.f32 %v1448_v37, %v1447_v35  ;;  %v1462_v39 = vrot.slane %v1461_v12, 1  ;;  %v6543_v35 = vld [vmem:[#allocation2 + $0x2a0] sm:$0xff]  ;;  %v6541_v37 = vld [vmem:[#allocation2 + $0x290] sm:$0xff] }
 0x704   :  { %v1450_v40 = vmul.f32 %v1449_v11, %v7027_v8  ;;  %v1463_v43 = vadd.f32 %v1462_v39, %v1461_v12  ;;  %v6540_v12 = vld [vmem:[#allocation2 + $0x288] sm:$0xff] }
 0x706   :  { %v1464_v42 = vmul.f32 %v1463_v43, %v7027_v8  ;;  %v1465_v49 = vmul.f32 %v1450_v40, %v1450_v40 }
 0x708   :  { %v1466_v46 = vsub.f32 %v1464_v42, %v1465_v49 }
 0x70a   :  { %v1467_v51 = vmax.f32 %v1466_v46, 0.0 }
 0x70c   :  { %v1469_v47 = vadd.f32 1e-05, %v1467_v51 }
 0x70e   :  { %6776 = vrsqrt.f32 %v1469_v47  ;;  %vm1476_vm15 = vweird.f32 %v1469_v47 }
 0x714   :  { %v6777_v32 = vpop.eup %6776 }
 0x715   :  { %v1471_v53 = vmul.f32 %v6777_v32, %v1469_v47  ;;  %vm1477_vm14 = vweird.f32 %v6777_v32 }
 0x716   :  { %vm1478_vm1 = vmor %vm1476_vm15, %vm1477_vm14 }
 0x717   :  { %v1472_v54 = vmul.f32 %v6777_v32, %v1471_v53 }
 0x719   :  { %v1473_v31 = vmul.f32 0.5, %v1472_v54 }
 0x71b   :  { %v1474_v55 = vsub.f32 1.5, %v1473_v31 }
 0x71d   :  { %v1475_v56 = vmul.f32 %v6777_v32, %v1474_v55 }
 0x71f   :  { %v1479_v57 = vsel %vm1478_vm1, %v6777_v32, %v1475_v56 }
 0x720   :  { %v1480_v58 = vmul.f32 %v1479_v57, %v1468_v30 }
 0x722   :  { %v1482_v6 = vmul.f32 %v1480_v58, %v1450_v40  ;;  %v1484_v60 = vperm.slane %v1480_v58, 0 }
 0x724   :  { %v1483_v61 = vsub.f32 %v1481_v59, %v1482_v6  ;;  %v1488_v13 = vmul.f32 %v1484_v60, %v1439_v16  ;;  %v1487_v2 = vmul.f32 %v1484_v60, %v7169_v1  ;;  %v1485_v3 = vmul.f32 %v1484_v60, %v7167_v0  ;;  %v6545_v0 = vld [vmem:[#allocation2 + $0x2b0] sm:$0xff] }
 0x725   :  { %v1486_v4 = vmul.f32 %v1484_v60, %v7165_v63  ;;  %1683 = vmatpush.bf16.msra.mxu0 %v6545_v0 }
 0x726   :  { %v1489_v62 = vperm.slane %v1483_v61, 0 }
 0x728   :  { %v1493_v5 = vadd.f32 %v1489_v62, %v1488_v13  ;;  %v1492_v7 = vadd.f32 %v1489_v62, %v1487_v2  ;;  %v1490_v9 = vadd.f32 %v1489_v62, %v1485_v3  ;;  %v1491_v10 = vadd.f32 %v1489_v62, %v1486_v4  ;;  %v6570_v62 = vld [vmem:[#allocation2 + $0x378] sm:$0xff] }
 0x72a   :  { %v1497_v15 = vmax.f32 %v1493_v5, 0.0  ;;  %v1496_v17 = vmax.f32 %v1492_v7, 0.0  ;;  %v1494_v18 = vmax.f32 %v1490_v9, 0.0  ;;  %v1495_v19 = vmax.f32 %v1491_v10, 0.0 }
 0x72c   :  { %v7189_v21 = vadd.f32 %v1497_v15, %v7105_v48  ;;  %v7192_v16 = vadd.f32 %v1496_v17, %v7108_v36  ;;  %v7195_v1 = vadd.f32 %v1494_v18, %v7111_v24  ;;  %v7198_v63 = vadd.f32 %v1495_v19, %v7114_v22  ;;  %v6544_v22 = vld [vmem:[#allocation2 + $0x2a8] sm:$0xff]  ;;  %v6569_v17 = vld [vmem:[#allocation2 + $0x370] sm:$0xff] }
 0x72d   :  { %1684 = vmatpush.bf16.msra.mxu0 %v6544_v22 }
 0x72e   :  { %v1504_v25 = vpack.c.bf16 %v7192_v16, %v7192_v16  ;;  %v1505_v26 = vpack.c.bf16 %v7189_v21, %v7189_v21  ;;  %v1502_v48 = vpack.c.bf16 %v7195_v1, %v7195_v1  ;;  %v1503_v36 = vpack.c.bf16 %v7198_v63, %v7198_v63 }
 0x730   :  { %v1512_v28 = vunpack.c.l.b16 %v1504_v25  ;;  %v1513_v24 = vunpack.c.l.b16 %v1505_v26  ;;  %v1510_v29 = vunpack.c.l.b16 %v1502_v48  ;;  %v1511_v33 = vunpack.c.l.b16 %v1503_v36  ;;  %v6568_v25 = vld [vmem:[#allocation2 + $0x368] sm:$0xff] }
 0x731   :  { %1685 = vmatpush.bf16.msra.mxu0 %v6543_v35 }
 0x732   :  { %v1515_v27 = vpack.c.b16 %v1513_v24, %v1512_v28  ;;  %v1514_v34 = vpack.c.b16 %v1511_v33, %v1510_v29  ;;  %v6567_v24 = vld [vmem:[#allocation2 + $0x360] sm:$0xff] }
 0x734   :  { %1524 = vmatpush.bf16.msrb.mxu2 %v1515_v27  ;;  %1709 = vmatmul.bf16.vlgmr.msra.gmra.mxu3 %v1514_v34 }
 0x735   :  { %1686 = vmatpush.bf16.msra.mxu0 %v6542_v14 }
 0x738   :  { %1525 = vmatpush.bf16.msrb.mxu2 %v1514_v34  ;;  %v6566_v34 = vld [vmem:[#allocation2 + $0x358] sm:$0xff] }
 0x739   :  { %1687 = vmatpush.bf16.msra.mxu0 %v6541_v37 }
 0x73b   :  { %5564 = vmatmul.msk.bf16.vlgmr.msrb.gmra.mxu2 %vm122_vm0, %v7154_v23 }
 0x73d   :  { %1688 = vmatpush.bf16.msra.mxu0 %v6540_v12 }
 0x741   :  { %1689 = vmatpush.bf16.msra.mxu0 %v6539_v38  ;;  %v6565_v38 = vld [vmem:[#allocation2 + $0x350] sm:$0xff] }
 0x744   :  { %1714 = vmatmul.bf16.gmra.mxu3 %v1515_v27 }
 0x745   :  { %1976 = vmatpush.bf16.msrb.mxu0 %v6570_v62 }
 0x749   :  { %1977 = vmatpush.bf16.msrb.mxu0 %v6569_v17  ;;  %v6561_v17 = vld [vmem:[#allocation2 + $0x330] sm:$0xff] }
 0x74b   :  { %5565 = vmatmul.msk.bf16.gmra.mxu2 %vm122_vm0, %v7161_v41 }
 0x74d   :  { %1978 = vmatpush.bf16.msrb.mxu0 %v6568_v25 }
 0x751   :  { %1979 = vmatpush.bf16.msrb.mxu0 %v6567_v24  ;;  %v6557_v24 = vld [vmem:[#allocation2 + $0x310] sm:$0xff] }
 0x755   :  { %1980 = vmatpush.bf16.msrb.mxu0 %v6566_v34 }
 0x759   :  { %1981 = vmatpush.bf16.msrb.mxu0 %v6565_v38 }
 0x7b7   :  { %v1710_v53 = vpop.f32.mrf.mxu3 }
 0x7be   :  { %v1527_v11 = vpop.f32.mrf.mxu2 }
 0x7bf   :  { %v1537_v39 = vpack.c.bf16 %v1527_v11, %v1527_v11  ;;  %v1712_v31 = vpop.f32.mrf.mxu3 }
 0x7c1   :  { %v1545_v45 = vunpack.c.l.b16 %v1537_v39 }
 0x7c6   :  { %v1529_v40 = vpop.f32.mrf.mxu2 }
 0x7c7   :  { %v1538_v43 = vpack.c.bf16 %v1529_v40, %v1529_v40  ;;  %v1715_v30 = vpop.f32.mrf.mxu3  ;;  %v6564_v40 = vld [vmem:[#allocation2 + $0x348] sm:$0xff] }
 0x7c8   :  { %1982 = vmatpush.bf16.msrb.mxu0 %v6564_v40 }
 0x7c9   :  { %v1546_v42 = vunpack.c.l.b16 %v1538_v43 }
 0x7cb   :  { %v1549_v49 = vpack.c.b16 %v1546_v42, %v1545_v45  ;;  %v6563_v45 = vld [vmem:[#allocation2 + $0x340] sm:$0xff] }
 0x7cc   :  { %1983 = vmatpush.bf16.msrb.mxu0 %v6563_v45 }
 0x7cd   :  { %1690 = vmatmul.bf16.vlgmr.msra.gmra.mxu0 %v1549_v49 }
 0x7ce   :  { %v1532_v46 = vpop.f32.mrf.mxu2 }
 0x7cf   :  { %v1539_v50 = vpack.c.bf16 %v1532_v46, %v1532_v46  ;;  %v1717_v2 = vpop.f32.mrf.mxu3 }
 0x7d1   :  { %v1547_v44 = vunpack.c.l.b16 %v1539_v50 }
 0x7d6   :  { %v1534_v51 = vpop.f32.mrf.mxu2 }
 0x7d7   :  { %v1540_v47 = vpack.c.bf16 %v1534_v51, %v1534_v51 }
 0x7d9   :  { %v1548_v52 = vunpack.c.l.b16 %v1540_v47  ;;  %v1747_v47 = vld [vmem:[#allocation5 + $0x5] sm:$0x1] }
 0x7db   :  { %v1550_v32 = vpack.c.b16 %v1548_v52, %v1547_v44 }
 0x7dd   :  { %1695 = vmatmul.bf16.gmra.mxu0 %v1550_v32 }
 0x84a   :  { %v1691_v54 = vpop.f32.mrf.mxu0 }
 0x84b   :  { %v7214_v58 = vadd.f32 %v1710_v53, %v1691_v54  ;;  %v1760_v53 = vld [vmem:[%s7673_s5 + $0x5] sm:$0x1] }
 0x84d   :  { %v1730_v60 = vmul.f32 %v7214_v58, %v7214_v58 }
 0x852   :  { %v1693_v55 = vpop.f32.mrf.mxu0 }
 0x853   :  { %v7212_v57 = vadd.f32 %v1712_v31, %v1693_v55 }
 0x855   :  { %v1731_v6 = vmul.f32 %v7212_v57, %v7212_v57  ;;  %v1720_v61 = vadd.f32 %v7212_v57, %v7214_v58 }
 0x857   :  { %v1734_v4 = vadd.f32 %v1731_v6, %v1730_v60 }
 0x85a   :  { %v1696_v56 = vpop.f32.mrf.mxu0 }
 0x85b   :  { %v7216_v59 = vadd.f32 %v1715_v30, %v1696_v56 }
 0x85d   :  { %v1732_v13 = vmul.f32 %v7216_v59, %v7216_v59  ;;  %v1721_v5 = vadd.f32 %v1720_v61, %v7216_v59 }
 0x85f   :  { %v1735_v9 = vadd.f32 %v1734_v4, %v1732_v13  ;;  %v6562_v4 = vld [vmem:[#allocation2 + $0x338] sm:$0xff] }
 0x860   :  { %1957 = vmatpush.bf16.msra.mxu2 %v6562_v4 }
 0x862   :  { %v1698_v3 = vpop.f32.mrf.mxu0 }
 0x863   :  { %v1718_v7 = vadd.f32 %v1717_v2, %v1698_v3 }
 0x864   :  { %1958 = vmatpush.bf16.msra.mxu2 %v6561_v17 }
 0x865   :  { %v1722_v10 = vadd.f32 %v1721_v5, %v1718_v7  ;;  %v1733_v15 = vmul.f32 %v1718_v7, %v1718_v7 }
 0x867   :  { %v1723_v18 = vrot.slane %v1722_v10, 4  ;;  %v1736_v19 = vadd.f32 %v1735_v9, %v1733_v15 }
 0x869   :  { %v1724_v20 = vadd.f32 %v1723_v18, %v1722_v10  ;;  %v1737_v0 = vrot.slane %v1736_v19, 4 }
 0x86b   :  { %v1725_v26 = vrot.slane %v1724_v20, 2  ;;  %v1738_v48 = vadd.f32 %v1737_v0, %v1736_v19 }
 0x86d   :  { %v1726_v36 = vadd.f32 %v1725_v26, %v1724_v20  ;;  %v1739_v28 = vrot.slane %v1738_v48, 2 }
 0x86f   :  { %v1727_v29 = vrot.slane %v1726_v36, 1  ;;  %v1740_v33 = vadd.f32 %v1739_v28, %v1738_v48  ;;  %v6558_v28 = vld [vmem:[#allocation2 + $0x318] sm:$0xff] }
 0x871   :  { %v1728_v22 = vadd.f32 %v1727_v29, %v1726_v36  ;;  %v1741_v27 = vrot.slane %v1740_v33, 1  ;;  %v6559_v36 = vld [vmem:[#allocation2 + $0x320] sm:$0xff]  ;;  %v6556_v29 = vld [vmem:[#allocation2 + $0x308] sm:$0xff] }
 0x873   :  { %v1729_v35 = vmul.f32 %v1728_v22, %v7027_v8  ;;  %v1742_v14 = vadd.f32 %v1741_v27, %v1740_v33  ;;  %v6555_v33 = vld [vmem:[#allocation2 + $0x300] sm:$0xff] }
 0x875   :  { %v1743_v37 = vmul.f32 %v1742_v14, %v7027_v8  ;;  %v1744_v12 = vmul.f32 %v1729_v35, %v1729_v35 }
 0x877   :  { %v1745_v11 = vsub.f32 %v1743_v37, %v1744_v12 }
 0x879   :  { %v1746_v39 = vmax.f32 %v1745_v11, 0.0 }
 0x87b   :  { %v1748_v43 = vadd.f32 1e-05, %v1746_v39 }
 0x87d   :  { %6778 = vrsqrt.f32 %v1748_v43  ;;  %vm1755_vm3 = vweird.f32 %v1748_v43 }
 0x883   :  { %v6779_v42 = vpop.eup %6778 }
 0x884   :  { %v1750_v49 = vmul.f32 %v6779_v42, %v1748_v43  ;;  %vm1756_vm2 = vweird.f32 %v6779_v42 }
 0x885   :  { %vm1757_vm4 = vmor %vm1755_vm3, %vm1756_vm2 }
 0x886   :  { %v1751_v46 = vmul.f32 %v6779_v42, %v1750_v49 }
 0x888   :  { %v1752_v50 = vmul.f32 0.5, %v1751_v46 }
 0x88a   :  { %v1753_v51 = vsub.f32 1.5, %v1752_v50 }
 0x88c   :  { %v1754_v44 = vmul.f32 %v6779_v42, %v1753_v51 }
 0x88e   :  { %v1758_v52 = vsel %vm1757_vm4, %v6779_v42, %v1754_v44 }
 0x88f   :  { %v1759_v32 = vmul.f32 %v1758_v52, %v1747_v47 }
 0x891   :  { %v1761_v54 = vmul.f32 %v1759_v32, %v1729_v35  ;;  %v1763_v31 = vperm.slane %v1759_v32, 0 }
 0x893   :  { %v1762_v55 = vsub.f32 %v1760_v53, %v1761_v54  ;;  %v1767_v30 = vmul.f32 %v1763_v31, %v1718_v7  ;;  %v1766_v6 = vmul.f32 %v1763_v31, %v7216_v59  ;;  %v1764_v60 = vmul.f32 %v1763_v31, %v7214_v58 }
 0x894   :  { %v1765_v61 = vmul.f32 %v1763_v31, %v7212_v57  ;;  %v6560_v57 = vld [vmem:[#allocation2 + $0x328] sm:$0xff] }
 0x895   :  { %v1768_v56 = vperm.slane %v1762_v55, 0  ;;  %1959 = vmatpush.bf16.msra.mxu2 %v6560_v57 }
 0x897   :  { %v1772_v13 = vadd.f32 %v1768_v56, %v1767_v30  ;;  %v1771_v62 = vadd.f32 %v1768_v56, %v1766_v6  ;;  %v1769_v2 = vadd.f32 %v1768_v56, %v1764_v60  ;;  %v1770_v3 = vadd.f32 %v1768_v56, %v1765_v61 }
 0x899   :  { %v1776_v5 = vmax.f32 %v1772_v13, 0.0  ;;  %v1775_v9 = vmax.f32 %v1771_v62, 0.0  ;;  %v1773_v10 = vmax.f32 %v1769_v2, 0.0  ;;  %v1774_v15 = vmax.f32 %v1770_v3, 0.0  ;;  %1960 = vmatpush.bf16.msra.mxu2 %v6559_v36  ;;  %v6586_v62 = vld [vmem:[#allocation2 + $0x3f8] sm:$0xff] }
 0x89b   :  { %v1780_v18 = vpack.c.bf16 %v1776_v5, %v1776_v5  ;;  %v1779_v7 = vpack.c.bf16 %v1775_v9, %v1775_v9  ;;  %v1777_v19 = vpack.c.bf16 %v1773_v10, %v1773_v10  ;;  %v1778_v20 = vpack.c.bf16 %v1774_v15, %v1774_v15  ;;  %v6585_v10 = vld [vmem:[#allocation2 + $0x3f0] sm:$0xff] }
 0x89d   :  { %v1787_v59 = vunpack.c.l.b16 %v1779_v7  ;;  %v1788_v0 = vunpack.c.l.b16 %v1780_v18  ;;  %v1785_v58 = vunpack.c.l.b16 %v1777_v19  ;;  %v1786_v25 = vunpack.c.l.b16 %v1778_v20  ;;  %1961 = vmatpush.bf16.msra.mxu2 %v6558_v28  ;;  %v6584_v19 = vld [vmem:[#allocation2 + $0x3e8] sm:$0xff]  ;;  %v6582_v28 = vld [vmem:[#allocation2 + $0x3d8] sm:$0xff] }
 0x89f   :  { %v1790_v26 = vpack.c.b16 %v1788_v0, %v1787_v59  ;;  %v1789_v48 = vpack.c.b16 %v1786_v25, %v1785_v58  ;;  %v6583_v25 = vld [vmem:[#allocation2 + $0x3e0] sm:$0xff] }
 0x8a1   :  { %1799 = vmatpush.bf16.msra.mxu1 %v1790_v26  ;;  %1984 = vmatmul.bf16.vlgmr.msrb.gmra.mxu0 %v1789_v48 }
 0x8a2   :  { %1962 = vmatpush.bf16.msra.mxu2 %v6557_v24 }
 0x8a5   :  { %1800 = vmatpush.bf16.msra.mxu1 %v1789_v48 }
 0x8a6   :  { %1963 = vmatpush.bf16.msra.mxu2 %v6556_v29 }
 0x8a8   :  { %5630 = vmatmul.msk.bf16.vlgmr.msra.gmra.mxu1 %vm122_vm0, %v7154_v23 }
 0x8aa   :  { %1964 = vmatpush.bf16.msra.mxu2 %v6555_v33 }
 0x8ae   :  { %2255 = vmatpush.bf16.msrb.mxu2 %v6586_v62 }
 0x8b1   :  { %1989 = vmatmul.bf16.gmra.mxu0 %v1790_v26 }
 0x8b2   :  { %2256 = vmatpush.bf16.msrb.mxu2 %v6585_v10 }
 0x8b6   :  { %2257 = vmatpush.bf16.msrb.mxu2 %v6584_v19 }
 0x8b8   :  { %5631 = vmatmul.msk.bf16.gmra.mxu1 %vm122_vm0, %v7161_v41 }
 0x8ba   :  { %2258 = vmatpush.bf16.msrb.mxu2 %v6583_v25  ;;  %v6571_v25 = vld [vmem:[#allocation2 + $0x380] sm:$0xff] }
 0x8be   :  { %2259 = vmatpush.bf16.msrb.mxu2 %v6582_v28 }
 0x91e   :  { %v1985_v49 = vpop.f32.mrf.mxu0 }
 0x925   :  { %v1802_v22 = vpop.f32.mrf.mxu1 }
 0x926   :  { %v1812_v27 = vpack.c.bf16 %v1802_v22, %v1802_v22  ;;  %v1987_v50 = vpop.f32.mrf.mxu0  ;;  %v6581_v22 = vld [vmem:[#allocation2 + $0x3d0] sm:$0xff] }
 0x927   :  { %2260 = vmatpush.bf16.msrb.mxu2 %v6581_v22 }
 0x928   :  { %v1820_v14 = vunpack.c.l.b16 %v1812_v27 }
 0x92d   :  { %v1804_v34 = vpop.f32.mrf.mxu1 }
 0x92e   :  { %v1813_v35 = vpack.c.bf16 %v1804_v34, %v1804_v34  ;;  %v1990_v47 = vpop.f32.mrf.mxu0  ;;  %v6580_v34 = vld [vmem:[#allocation2 + $0x3c8] sm:$0xff] }
 0x92f   :  { %2261 = vmatpush.bf16.msrb.mxu2 %v6580_v34 }
 0x930   :  { %v1821_v37 = vunpack.c.l.b16 %v1813_v35 }
 0x932   :  { %v1824_v12 = vpack.c.b16 %v1821_v37, %v1820_v14  ;;  %v6579_v14 = vld [vmem:[#allocation2 + $0x3c0] sm:$0xff] }
 0x933   :  { %2262 = vmatpush.bf16.msrb.mxu2 %v6579_v14 }
 0x934   :  { %1965 = vmatmul.bf16.vlgmr.msra.gmra.mxu2 %v1824_v12 }
 0x935   :  { %v1807_v38 = vpop.f32.mrf.mxu1 }
 0x936   :  { %v1814_v11 = vpack.c.bf16 %v1807_v38, %v1807_v38  ;;  %v1992_v56 = vpop.f32.mrf.mxu0 }
 0x938   :  { %v1822_v43 = vunpack.c.l.b16 %v1814_v11 }
 0x93d   :  { %v1809_v39 = vpop.f32.mrf.mxu1 }
 0x93e   :  { %v1815_v40 = vpack.c.bf16 %v1809_v39, %v1809_v39 }
 0x940   :  { %v1823_v45 = vunpack.c.l.b16 %v1815_v40  ;;  %v2022_v40 = vld [vmem:[#allocation5 + $0x6] sm:$0x1] }
 0x942   :  { %v1825_v42 = vpack.c.b16 %v1823_v45, %v1822_v43 }
 0x944   :  { %1970 = vmatmul.bf16.gmra.mxu2 %v1825_v42 }
 0x9b7   :  { %v1966_v46 = vpop.f32.mrf.mxu2 }
 0x9b8   :  { %v7241_v32 = vadd.f32 %v1985_v49, %v1966_v46  ;;  %v2035_v49 = vld [vmem:[%s7673_s5 + $0x6] sm:$0x1] }
 0x9ba   :  { %v2005_v31 = vmul.f32 %v7241_v32, %v7241_v32 }
 0x9bf   :  { %v1968_v51 = vpop.f32.mrf.mxu2 }
 0x9c0   :  { %v7239_v52 = vadd.f32 %v1987_v50, %v1968_v51 }
 0x9c2   :  { %v2006_v54 = vmul.f32 %v7239_v52, %v7239_v52  ;;  %v1995_v55 = vadd.f32 %v7239_v52, %v7241_v32 }
 0x9c4   :  { %v2009_v60 = vadd.f32 %v2006_v54, %v2005_v31 }
 0x9c7   :  { %v1971_v44 = vpop.f32.mrf.mxu2 }
 0x9c8   :  { %v7243_v53 = vadd.f32 %v1990_v47, %v1971_v44 }
 0x9ca   :  { %v2007_v30 = vmul.f32 %v7243_v53, %v7243_v53  ;;  %v1996_v61 = vadd.f32 %v1995_v55, %v7243_v53 }
 0x9cc   :  { %v2010_v2 = vadd.f32 %v2009_v60, %v2007_v30 }
 0x9cf   :  { %v1973_v6 = vpop.f32.mrf.mxu2 }
 0x9d0   :  { %v1993_v13 = vadd.f32 %v1992_v56, %v1973_v6 }
 0x9d2   :  { %v1997_v3 = vadd.f32 %v1996_v61, %v1993_v13  ;;  %v2008_v4 = vmul.f32 %v1993_v13, %v1993_v13 }
 0x9d4   :  { %v1998_v5 = vrot.slane %v1997_v3, 4  ;;  %v2011_v9 = vadd.f32 %v2010_v2, %v2008_v4  ;;  %v6578_v4 = vld [vmem:[#allocation2 + $0x3b8] sm:$0xff] }
 0x9d5   :  { %2236 = vmatpush.bf16.msrb.mxu1 %v6578_v4  ;;  %v6600_v4 = vld [vmem:[#allocation2 + $0x468] sm:$0xff] }
 0x9d6   :  { %v1999_v15 = vadd.f32 %v1998_v5, %v1997_v3  ;;  %v2012_v17 = vrot.slane %v2011_v9, 4 }
 0x9d8   :  { %v2000_v18 = vrot.slane %v1999_v15, 2  ;;  %v2013_v7 = vadd.f32 %v2012_v17, %v2011_v9 }
 0x9da   :  { %v2001_v20 = vadd.f32 %v2000_v18, %v1999_v15  ;;  %v2014_v59 = vrot.slane %v2013_v7, 2 }
 0x9dc   :  { %v2002_v0 = vrot.slane %v2001_v20, 1  ;;  %v2015_v58 = vadd.f32 %v2014_v59, %v2013_v7  ;;  %v6576_v59 = vld [vmem:[#allocation2 + $0x3a8] sm:$0xff] }
 0x9de   :  { %v2003_v57 = vadd.f32 %v2002_v0, %v2001_v20  ;;  %v2016_v26 = vrot.slane %v2015_v58, 1 }
 0x9e0   :  { %v2004_v48 = vmul.f32 %v2003_v57, %v7027_v8  ;;  %v2017_v36 = vadd.f32 %v2016_v26, %v2015_v58  ;;  %v6572_v58 = vld [vmem:[#allocation2 + $0x388] sm:$0xff] }
 0x9e2   :  { %v2018_v24 = vmul.f32 %v2017_v36, %v7027_v8  ;;  %v2019_v29 = vmul.f32 %v2004_v48, %v2004_v48 }
 0x9e4   :  { %v2020_v33 = vsub.f32 %v2018_v24, %v2019_v29 }
 0x9e6   :  { %v2021_v27 = vmax.f32 %v2020_v33, 0.0 }
 0x9e8   :  { %v2023_v35 = vadd.f32 1e-05, %v2021_v27 }
 0x9ea   :  { %6780 = vrsqrt.f32 %v2023_v35  ;;  %vm2030_vm6 = vweird.f32 %v2023_v35 }
 0x9f0   :  { %v6781_v37 = vpop.eup %6780 }
 0x9f1   :  { %v2025_v12 = vmul.f32 %v6781_v37, %v2023_v35  ;;  %vm2031_vm5 = vweird.f32 %v6781_v37 }
 0x9f2   :  { %vm2032_vm7 = vmor %vm2030_vm6, %vm2031_vm5 }
 0x9f3   :  { %v2026_v38 = vmul.f32 %v6781_v37, %v2025_v12 }
 0x9f5   :  { %v2027_v11 = vmul.f32 0.5, %v2026_v38 }
 0x9f7   :  { %v2028_v39 = vsub.f32 1.5, %v2027_v11 }
 0x9f9   :  { %v2029_v43 = vmul.f32 %v6781_v37, %v2028_v39 }
 0x9fb   :  { %v2033_v45 = vsel %vm2032_vm7, %v6781_v37, %v2029_v43 }
 0x9fc   :  { %v2034_v42 = vmul.f32 %v2033_v45, %v2022_v40 }
 0x9fe   :  { %v2036_v46 = vmul.f32 %v2034_v42, %v2004_v48  ;;  %v2038_v50 = vperm.slane %v2034_v42, 0 }
 0xa00   :  { %v2037_v51 = vsub.f32 %v2035_v49, %v2036_v46  ;;  %v2042_v47 = vmul.f32 %v2038_v50, %v1993_v13  ;;  %v2041_v54 = vmul.f32 %v2038_v50, %v7243_v53  ;;  %v2039_v31 = vmul.f32 %v2038_v50, %v7241_v32  ;;  %v6577_v32 = vld [vmem:[#allocation2 + $0x3b0] sm:$0xff] }
 0xa01   :  { %v2040_v55 = vmul.f32 %v2038_v50, %v7239_v52  ;;  %2237 = vmatpush.bf16.msrb.mxu1 %v6577_v32  ;;  %v6599_v32 = vld [vmem:[#allocation2 + $0x460] sm:$0xff] }
 0xa02   :  { %v2043_v44 = vperm.slane %v2037_v51, 0  ;;  %v6602_v51 = vld [vmem:[#allocation2 + $0x478] sm:$0xff] }
 0xa04   :  { %v2047_v30 = vadd.f32 %v2043_v44, %v2042_v47  ;;  %v2046_v56 = vadd.f32 %v2043_v44, %v2041_v54  ;;  %v2044_v6 = vadd.f32 %v2043_v44, %v2039_v31  ;;  %v2045_v60 = vadd.f32 %v2043_v44, %v2040_v55 }
 0xa05   :  { %2238 = vmatpush.bf16.msrb.mxu1 %v6576_v59 }
 0xa06   :  { %v2051_v61 = vmax.f32 %v2047_v30, 0.0  ;;  %v2050_v62 = vmax.f32 %v2046_v56, 0.0  ;;  %v2048_v2 = vmax.f32 %v2044_v6, 0.0  ;;  %v2049_v3 = vmax.f32 %v2045_v60, 0.0  ;;  %v6601_v60 = vld [vmem:[#allocation2 + $0x470] sm:$0xff] }
 0xa08   :  { %v2054_v5 = vadd.f32 %v2050_v62, %v7192_v16  ;;  %v2055_v13 = vadd.f32 %v2051_v61, %v7189_v21  ;;  %v2052_v9 = vadd.f32 %v2048_v2, %v7195_v1  ;;  %v2053_v53 = vadd.f32 %v2049_v3, %v7198_v63  ;;  %v6575_v21 = vld [vmem:[#allocation2 + $0x3a0] sm:$0xff]  ;;  %v6574_v1 = vld [vmem:[#allocation2 + $0x398] sm:$0xff]  ;;  %v6573_v63 = vld [vmem:[#allocation2 + $0x390] sm:$0xff] }
 0xa09   :  { %2239 = vmatpush.bf16.msrb.mxu1 %v6575_v21 }
 0xa0a   :  { %v2058_v52 = vpack.c.bf16 %v2054_v5, %v2054_v5  ;;  %v2059_v10 = vpack.c.bf16 %v2055_v13, %v2055_v13  ;;  %v2056_v15 = vpack.c.bf16 %v2052_v9, %v2052_v9  ;;  %v2057_v17 = vpack.c.bf16 %v2053_v53, %v2053_v53 }
 0xa0c   :  { %v2066_v18 = vunpack.c.l.b16 %v2058_v52  ;;  %v2067_v7 = vunpack.c.l.b16 %v2059_v10  ;;  %v2064_v19 = vunpack.c.l.b16 %v2056_v15  ;;  %v2065_v20 = vunpack.c.l.b16 %v2057_v17 }
 0xa0d   :  { %2240 = vmatpush.bf16.msrb.mxu1 %v6574_v1  ;;  %v6596_v1 = vld [vmem:[#allocation2 + $0x448] sm:$0xff] }
 0xa0e   :  { %v2069_v0 = vpack.c.b16 %v2067_v7, %v2066_v18  ;;  %v2068_v16 = vpack.c.b16 %v2065_v20, %v2064_v19  ;;  %v6598_v18 = vld [vmem:[#allocation2 + $0x458] sm:$0xff] }
 0xa10   :  { %2078 = vmatpush.bf16.msrb.mxu3 %v2069_v0  ;;  %2263 = vmatmul.bf16.vlgmr.msrb.gmra.mxu2 %v2068_v16 }
 0xa11   :  { %2241 = vmatpush.bf16.msrb.mxu1 %v6573_v63 }
 0xa14   :  { %2079 = vmatpush.bf16.msrb.mxu3 %v2068_v16 }
 0xa15   :  { %2242 = vmatpush.bf16.msrb.mxu1 %v6572_v58  ;;  %v6595_v58 = vld [vmem:[#allocation2 + $0x440] sm:$0xff] }
 0xa17   :  { %5696 = vmatmul.msk.bf16.vlgmr.msrb.gmra.mxu3 %vm122_vm0, %v7154_v23 }
 0xa19   :  { %2243 = vmatpush.bf16.msrb.mxu1 %v6571_v25 }
 0xa1d   :  { %2530 = vmatpush.bf16.msra.mxu1 %v6602_v51 }
 0xa20   :  { %2268 = vmatmul.bf16.gmra.mxu2 %v2069_v0  ;;  %v6597_v0 = vld [vmem:[#allocation2 + $0x450] sm:$0xff] }
 0xa21   :  { %2531 = vmatpush.bf16.msra.mxu1 %v6601_v60 }
 0xa25   :  { %2532 = vmatpush.bf16.msra.mxu1 %v6600_v4  ;;  %v6590_v4 = vld [vmem:[#allocation2 + $0x418] sm:$0xff] }
 0xa27   :  { %5697 = vmatmul.msk.bf16.gmra.mxu3 %vm122_vm0, %v7161_v41 }
 0xa29   :  { %2533 = vmatpush.bf16.msra.mxu1 %v6599_v32 }
 0xa2d   :  { %2534 = vmatpush.bf16.msra.mxu1 %v6598_v18 }
 0xa31   :  { %2535 = vmatpush.bf16.msra.mxu1 %v6597_v0 }
 0xa35   :  { %2536 = vmatpush.bf16.msra.mxu1 %v6596_v1 }
 0xa39   :  { %2537 = vmatpush.bf16.msra.mxu1 %v6595_v58 }
 0xa93   :  { %v2264_v14 = vpop.f32.mrf.mxu2 }
 0xa9a   :  { %v2081_v57 = vpop.f32.mrf.mxu3 }
 0xa9b   :  { %v2091_v26 = vpack.c.bf16 %v2081_v57, %v2081_v57  ;;  %v2266_v12 = vpop.f32.mrf.mxu2 }
 0xa9d   :  { %v2099_v28 = vunpack.c.l.b16 %v2091_v26 }
 0xaa2   :  { %v2083_v48 = vpop.f32.mrf.mxu3 }
 0xaa3   :  { %v2092_v36 = vpack.c.bf16 %v2083_v48, %v2083_v48  ;;  %v2269_v11 = vpop.f32.mrf.mxu2 }
 0xaa5   :  { %v2100_v23 = vunpack.c.l.b16 %v2092_v36 }
 0xaa7   :  { %v2103_v24 = vpack.c.b16 %v2100_v23, %v2099_v28  ;;  %v2301_v28 = vld [vmem:[#allocation5 + $0x7] sm:$0x1] }
 0xaa9   :  { %2244 = vmatmul.bf16.vlgmr.msrb.gmra.mxu1 %v2103_v24 }
 0xaaa   :  { %v2086_v29 = vpop.f32.mrf.mxu3 }
 0xaab   :  { %v2093_v41 = vpack.c.bf16 %v2086_v29, %v2086_v29  ;;  %v2271_v47 = vpop.f32.mrf.mxu2 }
 0xaad   :  { %v2101_v27 = vunpack.c.l.b16 %v2093_v41  ;;  %v2314_v41 = vld [vmem:[%s7673_s5 + $0x7] sm:$0x1] }
 0xab2   :  { %v2088_v33 = vpop.f32.mrf.mxu3 }
 0xab3   :  { %v2094_v22 = vpack.c.bf16 %v2088_v33, %v2088_v33 }
 0xab5   :  { %v2102_v34 = vunpack.c.l.b16 %v2094_v22 }
 0xab7   :  { %v2104_v35 = vpack.c.b16 %v2102_v34, %v2101_v27 }
 0xab9   :  { %2249 = vmatmul.bf16.gmra.mxu1 %v2104_v35 }
 0xb26   :  { %v2245_v37 = vpop.f32.mrf.mxu1 }
 0xb27   :  { %v7272_v43 = vadd.f32 %v2264_v14, %v2245_v37 }
 0xb29   :  { %v2284_v49 = vmul.f32 %v7272_v43, %v7272_v43 }
 0xb2e   :  { %v2247_v38 = vpop.f32.mrf.mxu1 }
 0xb2f   :  { %v7270_v40 = vadd.f32 %v2266_v12, %v2247_v38 }
 0xb31   :  { %v2285_v42 = vmul.f32 %v7270_v40, %v7270_v40  ;;  %v2274_v46 = vadd.f32 %v7270_v40, %v7272_v43 }
 0xb33   :  { %v2288_v54 = vadd.f32 %v2285_v42, %v2284_v49  ;;  %v6594_v49 = vld [vmem:[#allocation2 + $0x438] sm:$0xff] }
 0xb34   :  { %2511 = vmatpush.bf16.msra.mxu3 %v6594_v49 }
 0xb36   :  { %v2250_v39 = vpop.f32.mrf.mxu1 }
 0xb37   :  { %v7274_v45 = vadd.f32 %v2269_v11, %v2250_v39 }
 0xb39   :  { %v2286_v50 = vmul.f32 %v7274_v45, %v7274_v45  ;;  %v2275_v31 = vadd.f32 %v2274_v46, %v7274_v45 }
 0xb3b   :  { %v2289_v30 = vadd.f32 %v2288_v54, %v2286_v50 }
 0xb3e   :  { %v2252_v44 = vpop.f32.mrf.mxu1 }
 0xb3f   :  { %v2272_v55 = vadd.f32 %v2271_v47, %v2252_v44  ;;  %v6593_v44 = vld [vmem:[#allocation2 + $0x430] sm:$0xff] }
 0xb40   :  { %2512 = vmatpush.bf16.msra.mxu3 %v6593_v44 }
 0xb41   :  { %v2276_v56 = vadd.f32 %v2275_v31, %v2272_v55  ;;  %v2287_v6 = vmul.f32 %v2272_v55, %v2272_v55 }
 0xb43   :  { %v2277_v61 = vrot.slane %v2276_v56, 4  ;;  %v2290_v62 = vadd.f32 %v2289_v30, %v2287_v6  ;;  %v6592_v6 = vld [vmem:[#allocation2 + $0x428] sm:$0xff] }
 0xb44   :  { %2513 = vmatpush.bf16.msra.mxu3 %v6592_v6 }
 0xb45   :  { %v2278_v2 = vadd.f32 %v2277_v61, %v2276_v56  ;;  %v2291_v3 = vrot.slane %v2290_v62, 4 }
 0xb47   :  { %v2279_v5 = vrot.slane %v2278_v2, 2  ;;  %v2292_v13 = vadd.f32 %v2291_v3, %v2290_v62  ;;  %v7312_v62 = vld [vmem:[%s7669_s1] sm:$0xff] }
 0xb48   :  { %v6591_v3 = vld [vmem:[#allocation2 + $0x420] sm:$0xff] }
 0xb49   :  { %v2280_v9 = vadd.f32 %v2279_v5, %v2278_v2  ;;  %v2293_v53 = vrot.slane %v2292_v13, 2  ;;  %v7319_v2 = vld [vmem:[%s7669_s1 + $0x8] sm:$0xff]  ;;  %2514 = vmatpush.bf16.msra.mxu3 %v6591_v3  ;;  %v6589_v5 = vld [vmem:[#allocation2 + $0x410] sm:$0xff] }
 0xb4b   :  { %v2281_v52 = vrot.slane %v2280_v9, 1  ;;  %v2294_v10 = vadd.f32 %v2293_v53, %v2292_v13  ;;  %v6588_v13 = vld [vmem:[#allocation2 + $0x408] sm:$0xff] }
 0xb4d   :  { %v2282_v15 = vadd.f32 %v2281_v52, %v2280_v9  ;;  %v2295_v17 = vrot.slane %v2294_v10, 1  ;;  %2515 = vmatpush.bf16.msra.mxu3 %v6590_v4  ;;  %v6587_v9 = vld [vmem:[#allocation2 + $0x400] sm:$0xff] }
 0xb4f   :  { %v2283_v7 = vmul.f32 %v2282_v15, %v7027_v8  ;;  %v2296_v19 = vadd.f32 %v2295_v17, %v2294_v10 }
 0xb51   :  { %v2297_v20 = vmul.f32 %v2296_v19, %v7027_v8  ;;  %v2298_v59 = vmul.f32 %v2283_v7, %v2283_v7  ;;  %2516 = vmatpush.bf16.msra.mxu3 %v6589_v5 }
 0xb53   :  { %v2299_v16 = vsub.f32 %v2297_v20, %v2298_v59 }
 0xb55   :  { %v2300_v21 = vmax.f32 %v2299_v16, 0.0  ;;  %2517 = vmatpush.bf16.msra.mxu3 %v6588_v13 }
 0xb57   :  { %v2302_v63 = vadd.f32 1e-05, %v2300_v21 }
 0xb59   :  { %6782 = vrsqrt.f32 %v2302_v63  ;;  %vm2309_vm9 = vweird.f32 %v2302_v63  ;;  %2518 = vmatpush.bf16.msra.mxu3 %v6587_v9  ;;  %v6613_v9 = vld [vmem:[#allocation2 + $0x4d0] sm:$0xff] }
 0xb5f   :  { %v6783_v25 = vpop.eup %6782 }
 0xb60   :  { %v2304_v57 = vmul.f32 %v6783_v25, %v2302_v63  ;;  %vm2310_vm8 = vweird.f32 %v6783_v25 }
 0xb61   :  { %vm2311_vm10 = vmor %vm2309_vm9, %vm2310_vm8 }
 0xb62   :  { %v2305_v26 = vmul.f32 %v6783_v25, %v2304_v57 }
 0xb64   :  { %v2306_v48 = vmul.f32 0.5, %v2305_v26 }
 0xb66   :  { %v2307_v36 = vsub.f32 1.5, %v2306_v48 }
 0xb68   :  { %v2308_v23 = vmul.f32 %v6783_v25, %v2307_v36 }
 0xb6a   :  { %v2312_v24 = vsel %vm2311_vm10, %v6783_v25, %v2308_v23 }
 0xb6b   :  { %v2313_v29 = vmul.f32 %v2312_v24, %v2301_v28 }
 0xb6d   :  { %v2315_v33 = vmul.f32 %v2313_v29, %v2283_v7  ;;  %v2317_v22 = vperm.slane %v2313_v29, 0 }
 0xb6f   :  { %v2316_v27 = vsub.f32 %v2314_v41, %v2315_v33  ;;  %v2321_v34 = vmul.f32 %v2317_v22, %v2272_v55  ;;  %v2320_v14 = vmul.f32 %v2317_v22, %v7274_v45  ;;  %v2318_v37 = vmul.f32 %v2317_v22, %v7272_v43  ;;  %v6618_v33 = vld [vmem:[#allocation2 + $0x4f8] sm:$0xff] }
 0xb70   :  { %v2319_v12 = vmul.f32 %v2317_v22, %v7270_v40  ;;  %2805 = vmatpush.bf16.msrb.mxu3 %v6618_v33 }
 0xb71   :  { %v2322_v35 = vperm.slane %v2316_v27, 0 }
 0xb73   :  { %v2326_v38 = vadd.f32 %v2322_v35, %v2321_v34  ;;  %v2325_v11 = vadd.f32 %v2322_v35, %v2320_v14  ;;  %v2323_v39 = vadd.f32 %v2322_v35, %v2318_v37  ;;  %v2324_v42 = vadd.f32 %v2322_v35, %v2319_v12 }
 0xb75   :  { %v7293_v46 = vmax.f32 %v2326_v38, 0.0  ;;  %v7295_v50 = vmax.f32 %v2325_v11, 0.0  ;;  %v7297_v51 = vmax.f32 %v2323_v39, 0.0  ;;  %v7299_v47 = vmax.f32 %v2324_v42, 0.0  ;;  %v6617_v11 = vld [vmem:[#allocation2 + $0x4f0] sm:$0xff] }
 0xb76   :  { %2806 = vmatpush.bf16.msrb.mxu3 %v6617_v11  ;;  %v6609_v11 = vld [vmem:[#allocation2 + $0x4b0] sm:$0xff] }
 0xb77   :  { %v2333_v43 = vpack.c.bf16 %v7295_v50, %v7295_v50  ;;  %v2334_v40 = vpack.c.bf16 %v7293_v46, %v7293_v46  ;;  %v2331_v45 = vpack.c.bf16 %v7297_v51, %v7297_v51  ;;  %v2332_v54 = vpack.c.bf16 %v7299_v47, %v7299_v47 }
 0xb79   :  { %v2341_v31 = vunpack.c.l.b16 %v2333_v43  ;;  %v2342_v55 = vunpack.c.l.b16 %v2334_v40  ;;  %v2339_v30 = vunpack.c.l.b16 %v2331_v45  ;;  %v2340_v56 = vunpack.c.l.b16 %v2332_v54  ;;  %v6616_v43 = vld [vmem:[#allocation2 + $0x4e8] sm:$0xff] }
 0xb7a   :  { %2807 = vmatpush.bf16.msrb.mxu3 %v6616_v43 }
 0xb7b   :  { %v2344_v60 = vpack.c.b16 %v2342_v55, %v2341_v31  ;;  %v2343_v61 = vpack.c.b16 %v2340_v56, %v2339_v30  ;;  %v6615_v55 = vld [vmem:[#allocation2 + $0x4e0] sm:$0xff] }
 0xb7d   :  { %2353 = vmatpush.bf16.msra.mxu0 %v2344_v60  ;;  %2538 = vmatmul.bf16.vlgmr.msra.gmra.mxu1 %v2343_v61 }
 0xb7e   :  { %2808 = vmatpush.bf16.msrb.mxu3 %v6615_v55  ;;  %v6605_v55 = vld [vmem:[#allocation2 + $0x490] sm:$0xff] }
 0xb81   :  { %2354 = vmatpush.bf16.msra.mxu0 %v2343_v61  ;;  %v6614_v61 = vld [vmem:[#allocation2 + $0x4d8] sm:$0xff] }
 0xb82   :  { %2809 = vmatpush.bf16.msrb.mxu3 %v6614_v61 }
 0xb84   :  { %5762 = vmatmul.msk.bf16.vlgmr.msra.gmra.mxu0 %vm122_vm0, %v7312_v62 }
 0xb86   :  { %2810 = vmatpush.bf16.msrb.mxu3 %v6613_v9 }
 0xb8d   :  { %2543 = vmatmul.bf16.gmra.mxu1 %v2344_v60 }
 0xb94   :  { %5763 = vmatmul.msk.bf16.gmra.mxu0 %vm122_vm0, %v7319_v2 }
 0xbfa   :  { %v2539_v1 = vpop.f32.mrf.mxu1 }
 0xc01   :  { %v2356_v53 = vpop.f32.mrf.mxu0 }
 0xc02   :  { %v2366_v32 = vpack.c.bf16 %v2356_v53, %v2356_v53  ;;  %v2541_v58 = vpop.f32.mrf.mxu1 }
 0xc04   :  { %v2374_v15 = vunpack.c.l.b16 %v2366_v32 }
 0xc09   :  { %v2358_v52 = vpop.f32.mrf.mxu0 }
 0xc0a   :  { %v2367_v10 = vpack.c.bf16 %v2358_v52, %v2358_v52  ;;  %v2544_v57 = vpop.f32.mrf.mxu1  ;;  %v6612_v52 = vld [vmem:[#allocation2 + $0x4c8] sm:$0xff] }
 0xc0b   :  { %2811 = vmatpush.bf16.msrb.mxu3 %v6612_v52 }
 0xc0c   :  { %v2375_v17 = vunpack.c.l.b16 %v2367_v10 }
 0xc0e   :  { %v2378_v18 = vpack.c.b16 %v2375_v17, %v2374_v15  ;;  %v6611_v15 = vld [vmem:[#allocation2 + $0x4c0] sm:$0xff] }
 0xc0f   :  { %2812 = vmatpush.bf16.msrb.mxu3 %v6611_v15 }
 0xc10   :  { %2519 = vmatmul.bf16.vlgmr.msra.gmra.mxu3 %v2378_v18 }
 0xc11   :  { %v2361_v7 = vpop.f32.mrf.mxu0 }
 0xc12   :  { %v2368_v19 = vpack.c.bf16 %v2361_v7, %v2361_v7  ;;  %v2546_v22 = vpop.f32.mrf.mxu1 }
 0xc14   :  { %v2376_v0 = vunpack.c.l.b16 %v2368_v19 }
 0xc19   :  { %v2363_v20 = vpop.f32.mrf.mxu0 }
 0xc1a   :  { %v2369_v59 = vpack.c.bf16 %v2363_v20, %v2363_v20 }
 0xc1c   :  { %v2377_v16 = vunpack.c.l.b16 %v2369_v59  ;;  %v2576_v59 = vld [vmem:[#allocation5 + $0x8] sm:$0x1] }
 0xc1e   :  { %v2379_v21 = vpack.c.b16 %v2377_v16, %v2376_v0 }
 0xc20   :  { %2524 = vmatmul.bf16.gmra.mxu3 %v2379_v21 }
 0xc93   :  { %v2520_v63 = vpop.f32.mrf.mxu3 }
 0xc94   :  { %v7325_v36 = vadd.f32 %v2539_v1, %v2520_v63  ;;  %v2589_v1 = vld [vmem:[%s7673_s5 + $0x8] sm:$0x1] }
 0xc96   :  { %v2559_v24 = vmul.f32 %v7325_v36, %v7325_v36 }
 0xc9b   :  { %v2522_v25 = vpop.f32.mrf.mxu3 }
 0xc9c   :  { %v7323_v48 = vadd.f32 %v2541_v58, %v2522_v25 }
 0xc9e   :  { %v2560_v23 = vmul.f32 %v7323_v48, %v7323_v48  ;;  %v2549_v29 = vadd.f32 %v7323_v48, %v7325_v36 }
 0xca0   :  { %v2563_v34 = vadd.f32 %v2560_v23, %v2559_v24 }
 0xca3   :  { %v2525_v26 = vpop.f32.mrf.mxu3 }
 0xca4   :  { %v7327_v28 = vadd.f32 %v2544_v57, %v2525_v26 }
 0xca6   :  { %v2561_v41 = vmul.f32 %v7327_v28, %v7327_v28  ;;  %v2550_v35 = vadd.f32 %v2549_v29, %v7327_v28 }
 0xca8   :  { %v2564_v37 = vadd.f32 %v2563_v34, %v2561_v41  ;;  %v6610_v34 = vld [vmem:[#allocation2 + $0x4b8] sm:$0xff] }
 0xca9   :  { %2786 = vmatpush.bf16.msrb.mxu0 %v6610_v34 }
 0xcab   :  { %v2527_v27 = vpop.f32.mrf.mxu3 }
 0xcac   :  { %v2547_v14 = vadd.f32 %v2546_v22, %v2527_v27 }
 0xcad   :  { %2787 = vmatpush.bf16.msrb.mxu0 %v6609_v11 }
 0xcae   :  { %v2551_v12 = vadd.f32 %v2550_v35, %v2547_v14  ;;  %v2562_v38 = vmul.f32 %v2547_v14, %v2547_v14 }
 0xcb0   :  { %v2552_v39 = vrot.slane %v2551_v12, 4  ;;  %v2565_v42 = vadd.f32 %v2564_v37, %v2562_v38 }
 0xcb2   :  { %v2553_v49 = vadd.f32 %v2552_v39, %v2551_v12  ;;  %v2566_v44 = vrot.slane %v2565_v42, 4 }
 0xcb4   :  { %v2554_v40 = vrot.slane %v2553_v49, 2  ;;  %v2567_v45 = vadd.f32 %v2566_v44, %v2565_v42 }
 0xcb6   :  { %v2555_v54 = vadd.f32 %v2554_v40, %v2553_v49  ;;  %v2568_v31 = vrot.slane %v2567_v45, 2 }
 0xcb8   :  { %v2556_v30 = vrot.slane %v2555_v54, 1  ;;  %v2569_v56 = vadd.f32 %v2568_v31, %v2567_v45  ;;  %v6606_v31 = vld [vmem:[#allocation2 + $0x498] sm:$0xff] }
 0xcba   :  { %v2557_v6 = vadd.f32 %v2556_v30, %v2555_v54  ;;  %v2570_v60 = vrot.slane %v2569_v56, 1  ;;  %v6607_v54 = vld [vmem:[#allocation2 + $0x4a0] sm:$0xff]  ;;  %v6604_v30 = vld [vmem:[#allocation2 + $0x488] sm:$0xff] }
 0xcbc   :  { %v2558_v3 = vmul.f32 %v2557_v6, %v7027_v8  ;;  %v2571_v4 = vadd.f32 %v2570_v60, %v2569_v56  ;;  %v6603_v56 = vld [vmem:[#allocation2 + $0x480] sm:$0xff] }
 0xcbe   :  { %v2572_v5 = vmul.f32 %v2571_v4, %v7027_v8  ;;  %v2573_v13 = vmul.f32 %v2558_v3, %v2558_v3 }
 0xcc0   :  { %v2574_v53 = vsub.f32 %v2572_v5, %v2573_v13 }
 0xcc2   :  { %v2575_v32 = vmax.f32 %v2574_v53, 0.0 }
 0xcc4   :  { %v2577_v10 = vadd.f32 1e-05, %v2575_v32 }
 0xcc6   :  { %6784 = vrsqrt.f32 %v2577_v10  ;;  %vm2584_vm12 = vweird.f32 %v2577_v10 }
 0xccc   :  { %v6785_v17 = vpop.eup %6784 }
 0xccd   :  { %v2579_v18 = vmul.f32 %v6785_v17, %v2577_v10  ;;  %vm2585_vm11 = vweird.f32 %v6785_v17 }
 0xcce   :  { %vm2586_vm13 = vmor %vm2584_vm12, %vm2585_vm11 }
 0xccf   :  { %v2580_v7 = vmul.f32 %v6785_v17, %v2579_v18 }
 0xcd1   :  { %v2581_v19 = vmul.f32 0.5, %v2580_v7 }
 0xcd3   :  { %v2582_v20 = vsub.f32 1.5, %v2581_v19 }
 0xcd5   :  { %v2583_v0 = vmul.f32 %v6785_v17, %v2582_v20 }
 0xcd7   :  { %v2587_v16 = vsel %vm2586_vm13, %v6785_v17, %v2583_v0 }
 0xcd8   :  { %v2588_v21 = vmul.f32 %v2587_v16, %v2576_v59 }
 0xcda   :  { %v2590_v63 = vmul.f32 %v2588_v21, %v2558_v3  ;;  %v2592_v58 = vperm.slane %v2588_v21, 0 }
 0xcdc   :  { %v2591_v25 = vsub.f32 %v2589_v1, %v2590_v63  ;;  %v2596_v57 = vmul.f32 %v2592_v58, %v2547_v14  ;;  %v2595_v23 = vmul.f32 %v2592_v58, %v7327_v28  ;;  %v2593_v24 = vmul.f32 %v2592_v58, %v7325_v36 }
 0xcdd   :  { %v2594_v29 = vmul.f32 %v2592_v58, %v7323_v48  ;;  %v6608_v48 = vld [vmem:[#allocation2 + $0x4a8] sm:$0xff] }
 0xcde   :  { %v2597_v26 = vperm.slane %v2591_v25, 0  ;;  %2788 = vmatpush.bf16.msrb.mxu0 %v6608_v48 }
 0xce0   :  { %v2601_v41 = vadd.f32 %v2597_v26, %v2596_v57  ;;  %v2600_v33 = vadd.f32 %v2597_v26, %v2595_v23  ;;  %v2598_v22 = vadd.f32 %v2597_v26, %v2593_v24  ;;  %v2599_v27 = vadd.f32 %v2597_v26, %v2594_v29 }
 0xce2   :  { %v2605_v35 = vmax.f32 %v2601_v41, 0.0  ;;  %v2604_v37 = vmax.f32 %v2600_v33, 0.0  ;;  %v2602_v12 = vmax.f32 %v2598_v22, 0.0  ;;  %v2603_v38 = vmax.f32 %v2599_v27, 0.0  ;;  %2789 = vmatpush.bf16.msrb.mxu0 %v6607_v54  ;;  %v6634_v33 = vld [vmem:[#allocation2 + $0x578] sm:$0xff] }
 0xce4   :  { %v2609_v39 = vpack.c.bf16 %v2605_v35, %v2605_v35  ;;  %v2608_v14 = vpack.c.bf16 %v2604_v37, %v2604_v37  ;;  %v2606_v42 = vpack.c.bf16 %v2602_v12, %v2602_v12  ;;  %v2607_v49 = vpack.c.bf16 %v2603_v38, %v2603_v38  ;;  %v6633_v12 = vld [vmem:[#allocation2 + $0x570] sm:$0xff] }
 0xce6   :  { %v2616_v28 = vunpack.c.l.b16 %v2608_v14  ;;  %v2617_v44 = vunpack.c.l.b16 %v2609_v39  ;;  %v2614_v36 = vunpack.c.l.b16 %v2606_v42  ;;  %v2615_v43 = vunpack.c.l.b16 %v2607_v49  ;;  %2790 = vmatpush.bf16.msrb.mxu0 %v6606_v31  ;;  %v6632_v42 = vld [vmem:[#allocation2 + $0x568] sm:$0xff]  ;;  %v6630_v31 = vld [vmem:[#allocation2 + $0x558] sm:$0xff] }
 0xce8   :  { %v2619_v40 = vpack.c.b16 %v2617_v44, %v2616_v28  ;;  %v2618_v45 = vpack.c.b16 %v2615_v43, %v2614_v36  ;;  %v6631_v43 = vld [vmem:[#allocation2 + $0x560] sm:$0xff] }
 0xcea   :  { %2628 = vmatpush.bf16.msra.mxu2 %v2619_v40  ;;  %2813 = vmatmul.bf16.vlgmr.msrb.gmra.mxu3 %v2618_v45 }
 0xceb   :  { %2791 = vmatpush.bf16.msrb.mxu0 %v6605_v55 }
 0xcee   :  { %2629 = vmatpush.bf16.msra.mxu2 %v2618_v45 }
 0xcef   :  { %2792 = vmatpush.bf16.msrb.mxu0 %v6604_v30 }
 0xcf1   :  { %5828 = vmatmul.msk.bf16.vlgmr.msra.gmra.mxu2 %vm122_vm0, %v7312_v62 }
 0xcf3   :  { %2793 = vmatpush.bf16.msrb.mxu0 %v6603_v56 }
 0xcf7   :  { %3084 = vmatpush.bf16.msra.mxu0 %v6634_v33 }
 0xcfa   :  { %2818 = vmatmul.bf16.gmra.mxu3 %v2619_v40 }
 0xcfb   :  { %3085 = vmatpush.bf16.msra.mxu0 %v6633_v12 }
 0xcff   :  { %3086 = vmatpush.bf16.msra.mxu0 %v6632_v42 }
 0xd01   :  { %5829 = vmatmul.msk.bf16.gmra.mxu2 %vm122_vm0, %v7319_v2 }
 0xd03   :  { %3087 = vmatpush.bf16.msra.mxu0 %v6631_v43  ;;  %v6619_v43 = vld [vmem:[#allocation2 + $0x500] sm:$0xff] }
 0xd07   :  { %3088 = vmatpush.bf16.msra.mxu0 %v6630_v31 }
 0xd6d   :  { %v2814_v18 = vpop.f32.mrf.mxu3 }
 0xd74   :  { %v2631_v6 = vpop.f32.mrf.mxu2 }
 0xd75   :  { %v2641_v60 = vpack.c.bf16 %v2631_v6, %v2631_v6  ;;  %v2816_v19 = vpop.f32.mrf.mxu3  ;;  %v6629_v6 = vld [vmem:[#allocation2 + $0x550] sm:$0xff] }
 0xd76   :  { %3089 = vmatpush.bf16.msra.mxu0 %v6629_v6 }
 0xd77   :  { %v2649_v4 = vunpack.c.l.b16 %v2641_v60 }
 0xd7c   :  { %v2633_v61 = vpop.f32.mrf.mxu2 }
 0xd7d   :  { %v2642_v3 = vpack.c.bf16 %v2633_v61, %v2633_v61  ;;  %v2819_v59 = vpop.f32.mrf.mxu3 }
 0xd7f   :  { %v2650_v5 = vunpack.c.l.b16 %v2642_v3  ;;  %v6628_v3 = vld [vmem:[#allocation2 + $0x548] sm:$0xff] }
 0xd80   :  { %3090 = vmatpush.bf16.msra.mxu0 %v6628_v3 }
 0xd81   :  { %v2653_v13 = vpack.c.b16 %v2650_v5, %v2649_v4  ;;  %v6627_v4 = vld [vmem:[#allocation2 + $0x540] sm:$0xff] }
 0xd83   :  { %2794 = vmatmul.bf16.vlgmr.msrb.gmra.mxu0 %v2653_v13 }
 0xd84   :  { %v2636_v9 = vpop.f32.mrf.mxu2  ;;  %3091 = vmatpush.bf16.msra.mxu0 %v6627_v4 }
 0xd85   :  { %v2643_v53 = vpack.c.bf16 %v2636_v9, %v2636_v9  ;;  %v2821_v26 = vpop.f32.mrf.mxu3 }
 0xd87   :  { %v2651_v10 = vunpack.c.l.b16 %v2643_v53 }
 0xd8c   :  { %v2638_v32 = vpop.f32.mrf.mxu2 }
 0xd8d   :  { %v2644_v52 = vpack.c.bf16 %v2638_v32, %v2638_v32 }
 0xd8f   :  { %v2652_v15 = vunpack.c.l.b16 %v2644_v52  ;;  %v2851_v52 = vld [vmem:[#allocation5 + $0x9] sm:$0x1] }
 0xd91   :  { %v2654_v17 = vpack.c.b16 %v2652_v15, %v2651_v10 }
 0xd93   :  { %2799 = vmatmul.bf16.gmra.mxu0 %v2654_v17 }
 0xe00   :  { %v2795_v7 = vpop.f32.mrf.mxu0 }
 0xe01   :  { %v7352_v21 = vadd.f32 %v2814_v18, %v2795_v7  ;;  %v2864_v18 = vld [vmem:[%s7673_s5 + $0x9] sm:$0x1] }
 0xe03   :  { %v2834_v58 = vmul.f32 %v7352_v21, %v7352_v21 }
 0xe08   :  { %v2797_v20 = vpop.f32.mrf.mxu0 }
 0xe09   :  { %v7350_v16 = vadd.f32 %v2816_v19, %v2797_v20 }
 0xe0b   :  { %v2835_v63 = vmul.f32 %v7350_v16, %v7350_v16  ;;  %v2824_v25 = vadd.f32 %v7350_v16, %v7352_v21 }
 0xe0d   :  { %v2838_v24 = vadd.f32 %v2835_v63, %v2834_v58 }
 0xe10   :  { %v2800_v0 = vpop.f32.mrf.mxu0 }
 0xe11   :  { %v7354_v1 = vadd.f32 %v2819_v59, %v2800_v0 }
 0xe13   :  { %v2836_v57 = vmul.f32 %v7354_v1, %v7354_v1  ;;  %v2825_v29 = vadd.f32 %v2824_v25, %v7354_v1 }
 0xe15   :  { %v2839_v22 = vadd.f32 %v2838_v24, %v2836_v57 }
 0xe18   :  { %v2802_v23 = vpop.f32.mrf.mxu0 }
 0xe19   :  { %v2822_v41 = vadd.f32 %v2821_v26, %v2802_v23 }
 0xe1b   :  { %v2826_v27 = vadd.f32 %v2825_v29, %v2822_v41  ;;  %v2837_v34 = vmul.f32 %v2822_v41, %v2822_v41 }
 0xe1d   :  { %v2827_v35 = vrot.slane %v2826_v27, 4  ;;  %v2840_v37 = vadd.f32 %v2839_v22, %v2837_v34  ;;  %v6626_v34 = vld [vmem:[#allocation2 + $0x538] sm:$0xff] }
 0xe1e   :  { %3065 = vmatpush.bf16.msrb.mxu2 %v6626_v34 }
 0xe1f   :  { %v2828_v38 = vadd.f32 %v2827_v35, %v2826_v27  ;;  %v2841_v11 = vrot.slane %v2840_v37, 4 }
 0xe21   :  { %v2829_v39 = vrot.slane %v2828_v38, 2  ;;  %v2842_v14 = vadd.f32 %v2841_v11, %v2840_v37 }
 0xe23   :  { %v2830_v49 = vadd.f32 %v2829_v39, %v2828_v38  ;;  %v2843_v28 = vrot.slane %v2842_v14, 2 }
 0xe25   :  { %v2831_v44 = vrot.slane %v2830_v49, 1  ;;  %v2844_v36 = vadd.f32 %v2843_v28, %v2842_v14  ;;  %v6622_v28 = vld [vmem:[#allocation2 + $0x518] sm:$0xff] }
 0xe27   :  { %v2832_v48 = vadd.f32 %v2831_v44, %v2830_v49  ;;  %v2845_v40 = vrot.slane %v2844_v36, 1  ;;  %v6623_v49 = vld [vmem:[#allocation2 + $0x520] sm:$0xff]  ;;  %v6621_v44 = vld [vmem:[#allocation2 + $0x510] sm:$0xff] }
 0xe29   :  { %v2833_v45 = vmul.f32 %v2832_v48, %v7027_v8  ;;  %v2846_v54 = vadd.f32 %v2845_v40, %v2844_v36  ;;  %v6620_v36 = vld [vmem:[#allocation2 + $0x508] sm:$0xff] }
 0xe2b   :  { %v2847_v55 = vmul.f32 %v2846_v54, %v7027_v8  ;;  %v2848_v30 = vmul.f32 %v2833_v45, %v2833_v45 }
 0xe2d   :  { %v2849_v56 = vsub.f32 %v2847_v55, %v2848_v30 }
 0xe2f   :  { %v2850_v60 = vmax.f32 %v2849_v56, 0.0 }
 0xe31   :  { %v2852_v61 = vadd.f32 1e-05, %v2850_v60 }
 0xe33   :  { %6786 = vrsqrt.f32 %v2852_v61  ;;  %vm2859_vm15 = vweird.f32 %v2852_v61 }
 0xe39   :  { %v6787_v5 = vpop.eup %6786 }
 0xe3a   :  { %v2854_v13 = vmul.f32 %v6787_v5, %v2852_v61  ;;  %vm2860_vm14 = vweird.f32 %v6787_v5 }
 0xe3b   :  { %vm2861_vm1 = vmor %vm2859_vm15, %vm2860_vm14 }
 0xe3c   :  { %v2855_v9 = vmul.f32 %v6787_v5, %v2854_v13 }
 0xe3e   :  { %v2856_v53 = vmul.f32 0.5, %v2855_v9 }
 0xe40   :  { %v2857_v32 = vsub.f32 1.5, %v2856_v53 }
 0xe42   :  { %v2858_v10 = vmul.f32 %v6787_v5, %v2857_v32 }
 0xe44   :  { %v2862_v15 = vsel %vm2861_vm1, %v6787_v5, %v2858_v10 }
 0xe45   :  { %v2863_v17 = vmul.f32 %v2862_v15, %v2851_v52 }
 0xe47   :  { %v2865_v7 = vmul.f32 %v2863_v17, %v2833_v45  ;;  %v2867_v19 = vperm.slane %v2863_v17, 0 }
 0xe49   :  { %v2866_v20 = vsub.f32 %v2864_v18, %v2865_v7  ;;  %v2871_v59 = vmul.f32 %v2867_v19, %v2822_v41  ;;  %v2870_v63 = vmul.f32 %v2867_v19, %v7354_v1  ;;  %v2868_v58 = vmul.f32 %v2867_v19, %v7352_v21  ;;  %v6625_v21 = vld [vmem:[#allocation2 + $0x530] sm:$0xff] }
 0xe4a   :  { %v2869_v25 = vmul.f32 %v2867_v19, %v7350_v16  ;;  %3066 = vmatpush.bf16.msrb.mxu2 %v6625_v21 }
 0xe4b   :  { %v2872_v0 = vperm.slane %v2866_v20, 0 }
 0xe4d   :  { %v2876_v57 = vadd.f32 %v2872_v0, %v2871_v59  ;;  %v2875_v26 = vadd.f32 %v2872_v0, %v2870_v63  ;;  %v2873_v23 = vadd.f32 %v2872_v0, %v2868_v58  ;;  %v2874_v24 = vadd.f32 %v2872_v0, %v2869_v25  ;;  %v6650_v0 = vld [vmem:[#allocation2 + $0x5f8] sm:$0xff] }
 0xe4f   :  { %v2880_v29 = vmax.f32 %v2876_v57, 0.0  ;;  %v2879_v33 = vmax.f32 %v2875_v26, 0.0  ;;  %v2877_v22 = vmax.f32 %v2873_v23, 0.0  ;;  %v2878_v27 = vmax.f32 %v2874_v24, 0.0 }
 0xe51   :  { %v7374_v35 = vadd.f32 %v2880_v29, %v7293_v46  ;;  %v7377_v41 = vadd.f32 %v2879_v33, %v7295_v50  ;;  %v7380_v1 = vadd.f32 %v2877_v22, %v7297_v51  ;;  %v7383_v16 = vadd.f32 %v2878_v27, %v7299_v47  ;;  %v6624_v47 = vld [vmem:[#allocation2 + $0x528] sm:$0xff]  ;;  %v6649_v33 = vld [vmem:[#allocation2 + $0x5f0] sm:$0xff] }
 0xe52   :  { %3067 = vmatpush.bf16.msrb.mxu2 %v6624_v47 }
 0xe53   :  { %v2887_v37 = vpack.c.bf16 %v7377_v41, %v7377_v41  ;;  %v2888_v12 = vpack.c.bf16 %v7374_v35, %v7374_v35  ;;  %v2885_v46 = vpack.c.bf16 %v7380_v1, %v7380_v1  ;;  %v2886_v50 = vpack.c.bf16 %v7383_v16, %v7383_v16 }
 0xe55   :  { %v2895_v38 = vunpack.c.l.b16 %v2887_v37  ;;  %v2896_v51 = vunpack.c.l.b16 %v2888_v12  ;;  %v2893_v11 = vunpack.c.l.b16 %v2885_v46  ;;  %v2894_v39 = vunpack.c.l.b16 %v2886_v50  ;;  %v6648_v37 = vld [vmem:[#allocation2 + $0x5e8] sm:$0xff] }
 0xe56   :  { %3068 = vmatpush.bf16.msrb.mxu2 %v6623_v49 }
 0xe57   :  { %v2898_v14 = vpack.c.b16 %v2896_v51, %v2895_v38  ;;  %v2897_v42 = vpack.c.b16 %v2894_v39, %v2893_v11  ;;  %v6647_v51 = vld [vmem:[#allocation2 + $0x5e0] sm:$0xff] }
 0xe59   :  { %2907 = vmatpush.bf16.msrb.mxu1 %v2898_v14  ;;  %3092 = vmatmul.bf16.vlgmr.msra.gmra.mxu0 %v2897_v42 }
 0xe5a   :  { %3069 = vmatpush.bf16.msrb.mxu2 %v6622_v28 }
 0xe5d   :  { %2908 = vmatpush.bf16.msrb.mxu1 %v2897_v42  ;;  %v6646_v42 = vld [vmem:[#allocation2 + $0x5d8] sm:$0xff] }
 0xe5e   :  { %3070 = vmatpush.bf16.msrb.mxu2 %v6621_v44 }
 0xe60   :  { %5894 = vmatmul.msk.bf16.vlgmr.msrb.gmra.mxu1 %vm122_vm0, %v7312_v62 }
 0xe62   :  { %3071 = vmatpush.bf16.msrb.mxu2 %v6620_v36 }
 0xe66   :  { %3072 = vmatpush.bf16.msrb.mxu2 %v6619_v43  ;;  %v6645_v43 = vld [vmem:[#allocation2 + $0x5d0] sm:$0xff] }
 0xe69   :  { %3097 = vmatmul.bf16.gmra.mxu0 %v2898_v14 }
 0xe6a   :  { %3359 = vmatpush.bf16.msra.mxu2 %v6650_v0 }
 0xe6e   :  { %3360 = vmatpush.bf16.msra.mxu2 %v6649_v33  ;;  %v6641_v33 = vld [vmem:[#allocation2 + $0x5b0] sm:$0xff] }
 0xe70   :  { %5895 = vmatmul.msk.bf16.gmra.mxu1 %vm122_vm0, %v7319_v2 }
 0xe72   :  { %3361 = vmatpush.bf16.msra.mxu2 %v6648_v37 }
 0xe76   :  { %3362 = vmatpush.bf16.msra.mxu2 %v6647_v51  ;;  %v6637_v51 = vld [vmem:[#allocation2 + $0x590] sm:$0xff] }
 0xe7a   :  { %3363 = vmatpush.bf16.msra.mxu2 %v6646_v42 }
 0xe7e   :  { %3364 = vmatpush.bf16.msra.mxu2 %v6645_v43 }
 0xed6   :  { %v3093_v13 = vpop.f32.mrf.mxu0 }
 0xedd   :  { %v2910_v48 = vpop.f32.mrf.mxu1 }
 0xede   :  { %v2920_v40 = vpack.c.bf16 %v2910_v48, %v2910_v48  ;;  %v3095_v53 = vpop.f32.mrf.mxu0 }
 0xee0   :  { %v2928_v31 = vunpack.c.l.b16 %v2920_v40 }
 0xee5   :  { %v2912_v45 = vpop.f32.mrf.mxu1 }
 0xee6   :  { %v2921_v54 = vpack.c.bf16 %v2912_v45, %v2912_v45  ;;  %v3098_v52 = vpop.f32.mrf.mxu0  ;;  %v6644_v45 = vld [vmem:[#allocation2 + $0x5c8] sm:$0xff] }
 0xee7   :  { %3365 = vmatpush.bf16.msra.mxu2 %v6644_v45 }
 0xee8   :  { %v2929_v55 = vunpack.c.l.b16 %v2921_v54 }
 0xeea   :  { %v2932_v30 = vpack.c.b16 %v2929_v55, %v2928_v31  ;;  %v6643_v31 = vld [vmem:[#allocation2 + $0x5c0] sm:$0xff] }
 0xeeb   :  { %3366 = vmatpush.bf16.msra.mxu2 %v6643_v31 }
 0xeec   :  { %3073 = vmatmul.bf16.vlgmr.msrb.gmra.mxu2 %v2932_v30 }
 0xeed   :  { %v2915_v56 = vpop.f32.mrf.mxu1 }
 0xeee   :  { %v2922_v6 = vpack.c.bf16 %v2915_v56, %v2915_v56  ;;  %v3100_v63 = vpop.f32.mrf.mxu0 }
 0xef0   :  { %v2930_v3 = vunpack.c.l.b16 %v2922_v6 }
 0xef5   :  { %v2917_v60 = vpop.f32.mrf.mxu1 }
 0xef6   :  { %v2923_v61 = vpack.c.bf16 %v2917_v60, %v2917_v60 }
 0xef8   :  { %v2931_v4 = vunpack.c.l.b16 %v2923_v61  ;;  %v3130_v61 = vld [vmem:[#allocation5 + $0xa] sm:$0x1] }
 0xefa   :  { %v2933_v5 = vpack.c.b16 %v2931_v4, %v2930_v3 }
 0xefc   :  { %3078 = vmatmul.bf16.gmra.mxu2 %v2933_v5 }
 0xf6f   :  { %v3074_v9 = vpop.f32.mrf.mxu2 }
 0xf70   :  { %v7399_v17 = vadd.f32 %v3093_v13, %v3074_v9  ;;  %v3143_v13 = vld [vmem:[%s7673_s5 + $0xa] sm:$0x1] }
 0xf72   :  { %v3113_v19 = vmul.f32 %v7399_v17, %v7399_v17 }
 0xf77   :  { %v3076_v32 = vpop.f32.mrf.mxu2 }
 0xf78   :  { %v7397_v15 = vadd.f32 %v3095_v53, %v3076_v32 }
 0xf7a   :  { %v3114_v7 = vmul.f32 %v7397_v15, %v7397_v15  ;;  %v3103_v20 = vadd.f32 %v7397_v15, %v7399_v17 }
 0xf7c   :  { %v3117_v25 = vadd.f32 %v3114_v7, %v3113_v19 }
 0xf7f   :  { %v3079_v10 = vpop.f32.mrf.mxu2 }
 0xf80   :  { %v7401_v18 = vadd.f32 %v3098_v52, %v3079_v10 }
 0xf82   :  { %v3115_v59 = vmul.f32 %v7401_v18, %v7401_v18  ;;  %v3104_v57 = vadd.f32 %v3103_v20, %v7401_v18 }
 0xf84   :  { %v3118_v23 = vadd.f32 %v3117_v25, %v3115_v59  ;;  %v6642_v25 = vld [vmem:[#allocation2 + $0x5b8] sm:$0xff] }
 0xf85   :  { %3340 = vmatpush.bf16.msra.mxu1 %v6642_v25 }
 0xf87   :  { %v3081_v58 = vpop.f32.mrf.mxu2 }
 0xf88   :  { %v3101_v26 = vadd.f32 %v3100_v63, %v3081_v58 }
 0xf89   :  { %3341 = vmatpush.bf16.msra.mxu1 %v6641_v33 }
 0xf8a   :  { %v3105_v24 = vadd.f32 %v3104_v57, %v3101_v26  ;;  %v3116_v29 = vmul.f32 %v3101_v26, %v3101_v26 }
 0xf8c   :  { %v3106_v22 = vrot.slane %v3105_v24, 4  ;;  %v3119_v27 = vadd.f32 %v3118_v23, %v3116_v29 }
 0xf8e   :  { %v3107_v34 = vadd.f32 %v3106_v22, %v3105_v24  ;;  %v3120_v21 = vrot.slane %v3119_v27, 4 }
 0xf90   :  { %v3108_v12 = vrot.slane %v3107_v34, 2  ;;  %v3121_v46 = vadd.f32 %v3120_v21, %v3119_v27 }
 0xf92   :  { %v3109_v50 = vadd.f32 %v3108_v12, %v3107_v34  ;;  %v3122_v38 = vrot.slane %v3121_v46, 2 }
 0xf94   :  { %v3110_v11 = vrot.slane %v3109_v50, 1  ;;  %v3123_v39 = vadd.f32 %v3122_v38, %v3121_v46  ;;  %v6638_v38 = vld [vmem:[#allocation2 + $0x598] sm:$0xff] }
 0xf96   :  { %v3111_v47 = vadd.f32 %v3110_v11, %v3109_v50  ;;  %v3124_v14 = vrot.slane %v3123_v39, 1  ;;  %v6639_v50 = vld [vmem:[#allocation2 + $0x5a0] sm:$0xff]  ;;  %v6636_v11 = vld [vmem:[#allocation2 + $0x588] sm:$0xff] }
 0xf98   :  { %v3112_v49 = vmul.f32 %v3111_v47, %v7027_v8  ;;  %v3125_v28 = vadd.f32 %v3124_v14, %v3123_v39  ;;  %v6635_v39 = vld [vmem:[#allocation2 + $0x580] sm:$0xff] }
 0xf9a   :  { %v3126_v44 = vmul.f32 %v3125_v28, %v7027_v8  ;;  %v3127_v36 = vmul.f32 %v3112_v49, %v3112_v49 }
 0xf9c   :  { %v3128_v48 = vsub.f32 %v3126_v44, %v3127_v36 }
 0xf9e   :  { %v3129_v40 = vmax.f32 %v3128_v48, 0.0 }
 0xfa0   :  { %v3131_v54 = vadd.f32 1e-05, %v3129_v40 }
 0xfa2   :  { %6788 = vrsqrt.f32 %v3131_v54  ;;  %vm3138_vm3 = vweird.f32 %v3131_v54 }
 0xfa8   :  { %v6789_v55 = vpop.eup %6788 }
 0xfa9   :  { %v3133_v30 = vmul.f32 %v6789_v55, %v3131_v54  ;;  %vm3139_vm2 = vweird.f32 %v6789_v55 }
 0xfaa   :  { %vm3140_vm4 = vmor %vm3138_vm3, %vm3139_vm2 }
 0xfab   :  { %v3134_v56 = vmul.f32 %v6789_v55, %v3133_v30 }
 0xfad   :  { %v3135_v6 = vmul.f32 0.5, %v3134_v56 }
 0xfaf   :  { %v3136_v60 = vsub.f32 1.5, %v3135_v6 }
 0xfb1   :  { %v3137_v3 = vmul.f32 %v6789_v55, %v3136_v60 }
 0xfb3   :  { %v3141_v4 = vsel %vm3140_vm4, %v6789_v55, %v3137_v3 }
 0xfb4   :  { %v3142_v5 = vmul.f32 %v3141_v4, %v3130_v61 }
 0xfb6   :  { %v3144_v9 = vmul.f32 %v3142_v5, %v3112_v49  ;;  %v3146_v53 = vperm.slane %v3142_v5, 0 }
 0xfb8   :  { %v3145_v32 = vsub.f32 %v3143_v13, %v3144_v9  ;;  %v3150_v52 = vmul.f32 %v3146_v53, %v3101_v26  ;;  %v3149_v7 = vmul.f32 %v3146_v53, %v7401_v18  ;;  %v3147_v19 = vmul.f32 %v3146_v53, %v7399_v17 }
 0xfb9   :  { %v3148_v20 = vmul.f32 %v3146_v53, %v7397_v15  ;;  %v6640_v15 = vld [vmem:[#allocation2 + $0x5a8] sm:$0xff] }
 0xfba   :  { %v3151_v10 = vperm.slane %v3145_v32, 0  ;;  %3342 = vmatpush.bf16.msra.mxu1 %v6640_v15 }
 0xfbc   :  { %v3155_v59 = vadd.f32 %v3151_v10, %v3150_v52  ;;  %v3154_v0 = vadd.f32 %v3151_v10, %v3149_v7  ;;  %v3152_v63 = vadd.f32 %v3151_v10, %v3147_v19  ;;  %v3153_v58 = vadd.f32 %v3151_v10, %v3148_v20  ;;  %v6666_v20 = vld [vmem:[#allocation2 + $0x678] sm:$0xff] }
 0xfbe   :  { %v3159_v57 = vmax.f32 %v3155_v59, 0.0  ;;  %v3158_v23 = vmax.f32 %v3154_v0, 0.0  ;;  %v3156_v24 = vmax.f32 %v3152_v63, 0.0  ;;  %v3157_v29 = vmax.f32 %v3153_v58, 0.0  ;;  %3343 = vmatpush.bf16.msra.mxu1 %v6639_v50 }
 0xfc0   :  { %v3163_v22 = vpack.c.bf16 %v3159_v57, %v3159_v57  ;;  %v3162_v26 = vpack.c.bf16 %v3158_v23, %v3158_v23  ;;  %v3160_v27 = vpack.c.bf16 %v3156_v24, %v3156_v24  ;;  %v3161_v34 = vpack.c.bf16 %v3157_v29, %v3157_v29  ;;  %v6665_v57 = vld [vmem:[#allocation2 + $0x670] sm:$0xff] }
 0xfc2   :  { %v3171_v18 = vunpack.c.l.b16 %v3163_v22  ;;  %v3170_v21 = vunpack.c.l.b16 %v3162_v26  ;;  %v3168_v17 = vunpack.c.l.b16 %v3160_v27  ;;  %v3169_v37 = vunpack.c.l.b16 %v3161_v34  ;;  %3344 = vmatpush.bf16.msra.mxu1 %v6638_v38  ;;  %v6664_v22 = vld [vmem:[#allocation2 + $0x668] sm:$0xff] }
 0xfc4   :  { %v3173_v12 = vpack.c.b16 %v3171_v18, %v3170_v21  ;;  %v3172_v46 = vpack.c.b16 %v3169_v37, %v3168_v17  ;;  %v6663_v21 = vld [vmem:[#allocation2 + $0x660] sm:$0xff] }
 0xfc6   :  { %3182 = vmatpush.bf16.msra.mxu3 %v3173_v12  ;;  %3367 = vmatmul.bf16.vlgmr.msra.gmra.mxu2 %v3172_v46 }
 0xfc7   :  { %3345 = vmatpush.bf16.msra.mxu1 %v6637_v51 }
 0xfca   :  { %3183 = vmatpush.bf16.msra.mxu3 %v3172_v46  ;;  %v6662_v46 = vld [vmem:[#allocation2 + $0x658] sm:$0xff] }
 0xfcb   :  { %3346 = vmatpush.bf16.msra.mxu1 %v6636_v11  ;;  %v6661_v11 = vld [vmem:[#allocation2 + $0x650] sm:$0xff] }
 0xfcd   :  { %5960 = vmatmul.msk.bf16.vlgmr.msra.gmra.mxu3 %vm122_vm0, %v7312_v62 }
 0xfcf   :  { %3347 = vmatpush.bf16.msra.mxu1 %v6635_v39 }
 0xfd3   :  { %3638 = vmatpush.bf16.msrb.mxu1 %v6666_v20 }
 0xfd6   :  { %3372 = vmatmul.bf16.gmra.mxu2 %v3173_v12 }
 0xfd7   :  { %3639 = vmatpush.bf16.msrb.mxu1 %v6665_v57 }
 0xfdb   :  { %3640 = vmatpush.bf16.msrb.mxu1 %v6664_v22  ;;  %v6656_v22 = vld [vmem:[#allocation2 + $0x628] sm:$0xff] }
 0xfdd   :  { %5961 = vmatmul.msk.bf16.gmra.mxu3 %vm122_vm0, %v7319_v2 }
 0xfdf   :  { %3641 = vmatpush.bf16.msrb.mxu1 %v6663_v21  ;;  %v6651_v21 = vld [vmem:[#allocation2 + $0x600] sm:$0xff] }
 0xfe3   :  { %3642 = vmatpush.bf16.msrb.mxu1 %v6662_v46 }
 0xfe7   :  { %3643 = vmatpush.bf16.msrb.mxu1 %v6661_v11 }
0x1049   :  { %v3368_v31 = vpop.f32.mrf.mxu2 }
0x1050   :  { %v3185_v47 = vpop.f32.mrf.mxu3 }
0x1051   :  { %v3195_v14 = vpack.c.bf16 %v3185_v47, %v3185_v47  ;;  %v3370_v30 = vpop.f32.mrf.mxu2 }
0x1053   :  { %v3203_v28 = vunpack.c.l.b16 %v3195_v14  ;;  %v6660_v14 = vld [vmem:[#allocation2 + $0x648] sm:$0xff] }
0x1054   :  { %3644 = vmatpush.bf16.msrb.mxu1 %v6660_v14 }
0x1058   :  { %v3187_v42 = vpop.f32.mrf.mxu3 }
0x1059   :  { %v3196_v49 = vpack.c.bf16 %v3187_v42, %v3187_v42  ;;  %v3373_v6 = vpop.f32.mrf.mxu2  ;;  %v6659_v42 = vld [vmem:[#allocation2 + $0x640] sm:$0xff] }
0x105a   :  { %3645 = vmatpush.bf16.msrb.mxu1 %v6659_v42 }
0x105b   :  { %v3204_v62 = vunpack.c.l.b16 %v3196_v49 }
0x105d   :  { %v3207_v44 = vpack.c.b16 %v3204_v62, %v3203_v28 }
0x105f   :  { %3348 = vmatmul.bf16.vlgmr.msra.gmra.mxu1 %v3207_v44 }
0x1060   :  { %v3190_v36 = vpop.f32.mrf.mxu3 }
0x1061   :  { %v3197_v2 = vpack.c.bf16 %v3190_v36, %v3190_v36  ;;  %v3375_v32 = vpop.f32.mrf.mxu2 }
0x1063   :  { %v3205_v40 = vunpack.c.l.b16 %v3197_v2  ;;  %v3405_v2 = vld [vmem:[#allocation5 + $0xb] sm:$0x1] }
0x1068   :  { %v3192_v43 = vpop.f32.mrf.mxu3 }
0x1069   :  { %v3198_v48 = vpack.c.bf16 %v3192_v43, %v3192_v43 }
0x106b   :  { %v3206_v45 = vunpack.c.l.b16 %v3198_v48 }
0x106d   :  { %v3208_v54 = vpack.c.b16 %v3206_v45, %v3205_v40  ;;  %v3418_v45 = vld [vmem:[%s7673_s5 + $0xb] sm:$0x1] }
0x106f   :  { %3353 = vmatmul.bf16.gmra.mxu1 %v3208_v54 }
0x10dc   :  { %v3349_v55 = vpop.f32.mrf.mxu1 }
0x10dd   :  { %v7426_v3 = vadd.f32 %v3368_v31, %v3349_v55 }
0x10df   :  { %v3388_v13 = vmul.f32 %v7426_v3, %v7426_v3 }
0x10e4   :  { %v3351_v56 = vpop.f32.mrf.mxu1 }
0x10e5   :  { %v7424_v61 = vadd.f32 %v3370_v30, %v3351_v56 }
0x10e7   :  { %v3389_v5 = vmul.f32 %v7424_v61, %v7424_v61  ;;  %v3378_v9 = vadd.f32 %v7424_v61, %v7426_v3 }
0x10e9   :  { %v3392_v10 = vadd.f32 %v3389_v5, %v3388_v13 }
0x10ec   :  { %v3354_v60 = vpop.f32.mrf.mxu1 }
0x10ed   :  { %v7428_v4 = vadd.f32 %v3373_v6, %v3354_v60 }
0x10ef   :  { %v3390_v53 = vmul.f32 %v7428_v4, %v7428_v4  ;;  %v3379_v7 = vadd.f32 %v3378_v9, %v7428_v4 }
0x10f1   :  { %v3393_v59 = vadd.f32 %v3392_v10, %v3390_v53 }
0x10f4   :  { %v3356_v52 = vpop.f32.mrf.mxu1 }
0x10f5   :  { %v3376_v19 = vadd.f32 %v3375_v32, %v3356_v52 }
0x10f7   :  { %v3380_v0 = vadd.f32 %v3379_v7, %v3376_v19  ;;  %v3391_v63 = vmul.f32 %v3376_v19, %v3376_v19 }
0x10f9   :  { %v3381_v58 = vrot.slane %v3380_v0, 4  ;;  %v3394_v25 = vadd.f32 %v3393_v59, %v3391_v63  ;;  %v6658_v59 = vld [vmem:[#allocation2 + $0x638] sm:$0xff] }
0x10fa   :  { %3619 = vmatpush.bf16.msrb.mxu3 %v6658_v59 }
0x10fb   :  { %v3382_v23 = vadd.f32 %v3381_v58, %v3380_v0  ;;  %v3395_v24 = vrot.slane %v3394_v25, 4 }
0x10fd   :  { %v3383_v29 = vrot.slane %v3382_v23, 2  ;;  %v3396_v33 = vadd.f32 %v3395_v24, %v3394_v25 }
0x10ff   :  { %v3384_v26 = vadd.f32 %v3383_v29, %v3382_v23  ;;  %v3397_v27 = vrot.slane %v3396_v33, 2 }
0x1101   :  { %v3385_v34 = vrot.slane %v3384_v26, 1  ;;  %v3398_v18 = vadd.f32 %v3397_v27, %v3396_v33  ;;  %v6654_v27 = vld [vmem:[#allocation2 + $0x618] sm:$0xff] }
0x1103   :  { %v3386_v17 = vadd.f32 %v3385_v34, %v3384_v26  ;;  %v3399_v37 = vrot.slane %v3398_v18, 1  ;;  %v6653_v34 = vld [vmem:[#allocation2 + $0x610] sm:$0xff] }
0x1105   :  { %v3387_v15 = vmul.f32 %v3386_v17, %v7027_v8  ;;  %v3400_v12 = vadd.f32 %v3399_v37, %v3398_v18  ;;  %v6652_v18 = vld [vmem:[#allocation2 + $0x608] sm:$0xff] }
0x1107   :  { %v3401_v50 = vmul.f32 %v3400_v12, %v7027_v8  ;;  %v3402_v38 = vmul.f32 %v3387_v15, %v3387_v15 }
0x1109   :  { %v3403_v51 = vsub.f32 %v3401_v50, %v3402_v38 }
0x110b   :  { %v3404_v39 = vmax.f32 %v3403_v51, 0.0 }
0x110d   :  { %v3406_v47 = vadd.f32 1e-05, %v3404_v39 }
0x110f   :  { %6790 = vrsqrt.f32 %v3406_v47  ;;  %vm3413_vm6 = vweird.f32 %v3406_v47 }
0x1115   :  { %v6791_v49 = vpop.eup %6790 }
0x1116   :  { %v3408_v28 = vmul.f32 %v6791_v49, %v3406_v47  ;;  %vm3414_vm5 = vweird.f32 %v6791_v49 }
0x1117   :  { %vm3415_vm7 = vmor %vm3413_vm6, %vm3414_vm5 }
0x1118   :  { %v3409_v62 = vmul.f32 %v6791_v49, %v3408_v28 }
0x111a   :  { %v3410_v44 = vmul.f32 0.5, %v3409_v62 }
0x111c   :  { %v3411_v36 = vsub.f32 1.5, %v3410_v44 }
0x111e   :  { %v3412_v43 = vmul.f32 %v6791_v49, %v3411_v36 }
0x1120   :  { %v3416_v48 = vsel %vm3415_vm7, %v6791_v49, %v3412_v43 }
0x1121   :  { %v3417_v40 = vmul.f32 %v3416_v48, %v3405_v2 }
0x1123   :  { %v3419_v54 = vmul.f32 %v3417_v40, %v3387_v15  ;;  %v3421_v31 = vperm.slane %v3417_v40, 0 }
0x1125   :  { %v3420_v55 = vsub.f32 %v3418_v45, %v3419_v54  ;;  %v3425_v30 = vmul.f32 %v3421_v31, %v3376_v19  ;;  %v3424_v6 = vmul.f32 %v3421_v31, %v7428_v4  ;;  %v3422_v60 = vmul.f32 %v3421_v31, %v7426_v3  ;;  %v6657_v3 = vld [vmem:[#allocation2 + $0x630] sm:$0xff] }
0x1126   :  { %v3423_v5 = vmul.f32 %v3421_v31, %v7424_v61  ;;  %3620 = vmatpush.bf16.msrb.mxu3 %v6657_v3 }
0x1127   :  { %v3426_v56 = vperm.slane %v3420_v55, 0 }
0x1129   :  { %v3430_v13 = vadd.f32 %v3426_v56, %v3425_v30  ;;  %v3429_v9 = vadd.f32 %v3426_v56, %v3424_v6  ;;  %v3427_v53 = vadd.f32 %v3426_v56, %v3422_v60  ;;  %v3428_v32 = vadd.f32 %v3426_v56, %v3423_v5  ;;  %v6682_v56 = vld [vmem:[#allocation2 + $0x6f8] sm:$0xff] }
0x112a   :  { %3621 = vmatpush.bf16.msrb.mxu3 %v6656_v22 }
0x112b   :  { %v3434_v52 = vmax.f32 %v3430_v13, 0.0  ;;  %v3433_v10 = vmax.f32 %v3429_v9, 0.0  ;;  %v3431_v7 = vmax.f32 %v3427_v53, 0.0  ;;  %v3432_v20 = vmax.f32 %v3428_v32, 0.0 }
0x112d   :  { %v3438_v0 = vadd.f32 %v3434_v52, %v7374_v35  ;;  %v3437_v19 = vadd.f32 %v3433_v10, %v7377_v41  ;;  %v3435_v63 = vadd.f32 %v3431_v7, %v7380_v1  ;;  %v3436_v4 = vadd.f32 %v3432_v20, %v7383_v16  ;;  %v7454_v41 = vld [vmem:[%s7669_s1] sm:$0xff]  ;;  %v7461_v1 = vld [vmem:[%s7669_s1 + $0x8] sm:$0xff]  ;;  %v6681_v10 = vld [vmem:[#allocation2 + $0x6f0] sm:$0xff] }
0x112e   :  { %v6655_v16 = vld [vmem:[#allocation2 + $0x620] sm:$0xff] }
0x112f   :  { %v3441_v61 = vpack.c.bf16 %v3437_v19, %v3437_v19  ;;  %v3442_v58 = vpack.c.bf16 %v3438_v0, %v3438_v0  ;;  %v3439_v25 = vpack.c.bf16 %v3435_v63, %v3435_v63  ;;  %v3440_v57 = vpack.c.bf16 %v3436_v4, %v3436_v4  ;;  %3622 = vmatpush.bf16.msrb.mxu3 %v6655_v16  ;;  %v6680_v19 = vld [vmem:[#allocation2 + $0x6e8] sm:$0xff]  ;;  %v6677_v16 = vld [vmem:[#allocation2 + $0x6d0] sm:$0xff] }
0x1131   :  { %v3449_v23 = vunpack.c.l.b16 %v3441_v61  ;;  %v3450_v24 = vunpack.c.l.b16 %v3442_v58  ;;  %v3447_v29 = vunpack.c.l.b16 %v3439_v25  ;;  %v3448_v33 = vunpack.c.l.b16 %v3440_v57  ;;  %v6679_v58 = vld [vmem:[#allocation2 + $0x6e0] sm:$0xff] }
0x1133   :  { %v3452_v26 = vpack.c.b16 %v3450_v24, %v3449_v23  ;;  %v3451_v35 = vpack.c.b16 %v3448_v33, %v3447_v29  ;;  %3623 = vmatpush.bf16.msrb.mxu3 %v6654_v27  ;;  %v6678_v29 = vld [vmem:[#allocation2 + $0x6d8] sm:$0xff] }
0x1135   :  { %3461 = vmatpush.bf16.msrb.mxu0 %v3452_v26  ;;  %3646 = vmatmul.bf16.vlgmr.msrb.gmra.mxu1 %v3451_v35 }
0x1137   :  { %3624 = vmatpush.bf16.msrb.mxu3 %v6653_v34 }
0x1139   :  { %3462 = vmatpush.bf16.msrb.mxu0 %v3451_v35 }
0x113b   :  { %3625 = vmatpush.bf16.msrb.mxu3 %v6652_v18  ;;  %v6676_v18 = vld [vmem:[#allocation2 + $0x6c8] sm:$0xff] }
0x113c   :  { %6026 = vmatmul.msk.bf16.vlgmr.msrb.gmra.mxu0 %vm122_vm0, %v7454_v41 }
0x113f   :  { %3626 = vmatpush.bf16.msrb.mxu3 %v6651_v21 }
0x1143   :  { %3913 = vmatpush.bf16.msra.mxu3 %v6682_v56 }
0x1145   :  { %3651 = vmatmul.bf16.gmra.mxu1 %v3452_v26 }
0x1147   :  { %3914 = vmatpush.bf16.msra.mxu3 %v6681_v10 }
0x114b   :  { %3915 = vmatpush.bf16.msra.mxu3 %v6680_v19  ;;  %v6670_v19 = vld [vmem:[#allocation2 + $0x698] sm:$0xff] }
0x114c   :  { %6027 = vmatmul.msk.bf16.gmra.mxu0 %vm122_vm0, %v7461_v1 }
0x114f   :  { %3916 = vmatpush.bf16.msra.mxu3 %v6679_v58 }
0x1153   :  { %3917 = vmatpush.bf16.msra.mxu3 %v6678_v29 }
0x1157   :  { %3918 = vmatpush.bf16.msra.mxu3 %v6677_v16 }
0x115b   :  { %3919 = vmatpush.bf16.msra.mxu3 %v6676_v18 }
0x11b2   :  { %v3647_v28 = vpop.f32.mrf.mxu1 }
0x11b9   :  { %v3464_v17 = vpop.f32.mrf.mxu0 }
0x11ba   :  { %v3474_v37 = vpack.c.bf16 %v3464_v17, %v3464_v17  ;;  %v3649_v44 = vpop.f32.mrf.mxu1  ;;  %v6675_v17 = vld [vmem:[#allocation2 + $0x6c0] sm:$0xff] }
0x11bb   :  { %3920 = vmatpush.bf16.msra.mxu3 %v6675_v17 }
0x11bc   :  { %v3482_v46 = vunpack.c.l.b16 %v3474_v37 }
0x11c1   :  { %v3466_v15 = vpop.f32.mrf.mxu0 }
0x11c2   :  { %v3475_v12 = vpack.c.bf16 %v3466_v15, %v3466_v15  ;;  %v3652_v2 = vpop.f32.mrf.mxu1 }
0x11c4   :  { %v3483_v50 = vunpack.c.l.b16 %v3475_v12 }
0x11c6   :  { %v3486_v38 = vpack.c.b16 %v3483_v50, %v3482_v46 }
0x11c8   :  { %3627 = vmatmul.bf16.vlgmr.msrb.gmra.mxu3 %v3486_v38  ;;  %v3684_v38 = vld [vmem:[#allocation5 + $0xc] sm:$0x1] }
0x11c9   :  { %v3469_v51 = vpop.f32.mrf.mxu0 }
0x11ca   :  { %v3476_v11 = vpack.c.bf16 %v3469_v51, %v3469_v51  ;;  %v3654_v6 = vpop.f32.mrf.mxu1 }
0x11cc   :  { %v3484_v14 = vunpack.c.l.b16 %v3476_v11 }
0x11d1   :  { %v3471_v39 = vpop.f32.mrf.mxu0 }
0x11d2   :  { %v3477_v47 = vpack.c.bf16 %v3471_v39, %v3471_v39 }
0x11d4   :  { %v3485_v42 = vunpack.c.l.b16 %v3477_v47  ;;  %v3697_v47 = vld [vmem:[%s7673_s5 + $0xc] sm:$0x1] }
0x11d6   :  { %v3487_v49 = vpack.c.b16 %v3485_v42, %v3484_v14 }
0x11d8   :  { %3632 = vmatmul.bf16.gmra.mxu3 %v3487_v49 }
0x124b   :  { %v3628_v62 = vpop.f32.mrf.mxu3 }
0x124c   :  { %v7467_v40 = vadd.f32 %v3647_v28, %v3628_v62 }
0x124e   :  { %v3667_v31 = vmul.f32 %v7467_v40, %v7467_v40 }
0x1253   :  { %v3630_v36 = vpop.f32.mrf.mxu3 }
0x1254   :  { %v7465_v48 = vadd.f32 %v3649_v44, %v3630_v36 }
0x1256   :  { %v3668_v54 = vmul.f32 %v7465_v48, %v7465_v48  ;;  %v3657_v55 = vadd.f32 %v7465_v48, %v7467_v40 }
0x1258   :  { %v3671_v5 = vadd.f32 %v3668_v54, %v3667_v31 }
0x125b   :  { %v3633_v43 = vpop.f32.mrf.mxu3 }
0x125c   :  { %v7469_v45 = vadd.f32 %v3652_v2, %v3633_v43 }
0x125e   :  { %v3669_v30 = vmul.f32 %v7469_v45, %v7469_v45  ;;  %v3658_v13 = vadd.f32 %v3657_v55, %v7469_v45 }
0x1260   :  { %v3672_v53 = vadd.f32 %v3671_v5, %v3669_v30  ;;  %v6674_v30 = vld [vmem:[#allocation2 + $0x6b8] sm:$0xff] }
0x1261   :  { %3894 = vmatpush.bf16.msra.mxu0 %v6674_v30 }
0x1263   :  { %v3635_v60 = vpop.f32.mrf.mxu3 }
0x1264   :  { %v3655_v9 = vadd.f32 %v3654_v6, %v3635_v60 }
0x1266   :  { %v3659_v32 = vadd.f32 %v3658_v13, %v3655_v9  ;;  %v3670_v52 = vmul.f32 %v3655_v9, %v3655_v9  ;;  %v6673_v13 = vld [vmem:[#allocation2 + $0x6b0] sm:$0xff] }
0x1267   :  { %3895 = vmatpush.bf16.msra.mxu0 %v6673_v13 }
0x1268   :  { %v3660_v7 = vrot.slane %v3659_v32, 4  ;;  %v3673_v20 = vadd.f32 %v3672_v53, %v3670_v52 }
0x126a   :  { %v3661_v59 = vadd.f32 %v3660_v7, %v3659_v32  ;;  %v3674_v0 = vrot.slane %v3673_v20, 4  ;;  %v6672_v7 = vld [vmem:[#allocation2 + $0x6a8] sm:$0xff] }
0x126b   :  { %3896 = vmatpush.bf16.msra.mxu0 %v6672_v7 }
0x126c   :  { %v3662_v63 = vrot.slane %v3661_v59, 2  ;;  %v3675_v4 = vadd.f32 %v3674_v0, %v3673_v20  ;;  %v6671_v0 = vld [vmem:[#allocation2 + $0x6a0] sm:$0xff] }
0x126e   :  { %v3663_v3 = vadd.f32 %v3662_v63, %v3661_v59  ;;  %v3676_v61 = vrot.slane %v3675_v4, 2  ;;  %v6669_v63 = vld [vmem:[#allocation2 + $0x690] sm:$0xff] }
0x126f   :  { %3897 = vmatpush.bf16.msra.mxu0 %v6671_v0 }
0x1270   :  { %v3664_v25 = vrot.slane %v3663_v3, 1  ;;  %v3677_v57 = vadd.f32 %v3676_v61, %v3675_v4  ;;  %v6668_v4 = vld [vmem:[#allocation2 + $0x688] sm:$0xff] }
0x1272   :  { %v3665_v23 = vadd.f32 %v3664_v25, %v3663_v3  ;;  %v3678_v24 = vrot.slane %v3677_v57, 1  ;;  %v6667_v3 = vld [vmem:[#allocation2 + $0x680] sm:$0xff] }
0x1273   :  { %3898 = vmatpush.bf16.msra.mxu0 %v6670_v19 }
0x1274   :  { %v3666_v33 = vmul.f32 %v3665_v23, %v7027_v8  ;;  %v3679_v22 = vadd.f32 %v3678_v24, %v3677_v57 }
0x1276   :  { %v3680_v26 = vmul.f32 %v3679_v22, %v7027_v8  ;;  %v3681_v35 = vmul.f32 %v3666_v33, %v3666_v33 }
0x1277   :  { %3899 = vmatpush.bf16.msra.mxu0 %v6669_v63 }
0x1278   :  { %v3682_v27 = vsub.f32 %v3680_v26, %v3681_v35 }
0x127a   :  { %v3683_v34 = vmax.f32 %v3682_v27, 0.0 }
0x127b   :  { %3900 = vmatpush.bf16.msra.mxu0 %v6668_v4 }
0x127c   :  { %v3685_v21 = vadd.f32 1e-05, %v3683_v34 }
0x127e   :  { %6792 = vrsqrt.f32 %v3685_v21  ;;  %vm3692_vm9 = vweird.f32 %v3685_v21 }
0x127f   :  { %3901 = vmatpush.bf16.msra.mxu0 %v6667_v3  ;;  %v6693_v3 = vld [vmem:[#allocation2 + $0x750] sm:$0xff] }
0x1284   :  { %v6793_v37 = vpop.eup %6792 }
0x1285   :  { %v3687_v15 = vmul.f32 %v6793_v37, %v3685_v21  ;;  %vm3693_vm8 = vweird.f32 %v6793_v37 }
0x1286   :  { %vm3694_vm10 = vmor %vm3692_vm9, %vm3693_vm8 }
0x1287   :  { %v3688_v12 = vmul.f32 %v6793_v37, %v3687_v15 }
0x1289   :  { %v3689_v46 = vmul.f32 0.5, %v3688_v12 }
0x128b   :  { %v3690_v50 = vsub.f32 1.5, %v3689_v46 }
0x128d   :  { %v3691_v51 = vmul.f32 %v6793_v37, %v3690_v50 }
0x128f   :  { %v3695_v11 = vsel %vm3694_vm10, %v6793_v37, %v3691_v51 }
0x1290   :  { %v3696_v39 = vmul.f32 %v3695_v11, %v3684_v38 }
0x1292   :  { %v3698_v14 = vmul.f32 %v3696_v39, %v3666_v33  ;;  %v3700_v42 = vperm.slane %v3696_v39, 0 }
0x1294   :  { %v3699_v49 = vsub.f32 %v3697_v47, %v3698_v14  ;;  %v3704_v28 = vmul.f32 %v3700_v42, %v3655_v9  ;;  %v3703_v44 = vmul.f32 %v3700_v42, %v7469_v45  ;;  %v3701_v36 = vmul.f32 %v3700_v42, %v7467_v40  ;;  %v6698_v14 = vld [vmem:[#allocation2 + $0x778] sm:$0xff] }
0x1295   :  { %v3702_v2 = vmul.f32 %v3700_v42, %v7465_v48  ;;  %4188 = vmatpush.bf16.msrb.mxu0 %v6698_v14 }
0x1296   :  { %v3705_v62 = vperm.slane %v3699_v49, 0 }
0x1298   :  { %v3709_v43 = vadd.f32 %v3705_v62, %v3704_v28  ;;  %v3708_v54 = vadd.f32 %v3705_v62, %v3703_v44  ;;  %v3706_v31 = vadd.f32 %v3705_v62, %v3701_v36  ;;  %v3707_v55 = vadd.f32 %v3705_v62, %v3702_v2 }
0x129a   :  { %v7488_v56 = vmax.f32 %v3709_v43, 0.0  ;;  %v7490_v6 = vmax.f32 %v3708_v54, 0.0  ;;  %v7492_v60 = vmax.f32 %v3706_v31, 0.0  ;;  %v7494_v5 = vmax.f32 %v3707_v55, 0.0  ;;  %v6697_v54 = vld [vmem:[#allocation2 + $0x770] sm:$0xff] }
0x129b   :  { %4189 = vmatpush.bf16.msrb.mxu0 %v6697_v54  ;;  %v6689_v54 = vld [vmem:[#allocation2 + $0x730] sm:$0xff] }
0x129c   :  { %v3717_v40 = vpack.c.bf16 %v7488_v56, %v7488_v56  ;;  %v3716_v48 = vpack.c.bf16 %v7490_v6, %v7490_v6  ;;  %v3714_v45 = vpack.c.bf16 %v7492_v60, %v7492_v60  ;;  %v3715_v9 = vpack.c.bf16 %v7494_v5, %v7494_v5 }
0x129e   :  { %v3724_v53 = vunpack.c.l.b16 %v3716_v48  ;;  %v3725_v32 = vunpack.c.l.b16 %v3717_v40  ;;  %v3722_v52 = vunpack.c.l.b16 %v3714_v45  ;;  %v3723_v10 = vunpack.c.l.b16 %v3715_v9  ;;  %v6696_v40 = vld [vmem:[#allocation2 + $0x768] sm:$0xff] }
0x129f   :  { %4190 = vmatpush.bf16.msrb.mxu0 %v6696_v40 }
0x12a0   :  { %v3727_v20 = vpack.c.b16 %v3725_v32, %v3724_v53  ;;  %v3726_v59 = vpack.c.b16 %v3723_v10, %v3722_v52  ;;  %v6695_v32 = vld [vmem:[#allocation2 + $0x760] sm:$0xff] }
0x12a2   :  { %3736 = vmatpush.bf16.msrb.mxu2 %v3727_v20  ;;  %3921 = vmatmul.bf16.vlgmr.msra.gmra.mxu3 %v3726_v59 }
0x12a3   :  { %4191 = vmatpush.bf16.msrb.mxu0 %v6695_v32  ;;  %v6685_v32 = vld [vmem:[#allocation2 + $0x710] sm:$0xff] }
0x12a6   :  { %3737 = vmatpush.bf16.msrb.mxu2 %v3726_v59  ;;  %v6694_v59 = vld [vmem:[#allocation2 + $0x758] sm:$0xff] }
0x12a7   :  { %4192 = vmatpush.bf16.msrb.mxu0 %v6694_v59 }
0x12a9   :  { %6092 = vmatmul.msk.bf16.vlgmr.msrb.gmra.mxu2 %vm122_vm0, %v7454_v41 }
0x12ab   :  { %4193 = vmatpush.bf16.msrb.mxu0 %v6693_v3 }
0x12b2   :  { %3926 = vmatmul.bf16.gmra.mxu3 %v3727_v20 }
0x12b9   :  { %6093 = vmatmul.msk.bf16.gmra.mxu2 %vm122_vm0, %v7461_v1 }
0x1325   :  { %v3922_v18 = vpop.f32.mrf.mxu3 }
0x132c   :  { %v3739_v61 = vpop.f32.mrf.mxu2 }
0x132d   :  { %v3749_v58 = vpack.c.bf16 %v3739_v61, %v3739_v61  ;;  %v3924_v17 = vpop.f32.mrf.mxu3 }
0x132f   :  { %v3757_v23 = vunpack.c.l.b16 %v3749_v58 }
0x1334   :  { %v3741_v25 = vpop.f32.mrf.mxu2 }
0x1335   :  { %v3750_v57 = vpack.c.bf16 %v3741_v25, %v3741_v25  ;;  %v3927_v15 = vpop.f32.mrf.mxu3  ;;  %v6692_v25 = vld [vmem:[#allocation2 + $0x748] sm:$0xff] }
0x1336   :  { %4194 = vmatpush.bf16.msrb.mxu0 %v6692_v25 }
0x1337   :  { %v3758_v24 = vunpack.c.l.b16 %v3750_v57 }
0x1339   :  { %v3761_v29 = vpack.c.b16 %v3758_v24, %v3757_v23  ;;  %v6691_v23 = vld [vmem:[#allocation2 + $0x740] sm:$0xff] }
0x133a   :  { %4195 = vmatpush.bf16.msrb.mxu0 %v6691_v23 }
0x133b   :  { %3902 = vmatmul.bf16.vlgmr.msra.gmra.mxu0 %v3761_v29 }
0x133c   :  { %v3744_v33 = vpop.f32.mrf.mxu2 }
0x133d   :  { %v3751_v22 = vpack.c.bf16 %v3744_v33, %v3744_v33  ;;  %v3929_v42 = vpop.f32.mrf.mxu3 }
0x133f   :  { %v3759_v16 = vunpack.c.l.b16 %v3751_v22 }
0x1344   :  { %v3746_v26 = vpop.f32.mrf.mxu2 }
0x1345   :  { %v3752_v35 = vpack.c.bf16 %v3746_v26, %v3746_v26 }
0x1347   :  { %v3760_v27 = vunpack.c.l.b16 %v3752_v35  ;;  %v3959_v35 = vld [vmem:[#allocation5 + $0xd] sm:$0x1] }
0x1349   :  { %v3762_v34 = vpack.c.b16 %v3760_v27, %v3759_v16 }
0x134b   :  { %3907 = vmatmul.bf16.gmra.mxu0 %v3762_v34 }
0x13b8   :  { %v3903_v21 = vpop.f32.mrf.mxu0 }
0x13b9   :  { %v7510_v50 = vadd.f32 %v3922_v18, %v3903_v21  ;;  %v3972_v18 = vld [vmem:[%s7673_s5 + $0xd] sm:$0x1] }
0x13bb   :  { %v3942_v11 = vmul.f32 %v7510_v50, %v7510_v50 }
0x13c0   :  { %v3905_v37 = vpop.f32.mrf.mxu0 }
0x13c1   :  { %v7508_v46 = vadd.f32 %v3924_v17, %v3905_v37 }
0x13c3   :  { %v3943_v51 = vmul.f32 %v7508_v46, %v7508_v46  ;;  %v3932_v39 = vadd.f32 %v7508_v46, %v7510_v50 }
0x13c5   :  { %v3946_v28 = vadd.f32 %v3943_v51, %v3942_v11 }
0x13c8   :  { %v3908_v12 = vpop.f32.mrf.mxu0 }
0x13c9   :  { %v7512_v38 = vadd.f32 %v3927_v15, %v3908_v12 }
0x13cb   :  { %v3944_v47 = vmul.f32 %v7512_v38, %v7512_v38  ;;  %v3933_v62 = vadd.f32 %v3932_v39, %v7512_v38 }
0x13cd   :  { %v3947_v36 = vadd.f32 %v3946_v28, %v3944_v47  ;;  %v6690_v28 = vld [vmem:[#allocation2 + $0x738] sm:$0xff] }
0x13ce   :  { %4169 = vmatpush.bf16.msra.mxu2 %v6690_v28 }
0x13d0   :  { %v3910_v49 = vpop.f32.mrf.mxu0 }
0x13d1   :  { %v3930_v44 = vadd.f32 %v3929_v42, %v3910_v49 }
0x13d2   :  { %4170 = vmatpush.bf16.msra.mxu2 %v6689_v54 }
0x13d3   :  { %v3934_v2 = vadd.f32 %v3933_v62, %v3930_v44  ;;  %v3945_v43 = vmul.f32 %v3930_v44, %v3930_v44 }
0x13d5   :  { %v3935_v31 = vrot.slane %v3934_v2, 4  ;;  %v3948_v55 = vadd.f32 %v3947_v36, %v3945_v43 }
0x13d7   :  { %v3936_v30 = vadd.f32 %v3935_v31, %v3934_v2  ;;  %v3949_v13 = vrot.slane %v3948_v55, 4 }
0x13d9   :  { %v3937_v48 = vrot.slane %v3936_v30, 2  ;;  %v3950_v45 = vadd.f32 %v3949_v13, %v3948_v55 }
0x13db   :  { %v3938_v9 = vadd.f32 %v3937_v48, %v3936_v30  ;;  %v3951_v53 = vrot.slane %v3950_v45, 2 }
0x13dd   :  { %v3939_v52 = vrot.slane %v3938_v9, 1  ;;  %v3952_v10 = vadd.f32 %v3951_v53, %v3950_v45  ;;  %v6686_v53 = vld [vmem:[#allocation2 + $0x718] sm:$0xff] }
0x13df   :  { %v3940_v7 = vadd.f32 %v3939_v52, %v3938_v9  ;;  %v3953_v20 = vrot.slane %v3952_v10, 1  ;;  %v6687_v9 = vld [vmem:[#allocation2 + $0x720] sm:$0xff]  ;;  %v6684_v52 = vld [vmem:[#allocation2 + $0x708] sm:$0xff] }
0x13e1   :  { %v3941_v0 = vmul.f32 %v3940_v7, %v7027_v8  ;;  %v3954_v19 = vadd.f32 %v3953_v20, %v3952_v10  ;;  %v6683_v10 = vld [vmem:[#allocation2 + $0x700] sm:$0xff] }
0x13e3   :  { %v3955_v63 = vmul.f32 %v3954_v19, %v7027_v8  ;;  %v3956_v4 = vmul.f32 %v3941_v0, %v3941_v0 }
0x13e5   :  { %v3957_v61 = vsub.f32 %v3955_v63, %v3956_v4 }
0x13e7   :  { %v3958_v58 = vmax.f32 %v3957_v61, 0.0 }
0x13e9   :  { %v3960_v57 = vadd.f32 1e-05, %v3958_v58 }
0x13eb   :  { %6794 = vrsqrt.f32 %v3960_v57  ;;  %vm3967_vm12 = vweird.f32 %v3960_v57 }
0x13f1   :  { %v6795_v24 = vpop.eup %6794 }
0x13f2   :  { %v3962_v29 = vmul.f32 %v6795_v24, %v3960_v57  ;;  %vm3968_vm11 = vweird.f32 %v6795_v24 }
0x13f3   :  { %vm3969_vm13 = vmor %vm3967_vm12, %vm3968_vm11 }
0x13f4   :  { %v3963_v33 = vmul.f32 %v6795_v24, %v3962_v29 }
0x13f6   :  { %v3964_v22 = vmul.f32 0.5, %v3963_v33 }
0x13f8   :  { %v3965_v26 = vsub.f32 1.5, %v3964_v22 }
0x13fa   :  { %v3966_v16 = vmul.f32 %v6795_v24, %v3965_v26 }
0x13fc   :  { %v3970_v27 = vsel %vm3969_vm13, %v6795_v24, %v3966_v16 }
0x13fd   :  { %v3971_v34 = vmul.f32 %v3970_v27, %v3959_v35 }
0x13ff   :  { %v3973_v21 = vmul.f32 %v3971_v34, %v3941_v0  ;;  %v3975_v17 = vperm.slane %v3971_v34, 0 }
0x1401   :  { %v3974_v37 = vsub.f32 %v3972_v18, %v3973_v21  ;;  %v3979_v15 = vmul.f32 %v3975_v17, %v3930_v44  ;;  %v3978_v51 = vmul.f32 %v3975_v17, %v7512_v38  ;;  %v3976_v11 = vmul.f32 %v3975_v17, %v7510_v50 }
0x1402   :  { %v3977_v39 = vmul.f32 %v3975_v17, %v7508_v46  ;;  %v6688_v46 = vld [vmem:[#allocation2 + $0x728] sm:$0xff] }
0x1403   :  { %v3980_v12 = vperm.slane %v3974_v37, 0  ;;  %4171 = vmatpush.bf16.msra.mxu2 %v6688_v46 }
0x1405   :  { %v3984_v47 = vadd.f32 %v3980_v12, %v3979_v15  ;;  %v3983_v14 = vadd.f32 %v3980_v12, %v3978_v51  ;;  %v3981_v42 = vadd.f32 %v3980_v12, %v3976_v11  ;;  %v3982_v49 = vadd.f32 %v3980_v12, %v3977_v39 }
0x1407   :  { %v3988_v62 = vmax.f32 %v3984_v47, 0.0  ;;  %v3987_v36 = vmax.f32 %v3983_v14, 0.0  ;;  %v3985_v2 = vmax.f32 %v3981_v42, 0.0  ;;  %v3986_v43 = vmax.f32 %v3982_v49, 0.0  ;;  %4172 = vmatpush.bf16.msra.mxu2 %v6687_v9  ;;  %v6714_v14 = vld [vmem:[#allocation2 + $0x7f8] sm:$0xff] }
0x1409   :  { %v3992_v31 = vpack.c.bf16 %v3988_v62, %v3988_v62  ;;  %v3991_v44 = vpack.c.bf16 %v3987_v36, %v3987_v36  ;;  %v3989_v55 = vpack.c.bf16 %v3985_v2, %v3985_v2  ;;  %v3990_v30 = vpack.c.bf16 %v3986_v43, %v3986_v43  ;;  %v6713_v2 = vld [vmem:[#allocation2 + $0x7f0] sm:$0xff] }
0x140b   :  { %v4000_v38 = vunpack.c.l.b16 %v3992_v31  ;;  %v3999_v13 = vunpack.c.l.b16 %v3991_v44  ;;  %v3997_v50 = vunpack.c.l.b16 %v3989_v55  ;;  %v3998_v40 = vunpack.c.l.b16 %v3990_v30  ;;  %4173 = vmatpush.bf16.msra.mxu2 %v6686_v53  ;;  %v6712_v55 = vld [vmem:[#allocation2 + $0x7e8] sm:$0xff]  ;;  %v6710_v53 = vld [vmem:[#allocation2 + $0x7d8] sm:$0xff] }
0x140d   :  { %v4002_v48 = vpack.c.b16 %v4000_v38, %v3999_v13  ;;  %v4001_v45 = vpack.c.b16 %v3998_v40, %v3997_v50  ;;  %v6711_v40 = vld [vmem:[#allocation2 + $0x7e0] sm:$0xff] }
0x140f   :  { %4011 = vmatpush.bf16.msra.mxu1 %v4002_v48  ;;  %4196 = vmatmul.bf16.vlgmr.msrb.gmra.mxu0 %v4001_v45 }
0x1410   :  { %4174 = vmatpush.bf16.msra.mxu2 %v6685_v32 }
0x1413   :  { %4012 = vmatpush.bf16.msra.mxu1 %v4001_v45 }
0x1414   :  { %4175 = vmatpush.bf16.msra.mxu2 %v6684_v52 }
0x1416   :  { %6158 = vmatmul.msk.bf16.vlgmr.msra.gmra.mxu1 %vm122_vm0, %v7454_v41 }
0x1418   :  { %4176 = vmatpush.bf16.msra.mxu2 %v6683_v10 }
0x141c   :  { %4467 = vmatpush.bf16.msrb.mxu2 %v6714_v14 }
0x141f   :  { %4201 = vmatmul.bf16.gmra.mxu0 %v4002_v48 }
0x1420   :  { %4468 = vmatpush.bf16.msrb.mxu2 %v6713_v2 }
0x1424   :  { %4469 = vmatpush.bf16.msrb.mxu2 %v6712_v55 }
0x1426   :  { %6159 = vmatmul.msk.bf16.gmra.mxu1 %vm122_vm0, %v7461_v1 }
0x1428   :  { %4470 = vmatpush.bf16.msrb.mxu2 %v6711_v40  ;;  %v6699_v40 = vld [vmem:[#allocation2 + $0x780] sm:$0xff] }
0x142c   :  { %4471 = vmatpush.bf16.msrb.mxu2 %v6710_v53 }
0x148c   :  { %v4197_v29 = vpop.f32.mrf.mxu0 }
0x1493   :  { %v4014_v7 = vpop.f32.mrf.mxu1 }
0x1494   :  { %v4024_v20 = vpack.c.bf16 %v4014_v7, %v4014_v7  ;;  %v4199_v22 = vpop.f32.mrf.mxu0  ;;  %v6709_v7 = vld [vmem:[#allocation2 + $0x7d0] sm:$0xff] }
0x1495   :  { %4472 = vmatpush.bf16.msrb.mxu2 %v6709_v7 }
0x1496   :  { %v4032_v19 = vunpack.c.l.b16 %v4024_v20 }
0x149b   :  { %v4016_v59 = vpop.f32.mrf.mxu1 }
0x149c   :  { %v4025_v0 = vpack.c.bf16 %v4016_v59, %v4016_v59  ;;  %v4202_v35 = vpop.f32.mrf.mxu0 }
0x149e   :  { %v4033_v63 = vunpack.c.l.b16 %v4025_v0  ;;  %v6708_v0 = vld [vmem:[#allocation2 + $0x7c8] sm:$0xff] }
0x149f   :  { %4473 = vmatpush.bf16.msrb.mxu2 %v6708_v0 }
0x14a0   :  { %v4036_v4 = vpack.c.b16 %v4033_v63, %v4032_v19  ;;  %v6707_v19 = vld [vmem:[#allocation2 + $0x7c0] sm:$0xff] }
0x14a2   :  { %4177 = vmatmul.bf16.vlgmr.msra.gmra.mxu2 %v4036_v4 }
0x14a3   :  { %v4019_v3 = vpop.f32.mrf.mxu1  ;;  %4474 = vmatpush.bf16.msrb.mxu2 %v6707_v19 }
0x14a4   :  { %v4026_v61 = vpack.c.bf16 %v4019_v3, %v4019_v3  ;;  %v4204_v12 = vpop.f32.mrf.mxu0 }
0x14a6   :  { %v4034_v57 = vunpack.c.l.b16 %v4026_v61 }
0x14ab   :  { %v4021_v58 = vpop.f32.mrf.mxu1 }
0x14ac   :  { %v4027_v25 = vpack.c.bf16 %v4021_v58, %v4021_v58 }
0x14ae   :  { %v4035_v23 = vunpack.c.l.b16 %v4027_v25  ;;  %v4234_v25 = vld [vmem:[#allocation5 + $0xe] sm:$0x1] }
0x14b0   :  { %v4037_v24 = vpack.c.b16 %v4035_v23, %v4034_v57 }
0x14b2   :  { %4182 = vmatmul.bf16.gmra.mxu2 %v4037_v24 }
0x1525   :  { %v4178_v33 = vpop.f32.mrf.mxu2 }
0x1526   :  { %v7537_v34 = vadd.f32 %v4197_v29, %v4178_v33  ;;  %v4247_v29 = vld [vmem:[%s7673_s5 + $0xe] sm:$0x1] }
0x1528   :  { %v4217_v17 = vmul.f32 %v7537_v34, %v7537_v34 }
0x152d   :  { %v4180_v26 = vpop.f32.mrf.mxu2 }
0x152e   :  { %v7535_v27 = vadd.f32 %v4199_v22, %v4180_v26 }
0x1530   :  { %v4218_v21 = vmul.f32 %v7535_v27, %v7535_v27  ;;  %v4207_v37 = vadd.f32 %v7535_v27, %v7537_v34 }
0x1532   :  { %v4221_v11 = vadd.f32 %v4218_v21, %v4217_v17 }
0x1535   :  { %v4183_v16 = vpop.f32.mrf.mxu2 }
0x1536   :  { %v7539_v18 = vadd.f32 %v4202_v35, %v4183_v16 }
0x1538   :  { %v4219_v15 = vmul.f32 %v7539_v18, %v7539_v18  ;;  %v4208_v39 = vadd.f32 %v4207_v37, %v7539_v18 }
0x153a   :  { %v4222_v42 = vadd.f32 %v4221_v11, %v4219_v15 }
0x153d   :  { %v4185_v51 = vpop.f32.mrf.mxu2 }
0x153e   :  { %v4205_v47 = vadd.f32 %v4204_v12, %v4185_v51 }
0x1540   :  { %v4209_v49 = vadd.f32 %v4208_v39, %v4205_v47  ;;  %v4220_v28 = vmul.f32 %v4205_v47, %v4205_v47 }
0x1542   :  { %v4210_v62 = vrot.slane %v4209_v49, 4  ;;  %v4223_v36 = vadd.f32 %v4222_v42, %v4220_v28  ;;  %v6706_v28 = vld [vmem:[#allocation2 + $0x7b8] sm:$0xff] }
0x1543   :  { %4448 = vmatpush.bf16.msrb.mxu1 %v6706_v28  ;;  %v6728_v28 = vld [vmem:[#allocation2 + $0x868] sm:$0xff] }
0x1544   :  { %v4211_v43 = vadd.f32 %v4210_v62, %v4209_v49  ;;  %v4224_v54 = vrot.slane %v4223_v36, 4 }
0x1546   :  { %v4212_v31 = vrot.slane %v4211_v43, 2  ;;  %v4225_v44 = vadd.f32 %v4224_v54, %v4223_v36 }
0x1548   :  { %v4213_v30 = vadd.f32 %v4212_v31, %v4211_v43  ;;  %v4226_v38 = vrot.slane %v4225_v44, 2 }
0x154a   :  { %v4214_v13 = vrot.slane %v4213_v30, 1  ;;  %v4227_v50 = vadd.f32 %v4226_v38, %v4225_v44  ;;  %v6702_v38 = vld [vmem:[#allocation2 + $0x798] sm:$0xff] }
0x154c   :  { %v4215_v46 = vadd.f32 %v4214_v13, %v4213_v30  ;;  %v4228_v48 = vrot.slane %v4227_v50, 1  ;;  %v6703_v30 = vld [vmem:[#allocation2 + $0x7a0] sm:$0xff]  ;;  %v6701_v13 = vld [vmem:[#allocation2 + $0x790] sm:$0xff] }
0x154e   :  { %v4216_v45 = vmul.f32 %v4215_v46, %v7027_v8  ;;  %v4229_v9 = vadd.f32 %v4228_v48, %v4227_v50  ;;  %v6700_v50 = vld [vmem:[#allocation2 + $0x788] sm:$0xff] }
0x1550   :  { %v4230_v32 = vmul.f32 %v4229_v9, %v7027_v8  ;;  %v4231_v52 = vmul.f32 %v4216_v45, %v4216_v45 }
0x1552   :  { %v4232_v10 = vsub.f32 %v4230_v32, %v4231_v52 }
0x1554   :  { %v4233_v20 = vmax.f32 %v4232_v10, 0.0 }
0x1556   :  { %v4235_v59 = vadd.f32 1e-05, %v4233_v20 }
0x1558   :  { %6796 = vrsqrt.f32 %v4235_v59  ;;  %vm4242_vm15 = vweird.f32 %v4235_v59 }
0x155e   :  { %v6797_v63 = vpop.eup %6796 }
0x155f   :  { %v4237_v4 = vmul.f32 %v6797_v63, %v4235_v59  ;;  %vm4243_vm14 = vweird.f32 %v6797_v63 }
0x1560   :  { %vm4244_vm1 = vmor %vm4242_vm15, %vm4243_vm14 }
0x1561   :  { %v4238_v3 = vmul.f32 %v6797_v63, %v4237_v4 }
0x1563   :  { %v4239_v61 = vmul.f32 0.5, %v4238_v3 }
0x1565   :  { %v4240_v58 = vsub.f32 1.5, %v4239_v61 }
0x1567   :  { %v4241_v57 = vmul.f32 %v6797_v63, %v4240_v58 }
0x1569   :  { %v4245_v23 = vsel %vm4244_vm1, %v6797_v63, %v4241_v57 }
0x156a   :  { %v4246_v24 = vmul.f32 %v4245_v23, %v4234_v25 }
0x156c   :  { %v4248_v33 = vmul.f32 %v4246_v24, %v4216_v45  ;;  %v4250_v22 = vperm.slane %v4246_v24, 0 }
0x156e   :  { %v4249_v26 = vsub.f32 %v4247_v29, %v4248_v33  ;;  %v4254_v35 = vmul.f32 %v4250_v22, %v4205_v47  ;;  %v4253_v21 = vmul.f32 %v4250_v22, %v7539_v18  ;;  %v4251_v17 = vmul.f32 %v4250_v22, %v7537_v34  ;;  %v6705_v34 = vld [vmem:[#allocation2 + $0x7b0] sm:$0xff] }
0x156f   :  { %v4252_v37 = vmul.f32 %v4250_v22, %v7535_v27  ;;  %4449 = vmatpush.bf16.msrb.mxu1 %v6705_v34 }
0x1570   :  { %v4255_v16 = vperm.slane %v4249_v26, 0  ;;  %v6730_v26 = vld [vmem:[#allocation2 + $0x878] sm:$0xff] }
0x1572   :  { %v4259_v15 = vadd.f32 %v4255_v16, %v4254_v35  ;;  %v4258_v12 = vadd.f32 %v4255_v16, %v4253_v21  ;;  %v4256_v51 = vadd.f32 %v4255_v16, %v4251_v17  ;;  %v4257_v11 = vadd.f32 %v4255_v16, %v4252_v37 }
0x1574   :  { %v4263_v39 = vmax.f32 %v4259_v15, 0.0  ;;  %v4262_v14 = vmax.f32 %v4258_v12, 0.0  ;;  %v4260_v42 = vmax.f32 %v4256_v51, 0.0  ;;  %v4261_v49 = vmax.f32 %v4257_v11, 0.0  ;;  %v6729_v11 = vld [vmem:[#allocation2 + $0x870] sm:$0xff] }
0x1576   :  { %v7559_v62 = vadd.f32 %v4263_v39, %v7488_v56  ;;  %v7562_v47 = vadd.f32 %v4262_v14, %v7490_v6  ;;  %v7565_v18 = vadd.f32 %v4260_v42, %v7492_v60  ;;  %v7568_v27 = vadd.f32 %v4261_v49, %v7494_v5  ;;  %v6704_v5 = vld [vmem:[#allocation2 + $0x7a8] sm:$0xff] }
0x1577   :  { %4450 = vmatpush.bf16.msrb.mxu1 %v6704_v5  ;;  %v6726_v5 = vld [vmem:[#allocation2 + $0x858] sm:$0xff] }
0x1578   :  { %v4270_v36 = vpack.c.bf16 %v7562_v47, %v7562_v47  ;;  %v4271_v2 = vpack.c.bf16 %v7559_v62, %v7559_v62  ;;  %v4268_v56 = vpack.c.bf16 %v7565_v18, %v7565_v18  ;;  %v4269_v6 = vpack.c.bf16 %v7568_v27, %v7568_v27 }
0x157a   :  { %v4278_v43 = vunpack.c.l.b16 %v4270_v36  ;;  %v4279_v60 = vunpack.c.l.b16 %v4271_v2  ;;  %v4276_v54 = vunpack.c.l.b16 %v4268_v56  ;;  %v4277_v31 = vunpack.c.l.b16 %v4269_v6  ;;  %v6727_v6 = vld [vmem:[#allocation2 + $0x860] sm:$0xff] }
0x157b   :  { %4451 = vmatpush.bf16.msrb.mxu1 %v6703_v30 }
0x157c   :  { %v4281_v44 = vpack.c.b16 %v4279_v60, %v4278_v43  ;;  %v4280_v55 = vpack.c.b16 %v4277_v31, %v4276_v54 }
0x157e   :  { %4290 = vmatpush.bf16.msrb.mxu3 %v4281_v44  ;;  %4475 = vmatmul.bf16.vlgmr.msrb.gmra.mxu2 %v4280_v55 }
0x157f   :  { %4452 = vmatpush.bf16.msrb.mxu1 %v6702_v38 }
0x1582   :  { %4291 = vmatpush.bf16.msrb.mxu3 %v4280_v55 }
0x1583   :  { %4453 = vmatpush.bf16.msrb.mxu1 %v6701_v13  ;;  %v6725_v13 = vld [vmem:[#allocation2 + $0x850] sm:$0xff] }
0x1585   :  { %6224 = vmatmul.msk.bf16.vlgmr.msrb.gmra.mxu3 %vm122_vm0, %v7454_v41 }
0x1587   :  { %4454 = vmatpush.bf16.msrb.mxu1 %v6700_v50 }
0x158b   :  { %4455 = vmatpush.bf16.msrb.mxu1 %v6699_v40 }
0x158e   :  { %4480 = vmatmul.bf16.gmra.mxu2 %v4281_v44 }
0x158f   :  { %4742 = vmatpush.bf16.msra.mxu1 %v6730_v26 }
0x1593   :  { %4743 = vmatpush.bf16.msra.mxu1 %v6729_v11 }
0x1595   :  { %6225 = vmatmul.msk.bf16.gmra.mxu3 %vm122_vm0, %v7461_v1 }
0x1597   :  { %4744 = vmatpush.bf16.msra.mxu1 %v6728_v28 }
0x159b   :  { %4745 = vmatpush.bf16.msra.mxu1 %v6727_v6  ;;  %v6717_v6 = vld [vmem:[#allocation2 + $0x810] sm:$0xff] }
0x159f   :  { %4746 = vmatpush.bf16.msra.mxu1 %v6726_v5 }
0x15a3   :  { %4747 = vmatpush.bf16.msra.mxu1 %v6725_v13 }
0x1601   :  { %v4476_v19 = vpop.f32.mrf.mxu2 }
0x1608   :  { %v4293_v46 = vpop.f32.mrf.mxu3 }
0x1609   :  { %v4303_v48 = vpack.c.bf16 %v4293_v46, %v4293_v46  ;;  %v4478_v4 = vpop.f32.mrf.mxu2  ;;  %v6724_v46 = vld [vmem:[#allocation2 + $0x848] sm:$0xff] }
0x160a   :  { %4748 = vmatpush.bf16.msra.mxu1 %v6724_v46 }
0x160b   :  { %v4311_v53 = vunpack.c.l.b16 %v4303_v48 }
0x1610   :  { %v4295_v45 = vpop.f32.mrf.mxu3 }
0x1611   :  { %v4304_v9 = vpack.c.bf16 %v4295_v45, %v4295_v45  ;;  %v4481_v61 = vpop.f32.mrf.mxu2  ;;  %v6723_v45 = vld [vmem:[#allocation2 + $0x840] sm:$0xff] }
0x1612   :  { %4749 = vmatpush.bf16.msra.mxu1 %v6723_v45 }
0x1613   :  { %v4312_v41 = vunpack.c.l.b16 %v4304_v9 }
0x1615   :  { %v4315_v32 = vpack.c.b16 %v4312_v41, %v4311_v53 }
0x1617   :  { %4456 = vmatmul.bf16.vlgmr.msrb.gmra.mxu1 %v4315_v32 }
0x1618   :  { %v4298_v52 = vpop.f32.mrf.mxu3 }
0x1619   :  { %v4305_v1 = vpack.c.bf16 %v4298_v52, %v4298_v52  ;;  %v4483_v35 = vpop.f32.mrf.mxu2 }
0x161b   :  { %v4313_v20 = vunpack.c.l.b16 %v4305_v1  ;;  %v4513_v1 = vld [vmem:[#allocation5 + $0xf] sm:$0x1] }
0x1620   :  { %v4300_v10 = vpop.f32.mrf.mxu3 }
0x1621   :  { %v4306_v7 = vpack.c.bf16 %v4300_v10, %v4300_v10 }
0x1623   :  { %v4314_v59 = vunpack.c.l.b16 %v4306_v7 }
0x1625   :  { %v4316_v0 = vpack.c.b16 %v4314_v59, %v4313_v20  ;;  %v4526_v59 = vld [vmem:[%s7673_s5 + $0xf] sm:$0x1] }
0x1627   :  { %4461 = vmatmul.bf16.gmra.mxu1 %v4316_v0 }
0x1694   :  { %v4457_v63 = vpop.f32.mrf.mxu1 }
0x1695   :  { %v7584_v57 = vadd.f32 %v4476_v19, %v4457_v63 }
0x1697   :  { %v4496_v29 = vmul.f32 %v7584_v57, %v7584_v57 }
0x169c   :  { %v4459_v3 = vpop.f32.mrf.mxu1 }
0x169d   :  { %v7582_v25 = vadd.f32 %v4478_v4, %v4459_v3 }
0x169f   :  { %v4497_v24 = vmul.f32 %v7582_v25, %v7582_v25  ;;  %v4486_v33 = vadd.f32 %v7582_v25, %v7584_v57 }
0x16a1   :  { %v4500_v21 = vadd.f32 %v4497_v24, %v4496_v29 }
0x16a4   :  { %v4462_v58 = vpop.f32.mrf.mxu1 }
0x16a5   :  { %v7586_v23 = vadd.f32 %v4481_v61, %v4462_v58 }
0x16a7   :  { %v4498_v22 = vmul.f32 %v7586_v23, %v7586_v23  ;;  %v4487_v17 = vadd.f32 %v4486_v33, %v7586_v23 }
0x16a9   :  { %v4501_v15 = vadd.f32 %v4500_v21, %v4498_v22 }
0x16ac   :  { %v4464_v16 = vpop.f32.mrf.mxu1 }
0x16ad   :  { %v4484_v37 = vadd.f32 %v4483_v35, %v4464_v16  ;;  %v6722_v35 = vld [vmem:[#allocation2 + $0x838] sm:$0xff] }
0x16ae   :  { %4723 = vmatpush.bf16.msra.mxu3 %v6722_v35 }
0x16af   :  { %v4488_v12 = vadd.f32 %v4487_v17, %v4484_v37  ;;  %v4499_v51 = vmul.f32 %v4484_v37, %v4484_v37 }
0x16b1   :  { %v4489_v39 = vrot.slane %v4488_v12, 4  ;;  %v4502_v14 = vadd.f32 %v4501_v15, %v4499_v51 }
0x16b3   :  { %v4490_v42 = vadd.f32 %v4489_v39, %v4488_v12  ;;  %v4503_v49 = vrot.slane %v4502_v14, 4  ;;  %v6721_v12 = vld [vmem:[#allocation2 + $0x830] sm:$0xff] }
0x16b4   :  { %4724 = vmatpush.bf16.msra.mxu3 %v6721_v12 }
0x16b5   :  { %v4491_v34 = vrot.slane %v4490_v42, 2  ;;  %v4504_v36 = vadd.f32 %v4503_v49, %v4502_v14 }
0x16b7   :  { %v4492_v2 = vadd.f32 %v4491_v34, %v4490_v42  ;;  %v4505_v56 = vrot.slane %v4504_v36, 2  ;;  %v7608_v34 = vld [vmem:[%s7669_s1] sm:$0xff] }
0x16b9   :  { %v4493_v43 = vrot.slane %v4492_v2, 1  ;;  %v4506_v60 = vadd.f32 %v4505_v56, %v4504_v36  ;;  %v7615_v36 = vld [vmem:[%s7669_s1 + $0x8] sm:$0xff]  ;;  %v6718_v56 = vld [vmem:[#allocation2 + $0x818] sm:$0xff] }
0x16bb   :  { %v4494_v54 = vadd.f32 %v4493_v43, %v4492_v2  ;;  %v4507_v31 = vrot.slane %v4506_v60, 1  ;;  %v6719_v2 = vld [vmem:[#allocation2 + $0x820] sm:$0xff]  ;;  %v6716_v43 = vld [vmem:[#allocation2 + $0x808] sm:$0xff] }
0x16bd   :  { %v4495_v44 = vmul.f32 %v4494_v54, %v7027_v8  ;;  %v4508_v55 = vadd.f32 %v4507_v31, %v4506_v60  ;;  %v6715_v60 = vld [vmem:[#allocation2 + $0x800] sm:$0xff] }
0x16bf   :  { %v4509_v30 = vmul.f32 %v4508_v55, %v7027_v8  ;;  %v4510_v38 = vmul.f32 %v4495_v44, %v4495_v44 }
0x16c1   :  { %v4511_v50 = vsub.f32 %v4509_v30, %v4510_v38 }
0x16c3   :  { %v4512_v40 = vmax.f32 %v4511_v50, 0.0 }
0x16c5   :  { %v4514_v48 = vadd.f32 1e-05, %v4512_v40 }
0x16c7   :  { %6798 = vrsqrt.f32 %v4514_v48  ;;  %vm4521_vm3 = vweird.f32 %v4514_v48 }
0x16cd   :  { %v6799_v9 = vpop.eup %6798 }
0x16ce   :  { %v4516_v53 = vmul.f32 %v6799_v9, %v4514_v48  ;;  %vm4522_vm2 = vweird.f32 %v6799_v9 }
0x16cf   :  { %vm4523_vm4 = vmor %vm4521_vm3, %vm4522_vm2 }
0x16d0   :  { %v4517_v41 = vmul.f32 %v6799_v9, %v4516_v53 }
0x16d2   :  { %v4518_v32 = vmul.f32 0.5, %v4517_v41 }
0x16d4   :  { %v4519_v52 = vsub.f32 1.5, %v4518_v32 }
0x16d6   :  { %v4520_v10 = vmul.f32 %v6799_v9, %v4519_v52 }
0x16d8   :  { %v4524_v7 = vsel %vm4523_vm4, %v6799_v9, %v4520_v10 }
0x16d9   :  { %v4525_v20 = vmul.f32 %v4524_v7, %v4513_v1 }
0x16db   :  { %v4527_v0 = vmul.f32 %v4525_v20, %v4495_v44  ;;  %v4529_v19 = vperm.slane %v4525_v20, 0 }
0x16dd   :  { %v4528_v63 = vsub.f32 %v4526_v59, %v4527_v0  ;;  %v4533_v4 = vmul.f32 %v4529_v19, %v4484_v37  ;;  %v4532_v61 = vmul.f32 %v4529_v19, %v7586_v23  ;;  %v4530_v58 = vmul.f32 %v4529_v19, %v7584_v57 }
0x16de   :  { %v4531_v24 = vmul.f32 %v4529_v19, %v7582_v25  ;;  %v6720_v25 = vld [vmem:[#allocation2 + $0x828] sm:$0xff] }
0x16df   :  { %v4534_v3 = vperm.slane %v4528_v63, 0  ;;  %4725 = vmatpush.bf16.msra.mxu3 %v6720_v25 }
0x16e1   :  { %v4538_v29 = vadd.f32 %v4534_v3, %v4533_v4  ;;  %v4537_v33 = vadd.f32 %v4534_v3, %v4532_v61  ;;  %v4535_v22 = vadd.f32 %v4534_v3, %v4530_v58  ;;  %v4536_v26 = vadd.f32 %v4534_v3, %v4531_v24 }
0x16e3   :  { %v4542_v16 = vmax.f32 %v4538_v29, 0.0  ;;  %v4541_v21 = vmax.f32 %v4537_v33, 0.0  ;;  %v4539_v17 = vmax.f32 %v4535_v22, 0.0  ;;  %v4540_v15 = vmax.f32 %v4536_v26, 0.0  ;;  %4726 = vmatpush.bf16.msra.mxu3 %v6719_v2  ;;  %v6746_v33 = vld [vmem:[#allocation2 + $0x8f8] sm:$0xff] }
0x16e5   :  { %v4546_v51 = vpack.c.bf16 %v4542_v16, %v4542_v16  ;;  %v4545_v37 = vpack.c.bf16 %v4541_v21, %v4541_v21  ;;  %v4543_v11 = vpack.c.bf16 %v4539_v17, %v4539_v17  ;;  %v4544_v39 = vpack.c.bf16 %v4540_v15, %v4540_v15  ;;  %v6745_v17 = vld [vmem:[#allocation2 + $0x8f0] sm:$0xff] }
0x16e7   :  { %v4554_v23 = vunpack.c.l.b16 %v4546_v51  ;;  %v4553_v14 = vunpack.c.l.b16 %v4545_v37  ;;  %v4551_v57 = vunpack.c.l.b16 %v4543_v11  ;;  %v4552_v42 = vunpack.c.l.b16 %v4544_v39  ;;  %4727 = vmatpush.bf16.msra.mxu3 %v6718_v56  ;;  %v6744_v11 = vld [vmem:[#allocation2 + $0x8e8] sm:$0xff]  ;;  %v6742_v56 = vld [vmem:[#allocation2 + $0x8d8] sm:$0xff] }
0x16e9   :  { %v4556_v49 = vpack.c.b16 %v4554_v23, %v4553_v14  ;;  %v4555_v28 = vpack.c.b16 %v4552_v42, %v4551_v57  ;;  %v6743_v42 = vld [vmem:[#allocation2 + $0x8e0] sm:$0xff] }
0x16eb   :  { %4565 = vmatpush.bf16.msra.mxu0 %v4556_v49  ;;  %4750 = vmatmul.bf16.vlgmr.msra.gmra.mxu1 %v4555_v28 }
0x16ec   :  { %4728 = vmatpush.bf16.msra.mxu3 %v6717_v6 }
0x16ef   :  { %4566 = vmatpush.bf16.msra.mxu0 %v4555_v28 }
0x16f0   :  { %4729 = vmatpush.bf16.msra.mxu3 %v6716_v43 }
0x16f2   :  { %6290 = vmatmul.msk.bf16.vlgmr.msra.gmra.mxu0 %vm122_vm0, %v7608_v34 }
0x16f4   :  { %4730 = vmatpush.bf16.msra.mxu3 %v6715_v60 }
0x16f8   :  { %5021 = vmatpush.bf16.msrb.mxu3 %v6746_v33 }
0x16fb   :  { %4755 = vmatmul.bf16.gmra.mxu1 %v4556_v49 }
0x16fc   :  { %5022 = vmatpush.bf16.msrb.mxu3 %v6745_v17 }
0x1700   :  { %5023 = vmatpush.bf16.msrb.mxu3 %v6744_v11 }
0x1702   :  { %6291 = vmatmul.msk.bf16.gmra.mxu0 %vm122_vm0, %v7615_v36 }
0x1704   :  { %5024 = vmatpush.bf16.msrb.mxu3 %v6743_v42  ;;  %v6731_v42 = vld [vmem:[#allocation2 + $0x880] sm:$0xff] }
0x1708   :  { %5025 = vmatpush.bf16.msrb.mxu3 %v6742_v56 }
0x1768   :  { %v4751_v53 = vpop.f32.mrf.mxu1 }
0x176f   :  { %v4568_v54 = vpop.f32.mrf.mxu0 }
0x1770   :  { %v4578_v31 = vpack.c.bf16 %v4568_v54, %v4568_v54  ;;  %v4753_v32 = vpop.f32.mrf.mxu1  ;;  %v6741_v54 = vld [vmem:[#allocation2 + $0x8d0] sm:$0xff] }
0x1771   :  { %5026 = vmatpush.bf16.msrb.mxu3 %v6741_v54 }
0x1772   :  { %v4586_v55 = vunpack.c.l.b16 %v4578_v31 }
0x1777   :  { %v4570_v5 = vpop.f32.mrf.mxu0 }
0x1778   :  { %v4579_v44 = vpack.c.bf16 %v4570_v5, %v4570_v5  ;;  %v4756_v1 = vpop.f32.mrf.mxu1 }
0x177a   :  { %v4587_v30 = vunpack.c.l.b16 %v4579_v44  ;;  %v6740_v44 = vld [vmem:[#allocation2 + $0x8c8] sm:$0xff] }
0x177b   :  { %5027 = vmatpush.bf16.msrb.mxu3 %v6740_v44 }
0x177c   :  { %v4590_v38 = vpack.c.b16 %v4587_v30, %v4586_v55  ;;  %v6739_v55 = vld [vmem:[#allocation2 + $0x8c0] sm:$0xff] }
0x177e   :  { %4731 = vmatmul.bf16.vlgmr.msra.gmra.mxu3 %v4590_v38 }
0x177f   :  { %v4573_v13 = vpop.f32.mrf.mxu0  ;;  %5028 = vmatpush.bf16.msrb.mxu3 %v6739_v55 }
0x1780   :  { %v4580_v50 = vpack.c.bf16 %v4573_v13, %v4573_v13  ;;  %v4758_v3 = vpop.f32.mrf.mxu1 }
0x1782   :  { %v4588_v48 = vunpack.c.l.b16 %v4580_v50 }
0x1787   :  { %v4575_v40 = vpop.f32.mrf.mxu0 }
0x1788   :  { %v4581_v46 = vpack.c.bf16 %v4575_v40, %v4575_v40 }
0x178a   :  { %v4589_v45 = vunpack.c.l.b16 %v4581_v46  ;;  %v4788_v46 = vld [vmem:[#allocation5 + $0x10] sm:$0x1] }
0x178c   :  { %v4591_v9 = vpack.c.b16 %v4589_v45, %v4588_v48 }
0x178e   :  { %4736 = vmatmul.bf16.gmra.mxu3 %v4591_v9 }
0x1801   :  { %v4732_v41 = vpop.f32.mrf.mxu3 }
0x1802   :  { %v7621_v20 = vadd.f32 %v4751_v53, %v4732_v41  ;;  %v4801_v53 = vld [vmem:[%s7673_s5 + $0x10] sm:$0x1] }
0x1804   :  { %v4771_v19 = vmul.f32 %v7621_v20, %v7621_v20 }
0x1809   :  { %v4734_v52 = vpop.f32.mrf.mxu3 }
0x180a   :  { %v7619_v7 = vadd.f32 %v4753_v32, %v4734_v52 }
0x180c   :  { %v4772_v0 = vmul.f32 %v7619_v7, %v7619_v7  ;;  %v4761_v63 = vadd.f32 %v7619_v7, %v7621_v20 }
0x180e   :  { %v4775_v58 = vadd.f32 %v4772_v0, %v4771_v19 }
0x1811   :  { %v4737_v10 = vpop.f32.mrf.mxu3 }
0x1812   :  { %v7623_v59 = vadd.f32 %v4756_v1, %v4737_v10 }
0x1814   :  { %v4773_v4 = vmul.f32 %v7623_v59, %v7623_v59  ;;  %v4762_v24 = vadd.f32 %v4761_v63, %v7623_v59 }
0x1816   :  { %v4776_v22 = vadd.f32 %v4775_v58, %v4773_v4 }
0x1819   :  { %v4739_v61 = vpop.f32.mrf.mxu3 }
0x181a   :  { %v4759_v29 = vadd.f32 %v4758_v3, %v4739_v61 }
0x181c   :  { %v4763_v26 = vadd.f32 %v4762_v24, %v4759_v29  ;;  %v4774_v35 = vmul.f32 %v4759_v29, %v4759_v29 }
0x181e   :  { %v4764_v16 = vrot.slane %v4763_v26, 4  ;;  %v4777_v21 = vadd.f32 %v4776_v22, %v4774_v35  ;;  %v6738_v35 = vld [vmem:[#allocation2 + $0x8b8] sm:$0xff] }
0x181f   :  { %5002 = vmatpush.bf16.msrb.mxu0 %v6738_v35 }
0x1820   :  { %v4765_v15 = vadd.f32 %v4764_v16, %v4763_v26  ;;  %v4778_v12 = vrot.slane %v4777_v21, 4 }
0x1822   :  { %v4766_v51 = vrot.slane %v4765_v15, 2  ;;  %v4779_v37 = vadd.f32 %v4778_v12, %v4777_v21 }
0x1824   :  { %v4767_v39 = vadd.f32 %v4766_v51, %v4765_v15  ;;  %v4780_v23 = vrot.slane %v4779_v37, 2 }
0x1826   :  { %v4768_v14 = vrot.slane %v4767_v39, 1  ;;  %v4781_v57 = vadd.f32 %v4780_v23, %v4779_v37  ;;  %v6736_v23 = vld [vmem:[#allocation2 + $0x8a8] sm:$0xff] }
0x1828   :  { %v4769_v25 = vadd.f32 %v4768_v14, %v4767_v39  ;;  %v4782_v49 = vrot.slane %v4781_v57, 1 }
0x182a   :  { %v4770_v28 = vmul.f32 %v4769_v25, %v7027_v8  ;;  %v4783_v2 = vadd.f32 %v4782_v49, %v4781_v57  ;;  %v6732_v57 = vld [vmem:[#allocation2 + $0x888] sm:$0xff] }
0x182c   :  { %v4784_v6 = vmul.f32 %v4783_v2, %v7027_v8  ;;  %v4785_v43 = vmul.f32 %v4770_v28, %v4770_v28 }
0x182e   :  { %v4786_v60 = vsub.f32 %v4784_v6, %v4785_v43 }
0x1830   :  { %v4787_v31 = vmax.f32 %v4786_v60, 0.0 }
0x1832   :  { %v4789_v5 = vadd.f32 1e-05, %v4787_v31 }
0x1834   :  { %6800 = vrsqrt.f32 %v4789_v5  ;;  %vm4796_vm6 = vweird.f32 %v4789_v5 }
0x183a   :  { %v6801_v30 = vpop.eup %6800 }
0x183b   :  { %v4791_v38 = vmul.f32 %v6801_v30, %v4789_v5  ;;  %vm4797_vm5 = vweird.f32 %v6801_v30 }
0x183c   :  { %vm4798_vm7 = vmor %vm4796_vm6, %vm4797_vm5 }
0x183d   :  { %v4792_v13 = vmul.f32 %v6801_v30, %v4791_v38 }
0x183f   :  { %v4793_v50 = vmul.f32 0.5, %v4792_v13 }
0x1841   :  { %v4794_v40 = vsub.f32 1.5, %v4793_v50 }
0x1843   :  { %v4795_v48 = vmul.f32 %v6801_v30, %v4794_v40 }
0x1845   :  { %v4799_v45 = vsel %vm4798_vm7, %v6801_v30, %v4795_v48 }
0x1846   :  { %v4800_v9 = vmul.f32 %v4799_v45, %v4788_v46 }
0x1848   :  { %v4802_v41 = vmul.f32 %v4800_v9, %v4770_v28  ;;  %v4804_v32 = vperm.slane %v4800_v9, 0 }
0x184a   :  { %v4803_v52 = vsub.f32 %v4801_v53, %v4802_v41  ;;  %v4808_v1 = vmul.f32 %v4804_v32, %v4759_v29  ;;  %v4807_v0 = vmul.f32 %v4804_v32, %v7623_v59  ;;  %v4805_v19 = vmul.f32 %v4804_v32, %v7621_v20  ;;  %v6737_v20 = vld [vmem:[#allocation2 + $0x8b0] sm:$0xff] }
0x184b   :  { %v4806_v63 = vmul.f32 %v4804_v32, %v7619_v7  ;;  %5003 = vmatpush.bf16.msrb.mxu0 %v6737_v20 }
0x184c   :  { %v4809_v10 = vperm.slane %v4803_v52, 0 }
0x184e   :  { %v4813_v4 = vadd.f32 %v4809_v10, %v4808_v1  ;;  %v4812_v3 = vadd.f32 %v4809_v10, %v4807_v0  ;;  %v4810_v61 = vadd.f32 %v4809_v10, %v4805_v19  ;;  %v4811_v58 = vadd.f32 %v4809_v10, %v4806_v63 }
0x184f   :  { %5004 = vmatpush.bf16.msrb.mxu0 %v6736_v23 }
0x1850   :  { %v4817_v24 = vmax.f32 %v4813_v4, 0.0  ;;  %v4816_v33 = vmax.f32 %v4812_v3, 0.0  ;;  %v4814_v22 = vmax.f32 %v4810_v61, 0.0  ;;  %v4815_v26 = vmax.f32 %v4811_v58, 0.0 }
0x1852   :  { %v4821_v16 = vadd.f32 %v4817_v24, %v7559_v62  ;;  %v4820_v29 = vadd.f32 %v4816_v33, %v7562_v47  ;;  %v4818_v21 = vadd.f32 %v4814_v22, %v7565_v18  ;;  %v4819_v59 = vadd.f32 %v4815_v26, %v7568_v27  ;;  %v6735_v47 = vld [vmem:[#allocation2 + $0x8a0] sm:$0xff]  ;;  %v6734_v18 = vld [vmem:[#allocation2 + $0x898] sm:$0xff]  ;;  %v6733_v27 = vld [vmem:[#allocation2 + $0x890] sm:$0xff] }
0x1853   :  { %5005 = vmatpush.bf16.msrb.mxu0 %v6735_v47  ;;  %v6753_v47 = vld [vmem:[#allocation7 + $0x30] sm:$0xff] }
0x1854   :  { %v4824_v7 = vpack.c.bf16 %v4820_v29, %v4820_v29  ;;  %v4825_v17 = vpack.c.bf16 %v4821_v16, %v4821_v16  ;;  %v4822_v15 = vpack.c.bf16 %v4818_v21, %v4818_v21  ;;  %v4823_v12 = vpack.c.bf16 %v4819_v59, %v4819_v59 }
0x1856   :  { %v4832_v51 = vunpack.c.l.b16 %v4824_v7  ;;  %v4833_v37 = vunpack.c.l.b16 %v4825_v17  ;;  %v4830_v11 = vunpack.c.l.b16 %v4822_v15  ;;  %v4831_v39 = vunpack.c.l.b16 %v4823_v12 }
0x1857   :  { %5006 = vmatpush.bf16.msrb.mxu0 %v6734_v18 }
0x1858   :  { %v4835_v14 = vpack.c.b16 %v4833_v37, %v4832_v51  ;;  %v4834_v62 = vpack.c.b16 %v4831_v39, %v4830_v11 }
0x185a   :  { %4844 = vmatpush.bf16.msra.mxu2 %v4835_v14  ;;  %5029 = vmatmul.bf16.vlgmr.msrb.gmra.mxu3 %v4834_v62 }
0x185b   :  { %5007 = vmatpush.bf16.msrb.mxu0 %v6733_v27 }
0x185e   :  { %4845 = vmatpush.bf16.msra.mxu2 %v4834_v62 }
0x185f   :  { %5008 = vmatpush.bf16.msrb.mxu0 %v6732_v57  ;;  %v6752_v57 = vld [vmem:[#allocation7 + $0x28] sm:$0xff] }
0x1861   :  { %6356 = vmatmul.msk.bf16.vlgmr.msra.gmra.mxu2 %vm122_vm0, %v7608_v34 }
0x1863   :  { %5009 = vmatpush.bf16.msrb.mxu0 %v6731_v42  ;;  %v5067_v42 = vld [vmem:[#allocation5 + $0x11] sm:$0x1] }
0x186a   :  { %5034 = vmatmul.bf16.gmra.mxu3 %v4835_v14  ;;  %v6754_v14 = vld [vmem:[#allocation7 + $0x38] sm:$0xff] }
0x186b   :  { %5185 = vmatpush.bf16.msrb.mxu2 %v6754_v14 }
0x186f   :  { %5186 = vmatpush.bf16.msrb.mxu2 %v6753_v47 }
0x1871   :  { %6357 = vmatmul.msk.bf16.gmra.mxu2 %vm122_vm0, %v7615_v36 }
0x1873   :  { %5187 = vmatpush.bf16.msrb.mxu2 %v6752_v57 }
0x18dd   :  { %v5030_v55 = vpop.f32.mrf.mxu3 }
0x18e4   :  { %v4847_v25 = vpop.f32.mrf.mxu2 }
0x18e5   :  { %v4857_v49 = vpack.c.bf16 %v4847_v25, %v4847_v25  ;;  %v5032_v38 = vpop.f32.mrf.mxu3 }
0x18e7   :  { %v4865_v56 = vunpack.c.l.b16 %v4857_v49  ;;  %v6751_v49 = vld [vmem:[#allocation7 + $0x20] sm:$0xff] }
0x18e8   :  { %5188 = vmatpush.bf16.msrb.mxu2 %v6751_v49 }
0x18ec   :  { %v4849_v28 = vpop.f32.mrf.mxu2 }
0x18ed   :  { %v4858_v2 = vpack.c.bf16 %v4849_v28, %v4849_v28  ;;  %v5035_v50 = vpop.f32.mrf.mxu3 }
0x18ef   :  { %v4866_v34 = vunpack.c.l.b16 %v4858_v2  ;;  %v5080_v2 = vld [vmem:[%s7673_s5 + $0x11] sm:$0x1] }
0x18f1   :  { %v4869_v6 = vpack.c.b16 %v4866_v34, %v4865_v56 }
0x18f3   :  { %5010 = vmatmul.bf16.vlgmr.msrb.gmra.mxu0 %v4869_v6  ;;  %v6750_v6 = vld [vmem:[#allocation7 + $0x18] sm:$0xff] }
0x18f4   :  { %v4852_v43 = vpop.f32.mrf.mxu2  ;;  %5189 = vmatpush.bf16.msrb.mxu2 %v6750_v6 }
0x18f5   :  { %v4859_v36 = vpack.c.bf16 %v4852_v43, %v4852_v43  ;;  %v5037_v52 = vpop.f32.mrf.mxu3 }
0x18f7   :  { %v4867_v31 = vunpack.c.l.b16 %v4859_v36 }
0x18fc   :  { %v4854_v60 = vpop.f32.mrf.mxu2 }
0x18fd   :  { %v4860_v54 = vpack.c.bf16 %v4854_v60, %v4854_v60 }
0x18ff   :  { %v4868_v5 = vunpack.c.l.b16 %v4860_v54 }
0x1901   :  { %v4870_v44 = vpack.c.b16 %v4868_v5, %v4867_v31 }
0x1903   :  { %5015 = vmatmul.bf16.gmra.mxu0 %v4870_v44  ;;  %v6749_v44 = vld [vmem:[#allocation7 + $0x10] sm:$0xff] }
0x1904   :  { %5190 = vmatpush.bf16.msrb.mxu2 %v6749_v44 }
0x1970   :  { %v5011_v30 = vpop.f32.mrf.mxu0 }
0x1971   :  { %v5031_v48 = vadd.f32 %v5030_v55, %v5011_v30 }
0x1973   :  { %v5050_v53 = vmul.f32 %v5031_v48, %v5031_v48 }
0x1978   :  { %v5013_v13 = vpop.f32.mrf.mxu0 }
0x1979   :  { %v7650_v46 = vadd.f32 %v5032_v38, %v5013_v13 }
0x197b   :  { %v5051_v9 = vmul.f32 %v7650_v46, %v7650_v46  ;;  %v5040_v41 = vadd.f32 %v7650_v46, %v5031_v48 }
0x197d   :  { %v5054_v10 = vadd.f32 %v5051_v9, %v5050_v53  ;;  %v6748_v9 = vld [vmem:[#allocation7 + $0x8] sm:$0xff] }
0x197e   :  { %5191 = vmatpush.bf16.msrb.mxu2 %v6748_v9 }
0x1980   :  { %v5016_v40 = vpop.f32.mrf.mxu0 }
0x1981   :  { %v5036_v45 = vadd.f32 %v5035_v50, %v5016_v40 }
0x1983   :  { %v5052_v32 = vmul.f32 %v5036_v45, %v5036_v45  ;;  %v5041_v0 = vadd.f32 %v5040_v41, %v5036_v45 }
0x1985   :  { %v5055_v63 = vadd.f32 %v5054_v10, %v5052_v32 }
0x1988   :  { %v5018_v1 = vpop.f32.mrf.mxu0 }
0x1989   :  { %v5038_v19 = vadd.f32 %v5037_v52, %v5018_v1 }
0x198b   :  { %v5042_v4 = vadd.f32 %v5041_v0, %v5038_v19  ;;  %v5053_v3 = vmul.f32 %v5038_v19, %v5038_v19  ;;  %v6765_v0 = vld [vmem:[#allocation8] ss:$0 sm:$0xff] }
0x198d   :  { %v5043_v61 = vrot.slane %v5042_v4, 4  ;;  %v5056_v58 = vadd.f32 %v5055_v63, %v5053_v3 }
0x198f   :  { %v5044_v24 = vadd.f32 %v5043_v61, %v5042_v4  ;;  %v5057_v33 = vrot.slane %v5056_v58, 4 }
0x1991   :  { %v5045_v22 = vrot.slane %v5044_v24, 2  ;;  %v5058_v26 = vadd.f32 %v5057_v33, %v5056_v58 }
0x1993   :  { %v5046_v35 = vadd.f32 %v5045_v22, %v5044_v24  ;;  %v5059_v16 = vrot.slane %v5058_v26, 2 }
0x1995   :  { %v5047_v29 = vrot.slane %v5046_v35, 1  ;;  %v5060_v21 = vadd.f32 %v5059_v16, %v5058_v26 }
0x1997   :  { %v5048_v59 = vadd.f32 %v5047_v29, %v5046_v35  ;;  %v5061_v20 = vrot.slane %v5060_v21, 1 }
0x1999   :  { %v5049_v7 = vmul.f32 %v5048_v59, %v7027_v8  ;;  %v5062_v17 = vadd.f32 %v5061_v20, %v5060_v21 }
0x199b   :  { %v5063_v15 = vmul.f32 %v5062_v17, %v7027_v8  ;;  %v5064_v12 = vmul.f32 %v5049_v7, %v5049_v7 }
0x199d   :  { %v5065_v51 = vsub.f32 %v5063_v15, %v5064_v12 }
0x199f   :  { %v5066_v37 = vmax.f32 %v5065_v51, 0.0 }
0x19a1   :  { %v5068_v11 = vadd.f32 1e-05, %v5066_v37 }
0x19a3   :  { %6802 = vrsqrt.f32 %v5068_v11  ;;  %vm5075_vm9 = vweird.f32 %v5068_v11 }
0x19a9   :  { %v6803_v39 = vpop.eup %6802 }
0x19aa   :  { %v5070_v23 = vmul.f32 %v6803_v39, %v5068_v11  ;;  %vm5076_vm8 = vweird.f32 %v6803_v39 }
0x19ab   :  { %vm5077_vm10 = vmor %vm5075_vm9, %vm5076_vm8 }
0x19ac   :  { %v5071_v62 = vmul.f32 %v6803_v39, %v5070_v23 }
0x19ae   :  { %v5072_v18 = vmul.f32 0.5, %v5071_v62 }
0x19b0   :  { %v5073_v27 = vsub.f32 1.5, %v5072_v18 }
0x19b2   :  { %v5074_v25 = vmul.f32 %v6803_v39, %v5073_v27 }
0x19b4   :  { %v5078_v8 = vsel %vm5077_vm10, %v6803_v39, %v5074_v25 }
0x19b5   :  { %v5079_v28 = vmul.f32 %v5078_v8, %v5067_v42 }
0x19b7   :  { %v5081_v56 = vmul.f32 %v5079_v28, %v5049_v7  ;;  %v5083_v34 = vperm.slane %v5079_v28, 0 }
0x19b9   :  { %v5082_v43 = vsub.f32 %v5080_v2, %v5081_v56  ;;  %v5087_v36 = vmul.f32 %v5083_v34, %v5038_v19  ;;  %v5086_v54 = vmul.f32 %v5083_v34, %v5036_v45  ;;  %v5084_v31 = vmul.f32 %v5083_v34, %v5031_v48  ;;  %v6747_v48 = vld [vmem:[#allocation7] sm:$0xff] }
0x19ba   :  { %v5085_v5 = vmul.f32 %v5083_v34, %v7650_v46  ;;  %v5097_v46 = vld [vmem:[%s7670_s2] sm:$0x1]  ;;  %5192 = vmatpush.bf16.msrb.mxu2 %v6747_v48 }
0x19bb   :  { %v5088_v60 = vperm.slane %v5082_v43, 0 }
0x19bd   :  { %v5092_v55 = vadd.f32 %v5088_v60, %v5087_v36  ;;  %v5091_v30 = vadd.f32 %v5088_v60, %v5086_v54  ;;  %v5089_v38 = vadd.f32 %v5088_v60, %v5084_v31  ;;  %v5090_v13 = vadd.f32 %v5088_v60, %v5085_v5 }
0x19bf   :  { %v5096_v50 = vmax.f32 %v5092_v55, 0.0  ;;  %v5095_v40 = vmax.f32 %v5091_v30, 0.0  ;;  %v5093_v41 = vmax.f32 %v5089_v38, 0.0  ;;  %v5094_v32 = vmax.f32 %v5090_v13, 0.0 }
0x19c1   :  { %v5099_v53 = vpack.c.bf16 %v5096_v50, %v5095_v40  ;;  %v5098_v52 = vpack.c.bf16 %v5094_v32, %v5093_v41 }
0x19c3   :  { %5109 = vmatpush.bf16.msrb.mxu1 %v5099_v53 }
0x19c7   :  { %5110 = vmatpush.bf16.msrb.mxu1 %v5098_v52 }
0x19ca   :  { %6422 = vmatmul.msk.bf16.vlgmr.msrb.gmra.mxu1 %vm122_vm0, %v5097_v46 }
0x1a47   :  { %v5112_v45 = vpop.f32.mrf.mxu1 }
0x1a48   :  { %v5116_v1 = vpack.c.bf16 %v5112_v45, %v5112_v45 }
0x1a4a   :  { %5193 = vmatmul.bf16.vlgmr.msrb.gmra.mxu2 %v5116_v1 }
0x1a4f   :  { %v5114_v10 = vpop.f32.mrf.mxu1 }
0x1acd   :  { %v5194_v19 = vpop.f32.mrf.mxu2 }
0x1ace   :  { %v5195_v63 = vadd.f32 %v6765_v0, %v5194_v19 }
0x1ad0   :  { %5198 = vst [vmem:[#allocation10] sm:$0x3] %v5195_v63 }
0x1ad1   :  { %5209 = dma.vmem_to_hbm [thread:$0]  %s5205_s9, 32, %s5207_s12, [#allocation4]  }
0x1ad5   :  { %v5196_v4 = vpop.f32.mrf.mxu2 }
0x1ad6   :  { %6938 = dma.done.wait [#allocation4], 32  }
0x1ad7   :  { %6939 = vsyncadd [#allocation4], 4294967264 }
0x1ad8   :  { %5214 = vsyncpa [#allocation3], 1 }
0x1ad9   :  { %5215 = vsyncpa [#allocation6], 1 }
0x1ada   :  { %5216 = vsyncpa [#allocation9], 1 }
0x1adb   :  { %5217 = vsyncpa [#allocation4], 1 }

</bundles_post_ra>
